<compile_context>
chip_gen: v7x
topology: tpu7x:2x2x1
jax: 0.10.0
libtpu: 0.0.40
codegen_flags: <defaults>
</compile_context>

<pallas_src>
import functools

import jax
import jax.numpy as jnp
from jax import lax
from jax.experimental import pallas as pl
from jax.experimental.pallas import tpu as pltpu


def _round_up(v, m):
    return -(-int(v) // m) * m


def _vmem_capacity_bytes():
    """Per-generation VMEM capacity (v5e/v6e: 128 MiB, v7x: 64 MiB)."""
    try:
        return int(pltpu.get_tpu_info().vmem_capacity_bytes)
    except Exception:
        return 64 * 2 ** 20   # conservative (v7x-sized) fallback


def _tile_bytes(shape, dtype):
    """Approximate VMEM footprint of one buffer, rounded up to (8, 128) tiles."""
    itemsize = jnp.dtype(dtype).itemsize
    shape = (1,) * max(0, 2 - len(shape)) + tuple(int(d) for d in shape)
    lead = 1
    for d in shape[:-2]:
        lead *= d
    return lead * _round_up(shape[-2], 8) * _round_up(shape[-1], 128) * itemsize


def _qlstm_kernel(x_ref, wih_ref, whh_ref, bias_ref, h0_ref, c0_ref,
                  y_ref, hout_ref, cout_ref,
                  proj_s, h_s, c_s,
                  *, seq_len, batch_pad, hidden_pad, chunk):
    """One grid step == one chunk of `chunk` LSTM time steps.

    All operands are time-major and pre-flattened so every access is dense:
      x_ref    : (chunk*Bp, I)    rows ordered (t, b)
      wih_ref  : (I, 4*Hp)        W_ih^T, gate columns padded to 128 lanes
      whh_ref  : (Hp, 4*Hp)       W_hh^T, gate columns padded to 128 lanes
      bias_ref : (1, 4*Hp)        f32, b_ih + b_hh (pre-summed in f32)
      h0/c0    : (Bp, Hp)         initial state
      y_ref    : (chunk*Bp, Hp)   time-major hidden outputs
      hout/cout: (Bp, Hp)         final state (written once, last chunk)
      proj_s   : (chunk*Bp, 4Hp)  f32 scratch — hoisted input projection
      h_s, c_s : (Bp, Hp) f32     recurrent state carried across chunks
    """
    cidx = pl.program_id(0)
    Bp = batch_pad
    Hp = hidden_pad
    n_chunks = pl.cdiv(seq_len, chunk)          # static python int
    tail = seq_len - (n_chunks - 1) * chunk     # static python int

    @pl.when(cidx == 0)
    def _():
        # state_quantizer == identity.
        h_s[...] = h0_ref[...].astype(jnp.float32)
        c_s[...] = c0_ref[...].astype(jnp.float32)

    # ---- Hoisted input projection for the whole chunk (no sequential dep):
    # one (chunk*Bp, I) x (I, 4Hp) MXU matmul + f32 bias, one dense store into
    # time-major scratch.  (weight_quantizer == identity.)
    proj_s[...] = (
        jnp.dot(x_ref[...], wih_ref[...], preferred_element_type=jnp.float32)
        + bias_ref[...]
    )

    whh = whh_ref[...]

    def step(t, carry):
        h, c = carry
        row = t * Bp
        if not isinstance(row, int):
            row = pl.multiple_of(row, 8)
        gates = proj_s[pl.ds(row, Bp), :] + jnp.dot(
            h, whh, preferred_element_type=jnp.float32)
        # Gate columns are padded to 128-lane boundaries, so each slice is
        # lane-tile aligned (no per-step XLU shifts on the serial path).
        i_g = jax.nn.sigmoid(gates[:, 0 * Hp:1 * Hp])   # input gate
        f_g = jax.nn.sigmoid(gates[:, 1 * Hp:2 * Hp])   # forget gate
        g_g = jnp.tanh(gates[:, 2 * Hp:3 * Hp])         # cell gate
        o_g = jax.nn.sigmoid(gates[:, 3 * Hp:4 * Hp])   # output gate
        c_new = f_g * c + i_g * g_g
        h_new = o_g * jnp.tanh(c_new)
        # Dense (Bp, Hp) tile-aligned store straight into the output block.
        y_ref[pl.ds(row, Bp), :] = h_new.astype(y_ref.dtype)
        return h_new, c_new

    def run(n_steps):
        carry0 = (h_s[...], c_s[...])
        if n_steps <= 32:
            # Fully static unroll: scheduler overlaps y stores / proj loads
            # with the MXU + EUP latency of the serial chain.
            carry = carry0
            for t in range(n_steps):
                carry = step(t, carry)
            h_f, c_f = carry
        else:
            h_f, c_f = lax.fori_loop(0, n_steps, step, carry0, unroll=8)
        h_s[...] = h_f
        c_s[...] = c_f

    if tail == chunk:
        run(chunk)                     # every chunk full: one static trip count
    else:
        @pl.when(cidx < n_chunks - 1)
        def _():
            run(chunk)

        @pl.when(cidx == n_chunks - 1)
        def _():
            run(tail)                  # ragged tail, still a static trip count

    # Final states are written exactly once.
    @pl.when(cidx == n_chunks - 1)
    def _():
        hout_ref[...] = h_s[...].astype(hout_ref.dtype)
        cout_ref[...] = c_s[...].astype(cout_ref.dtype)


@functools.partial(jax.jit, static_argnames=("batch_first", "time_chunk"))
def qlstm_forward(x, weight_ih, weight_hh, bias_ih, bias_hh, state=None,
                  batch_first=True, time_chunk=None):
    """LSTM forward matching _QLSTMBase(_QLSTMCellBase), identity quantizers.

    x: (B, T, I) if batch_first else (T, B, I); a 2-D (T, I) input is treated
    as unbatched like the torch module.  Returns (result, (h_n, c_n)).
    """
    if x.ndim == 2:
        # Unbatched path: run with B == 1 and squeeze, like the torch module.
        y, (h_n, c_n) = qlstm_forward(x[None], weight_ih, weight_hh, bias_ih,
                                      bias_hh, state=state, batch_first=True,
                                      time_chunk=time_chunk)
        return y[0], (h_n[0], c_n[0])

    # Time-major layout for the kernel (batch_first=False is already (T, B, I)).
    x_tbi = jnp.transpose(x, (1, 0, 2)) if batch_first else x
    T, B, I = x_tbi.shape
    H = weight_hh.shape[1]
    dtype = x.dtype

    # Tile-dense padding: batch to a full sublane tile, hidden to a lane tile.
    Bp = _round_up(max(B, 1), 8)
    Hp = _round_up(H, 128)
    G = 4 * Hp

    # ---- operand prep (weight_quantizer == identity) ----
    def pad_gate_cols(w):              # (4H, K) -> (K, 4*Hp), zero-padded gates
        K = w.shape[1]
        w4 = w.reshape(4, H, K)
        w4 = jnp.zeros((4, Hp, K), w.dtype).at[:, :H, :].set(w4)
        return jnp.transpose(w4, (2, 0, 1)).reshape(K, G)

    wih_t = pad_gate_cols(weight_ih.astype(dtype))                    # (I, 4Hp)
    whh_small = pad_gate_cols(weight_hh.astype(dtype))                # (H, 4Hp)
    whh_t = jnp.zeros((Hp, G), dtype).at[:H, :].set(whh_small)        # (Hp, 4Hp)
    # Pre-sum biases in f32 (correctness feedback), pad gate columns.
    b_sum = (bias_ih.astype(jnp.float32)
             + bias_hh.astype(jnp.float32)).reshape(4, H)
    bias = jnp.zeros((4, Hp), jnp.float32).at[:, :H].set(b_sum).reshape(1, G)

    if state is None:
        h0 = jnp.zeros((Bp, Hp), dtype)
        c0 = jnp.zeros((Bp, Hp), dtype)
    else:
        # state_quantizer == identity; torch passes (1, B, H) and squeezes.
        h0 = jnp.zeros((Bp, Hp), dtype).at[:B, :H].set(
            state[0].reshape(B, H).astype(dtype))
        c0 = jnp.zeros((Bp, Hp), dtype).at[:B, :H].set(
            state[1].reshape(B, H).astype(dtype))

    # Time-major, batch-padded, flattened x (row = t*Bp + b): every kernel
    # access is lane/sublane dense with zero in-kernel relayout.
    if Bp != B:
        x_tbi = jnp.pad(x_tbi, ((0, 0), (0, Bp - B), (0, 0)))
    x2d = x_tbi.reshape(T * Bp, I)

    # ---- generation-aware chunk selection & VMEM budget ----
    vmem_cap = _vmem_capacity_bytes()
    budget = min(int(vmem_cap * 0.8), vmem_cap - (8 << 20))
    fixed = (2 * (_tile_bytes((I, G), dtype) + _tile_bytes((Hp, G), dtype)
                  + _tile_bytes((1, G), jnp.float32)
                  + 2 * _tile_bytes((Bp, Hp), dtype))        # resident inputs x2
             + 2 * 2 * _tile_bytes((Bp, Hp), dtype)           # hout / cout
             + 2 * _tile_bytes((Bp, Hp), jnp.float32))        # h_s / c_s scratch
    per_step = (2 * _tile_bytes((Bp, I), dtype)               # x block (dbl buf)
                + 2 * _tile_bytes((Bp, Hp), dtype)            # y block (dbl buf)
                + _tile_bytes((Bp, G), jnp.float32))          # proj_s scratch
    chunk = int(max(8, min((budget - fixed) // max(per_step, 1), 512)))
    if time_chunk is not None:
        chunk = min(chunk, max(1, int(time_chunk)))
    if chunk >= T:
        chunk = T
    else:
        chunk = max(8, (chunk // 8) * 8)
    num_chunks = pl.cdiv(T, chunk)

    est = fixed + chunk * per_step
    vmem_limit = int(min(max(2 * est + (4 << 20), 32 << 20),
                         max(vmem_cap - (2 << 20), 32 << 20)))

    grid_spec = pltpu.PrefetchScalarGridSpec(
        num_scalar_prefetch=0,
        grid=(num_chunks,),
        in_specs=[
            pl.BlockSpec((chunk * Bp, I), lambda c: (c, 0)),   # x rows, chunk c
            # Loop-invariant operands (constant index maps -> VMEM resident).
            pl.BlockSpec((I, G), lambda c: (0, 0)),            # W_ih^T
            pl.BlockSpec((Hp, G), lambda c: (0, 0)),           # W_hh^T
            pl.BlockSpec((1, G), lambda c: (0, 0)),            # b_ih + b_hh (f32)
            pl.BlockSpec((Bp, Hp), lambda c: (0, 0)),          # h0
            pl.BlockSpec((Bp, Hp), lambda c: (0, 0)),          # c0
        ],
        out_specs=[
            pl.BlockSpec((chunk * Bp, Hp), lambda c: (c, 0)),  # y rows, chunk c
            pl.BlockSpec((Bp, Hp), lambda c: (0, 0)),          # final h
            pl.BlockSpec((Bp, Hp), lambda c: (0, 0)),          # final c
        ],
        scratch_shapes=[
            pltpu.VMEM((chunk * Bp, G), jnp.float32),          # hoisted projection
            pltpu.VMEM((Bp, Hp), jnp.float32),                 # h carry
            pltpu.VMEM((Bp, Hp), jnp.float32),                 # c carry
        ],
    )

    kernel = functools.partial(_qlstm_kernel, seq_len=T, batch_pad=Bp,
                               hidden_pad=Hp, chunk=chunk)
    y2d, h_out, c_out = pl.pallas_call(
        kernel,
        grid_spec=grid_spec,
        out_shape=(
            jax.ShapeDtypeStruct((T * Bp, Hp), dtype),
            jax.ShapeDtypeStruct((Bp, Hp), dtype),
            jax.ShapeDtypeStruct((Bp, Hp), dtype),
        ),
        compiler_params=pltpu.CompilerParams(
            dimension_semantics=("arbitrary",),   # sequential carry across chunks
            vmem_limit_bytes=vmem_limit,
        ),
    )(x2d, wih_t, whh_t, bias, h0, c0)

    y = y2d.reshape(T, Bp, Hp)[:, :B, :H]
    result = jnp.transpose(y, (1, 0, 2)) if batch_first else y
    h_n = h_out[:B, :H][None]
    c_n = c_out[:B, :H][None]
    return result, (h_n, c_n)


def _reference_forward(x, weight_ih, weight_hh, bias_ih, bias_hh, state=None,
                       batch_first=True):
    """Pure-JAX reference mirroring the PyTorch module (identity quantizers)."""
    x_tbi = jnp.transpose(x, (1, 0, 2)) if batch_first else x
    T, B, I = x_tbi.shape
    H = weight_hh.shape[1]
    if state is None:
        h = jnp.zeros((B, H), x.dtype)
        c = jnp.zeros((B, H), x.dtype)
    else:
        h = state[0].reshape(B, H)
        c = state[1].reshape(B, H)

    def step(carry, x_t):
        h, c = carry
        gates = (jnp.dot(x_t, weight_ih.T, precision=lax.Precision.HIGHEST)
                 + jnp.dot(h, weight_hh.T, precision=lax.Precision.HIGHEST)
                 + bias_ih + bias_hh)
        i = jax.nn.sigmoid(gates[:, 0 * H:1 * H])
        f = jax.nn.sigmoid(gates[:, 1 * H:2 * H])
        g = jnp.tanh(gates[:, 2 * H:3 * H])
        o = jax.nn.sigmoid(gates[:, 3 * H:4 * H])
        c = f * c + i * g
        h = o * jnp.tanh(c)
        return (h, c), h

    (h, c), ys = lax.scan(step, (h, c), x_tbi)
    result = jnp.transpose(ys, (1, 0, 2)) if batch_first else ys
    return result, (h[None], c[None])


if __name__ == "__main__":
    B, T, I, H = 2, 20, 16, 32   # small shapes; T=20 exercises a ragged tail

    key = jax.random.PRNGKey(0)
    k = jax.random.split(key, 7)
    bound = 1.0 / float(jnp.sqrt(H))     # torch LSTMCell default init range
    x = jax.random.normal(k[0], (B, T, I), dtype=jnp.float32)
    weight_ih = jax.random.uniform(k[1], (4 * H, I), minval=-bound, maxval=bound)
    weight_hh = jax.random.uniform(k[2], (4 * H, H), minval=-bound, maxval=bound)
    bias_ih = jax.random.uniform(k[3], (4 * H,), minval=-bound, maxval=bound)
    bias_hh = jax.random.uniform(k[4], (4 * H,), minval=-bound, maxval=bound)
    h0 = jax.random.normal(k[5], (1, B, H), dtype=jnp.float32)
    c0 = jax.random.normal(k[6], (1, B, H), dtype=jnp.float32)

    # --- default chunking (single chunk), zero initial state ---
    out, (h_n, c_n) = qlstm_forward(x, weight_ih, weight_hh, bias_ih, bias_hh)
    jax.block_until_ready((out, h_n, c_n))
    ref_out, (ref_h, ref_c) = _reference_forward(x, weight_ih, weight_hh,
                                                 bias_ih, bias_hh)
    assert out.shape == (B, T, H) and h_n.shape == (1, B, H) and c_n.shape == (1, B, H)
    assert jnp.allclose(out, ref_out, atol=1e-3)
    assert jnp.allclose(h_n, ref_h, atol=1e-3)
    assert jnp.allclose(c_n, ref_c, atol=1e-3)

    # --- multi-chunk with carried state + ragged tail (20 = 8+8+4), explicit state ---
    out2, (h_n2, c_n2) = qlstm_forward(x, weight_ih, weight_hh, bias_ih, bias_hh,
                                       state=(h0, c0), time_chunk=8)
    jax.block_until_ready((out2, h_n2, c_n2))
    ref_out2, (ref_h2, ref_c2) = _reference_forward(x, weight_ih, weight_hh,
                                                    bias_ih, bias_hh,
                                                    state=(h0, c0))
    assert jnp.allclose(out2, ref_out2, atol=1e-3)
    assert jnp.allclose(h_n2, ref_h2, atol=1e-3)
    assert jnp.allclose(c_n2, ref_c2, atol=1e-3)

    # --- unbatched 2-D input path (like the torch module) ---
    out3, (h_n3, c_n3) = qlstm_forward(x[0], weight_ih, weight_hh, bias_ih, bias_hh)
    jax.block_until_ready((out3, h_n3, c_n3))
    assert out3.shape == (T, H) and h_n3.shape == (1, H)
    assert jnp.allclose(out3, ref_out[0], atol=1e-3)

    print("KERNEL_OK")
</pallas_src>

<mosaic_0001>
module attributes {stable_mosaic.version = 11 : i64} {
  func.func @_qlstm_kernel(%arg0: i32, %arg1: memref<160x16xf32, #tpu.memory_space<vmem>>, %arg2: memref<16x512xf32, #tpu.memory_space<vmem>>, %arg3: memref<128x512xf32, #tpu.memory_space<vmem>>, %arg4: memref<1x512xf32, #tpu.memory_space<vmem>>, %arg5: memref<8x128xf32, #tpu.memory_space<vmem>>, %arg6: memref<8x128xf32, #tpu.memory_space<vmem>>, %arg7: memref<160x128xf32, #tpu.memory_space<vmem>>, %arg8: memref<8x128xf32, #tpu.memory_space<vmem>>, %arg9: memref<8x128xf32, #tpu.memory_space<vmem>>, %arg10: memref<160x512xf32, #tpu.memory_space<vmem>>, %arg11: memref<8x128xf32, #tpu.memory_space<vmem>>, %arg12: memref<8x128xf32, #tpu.memory_space<vmem>>) attributes {dimension_semantics = [#tpu.dimension_semantics<arbitrary>], iteration_bounds = array<i64: 1>, scalar_prefetch = 0 : i64, scratch_operands = 3 : i64, tpu.core_type = #tpu.core_type<tc>, window_params = [{transform_indices = @transform_0, window_bounds = array<i64: 160, 16>}, {pipeline_mode = #tpu.pipeline_mode<synchronous>, transform_indices = @transform_1, window_bounds = array<i64: 16, 512>}, {pipeline_mode = #tpu.pipeline_mode<synchronous>, transform_indices = @transform_2, window_bounds = array<i64: 128, 512>}, {pipeline_mode = #tpu.pipeline_mode<synchronous>, transform_indices = @transform_3, window_bounds = array<i64: 1, 512>}, {pipeline_mode = #tpu.pipeline_mode<synchronous>, transform_indices = @transform_4, window_bounds = array<i64: 8, 128>}, {pipeline_mode = #tpu.pipeline_mode<synchronous>, transform_indices = @transform_5, window_bounds = array<i64: 8, 128>}, {transform_indices = @transform_6, window_bounds = array<i64: 160, 128>}, {pipeline_mode = #tpu.pipeline_mode<synchronous>, transform_indices = @transform_7, window_bounds = array<i64: 8, 128>}, {pipeline_mode = #tpu.pipeline_mode<synchronous>, transform_indices = @transform_8, window_bounds = array<i64: 8, 128>}]} {
    %c0_i32 = arith.constant 0 : i32
    %0 = arith.cmpi eq, %arg0, %c0_i32 : i32
    %1 = arith.extui %0 : i1 to i32
    %c0_i32_0 = arith.constant 0 : i32
    %2 = arith.cmpi ne, %1, %c0_i32_0 : i32
    scf.if %2 {
      %c0_161 = arith.constant 0 : index
      %c0_162 = arith.constant 0 : index
      %598 = vector.load %arg5[%c0_161, %c0_162] : memref<8x128xf32, #tpu.memory_space<vmem>>, vector<8x128xf32>
      %c0_163 = arith.constant 0 : index
      %c0_164 = arith.constant 0 : index
      %599 = vector.load %arg11[%c0_163, %c0_164] : memref<8x128xf32, #tpu.memory_space<vmem>>, vector<8x128xf32>
      tpu.vector_store %arg11[%c0_163, %c0_164], %598 {strides = array<i32>} : memref<8x128xf32, #tpu.memory_space<vmem>>, vector<8x128xf32>,
      %c0_165 = arith.constant 0 : index
      %c0_166 = arith.constant 0 : index
      %600 = vector.load %arg6[%c0_165, %c0_166] : memref<8x128xf32, #tpu.memory_space<vmem>>, vector<8x128xf32>
      %c0_167 = arith.constant 0 : index
      %c0_168 = arith.constant 0 : index
      %601 = vector.load %arg12[%c0_167, %c0_168] : memref<8x128xf32, #tpu.memory_space<vmem>>, vector<8x128xf32>
      tpu.vector_store %arg12[%c0_167, %c0_168], %600 {strides = array<i32>} : memref<8x128xf32, #tpu.memory_space<vmem>>, vector<8x128xf32>,
    } else {
    }
    %c0 = arith.constant 0 : index
    %c0_1 = arith.constant 0 : index
    %3 = vector.load %arg1[%c0, %c0_1] : memref<160x16xf32, #tpu.memory_space<vmem>>, vector<160x16xf32>
    %c0_2 = arith.constant 0 : index
    %c0_3 = arith.constant 0 : index
    %4 = vector.load %arg2[%c0_2, %c0_3] : memref<16x512xf32, #tpu.memory_space<vmem>>, vector<16x512xf32>
    %cst = arith.constant dense<0.000000e+00> : vector<160x512xf32>
    %5 = tpu.matmul %3, %4, %cst {dimension_numbers = #tpu.dot_dimension_numbers<[1], [0], [0], [1], [0, 0, 1, 1], [], []>} : vector<160x16xf32>, vector<16x512xf32>, vector<160x512xf32> -> vector<160x512xf32>
    %c0_4 = arith.constant 0 : index
    %c0_5 = arith.constant 0 : index
    %6 = vector.load %arg4[%c0_4, %c0_5] : memref<1x512xf32, #tpu.memory_space<vmem>>, vector<1x512xf32>
    %7 = vector.broadcast %6 : vector<1x512xf32> to vector<160x512xf32>
    %8 = arith.addf %5, %7 : vector<160x512xf32>
    %c0_6 = arith.constant 0 : index
    %c0_7 = arith.constant 0 : index
    %9 = vector.load %arg10[%c0_6, %c0_7] : memref<160x512xf32, #tpu.memory_space<vmem>>, vector<160x512xf32>
    tpu.vector_store %arg10[%c0_6, %c0_7], %8 {strides = array<i32>} : memref<160x512xf32, #tpu.memory_space<vmem>>, vector<160x512xf32>,
    %c0_8 = arith.constant 0 : index
    %c0_9 = arith.constant 0 : index
    %10 = vector.load %arg3[%c0_8, %c0_9] : memref<128x512xf32, #tpu.memory_space<vmem>>, vector<128x512xf32>
    %c0_10 = arith.constant 0 : index
    %c0_11 = arith.constant 0 : index
    %11 = vector.load %arg11[%c0_10, %c0_11] : memref<8x128xf32, #tpu.memory_space<vmem>>, vector<8x128xf32>
    %c0_12 = arith.constant 0 : index
    %c0_13 = arith.constant 0 : index
    %12 = vector.load %arg12[%c0_12, %c0_13] : memref<8x128xf32, #tpu.memory_space<vmem>>, vector<8x128xf32>
    %c0_14 = arith.constant 0 : index
    %c0_15 = arith.constant 0 : index
    %13 = vector.load %arg10[%c0_14, %c0_15] : memref<160x512xf32, #tpu.memory_space<vmem>>, vector<8x512xf32>
    %cst_16 = arith.constant dense<0.000000e+00> : vector<8x512xf32>
    %14 = tpu.matmul %11, %10, %cst_16 {dimension_numbers = #tpu.dot_dimension_numbers<[1], [0], [0], [1], [0, 0, 1, 1], [], []>} : vector<8x128xf32>, vector<128x512xf32>, vector<8x512xf32> -> vector<8x512xf32>
    %15 = arith.addf %13, %14 : vector<8x512xf32>
    %16 = vector.extract_strided_slice %15 {offsets = [0, 0], sizes = [8, 128], strides = [1, 1]} : vector<8x512xf32> to vector<8x128xf32>
    %17 = arith.negf %16 : vector<8x128xf32>
    %18 = math.exp %17 : vector<8x128xf32>
    %cst_17 = arith.constant 1.000000e+00 : f32
    %19 = vector.broadcast %cst_17 : f32 to vector<8x128xf32>
    %20 = arith.addf %19, %18 : vector<8x128xf32>
    %21 = arith.divf %19, %20 : vector<8x128xf32>
    %22 = vector.extract_strided_slice %15 {offsets = [0, 128], sizes = [8, 128], strides = [1, 1]} : vector<8x512xf32> to vector<8x128xf32>
    %23 = arith.negf %22 : vector<8x128xf32>
    %24 = math.exp %23 : vector<8x128xf32>
    %cst_18 = arith.constant 1.000000e+00 : f32
    %25 = vector.broadcast %cst_18 : f32 to vector<8x128xf32>
    %26 = arith.addf %25, %24 : vector<8x128xf32>
    %27 = arith.divf %25, %26 : vector<8x128xf32>
    %28 = vector.extract_strided_slice %15 {offsets = [0, 256], sizes = [8, 128], strides = [1, 1]} : vector<8x512xf32> to vector<8x128xf32>
    %29 = math.tanh %28 : vector<8x128xf32>
    %30 = vector.extract_strided_slice %15 {offsets = [0, 384], sizes = [8, 128], strides = [1, 1]} : vector<8x512xf32> to vector<8x128xf32>
    %31 = arith.negf %30 : vector<8x128xf32>
    %32 = math.exp %31 : vector<8x128xf32>
    %cst_19 = arith.constant 1.000000e+00 : f32
    %33 = vector.broadcast %cst_19 : f32 to vector<8x128xf32>
    %34 = arith.addf %33, %32 : vector<8x128xf32>
    %35 = arith.divf %33, %34 : vector<8x128xf32>
    %36 = arith.mulf %27, %12 : vector<8x128xf32>
    %37 = arith.mulf %21, %29 : vector<8x128xf32>
    %38 = arith.addf %36, %37 : vector<8x128xf32>
    %39 = math.tanh %38 : vector<8x128xf32>
    %40 = arith.mulf %35, %39 : vector<8x128xf32>
    %c0_20 = arith.constant 0 : index
    %c0_21 = arith.constant 0 : index
    %41 = vector.load %arg7[%c0_20, %c0_21] : memref<160x128xf32, #tpu.memory_space<vmem>>, vector<8x128xf32>
    tpu.vector_store %arg7[%c0_20, %c0_21], %40 {strides = array<i32>} : memref<160x128xf32, #tpu.memory_space<vmem>>, vector<8x128xf32>,
    %c8 = arith.constant 8 : index
    %c0_22 = arith.constant 0 : index
    %42 = vector.load %arg10[%c8, %c0_22] : memref<160x512xf32, #tpu.memory_space<vmem>>, vector<8x512xf32>
    %cst_23 = arith.constant dense<0.000000e+00> : vector<8x512xf32>
    %43 = tpu.matmul %40, %10, %cst_23 {dimension_numbers = #tpu.dot_dimension_numbers<[1], [0], [0], [1], [0, 0, 1, 1], [], []>} : vector<8x128xf32>, vector<128x512xf32>, vector<8x512xf32> -> vector<8x512xf32>
    %44 = arith.addf %42, %43 : vector<8x512xf32>
    %45 = vector.extract_strided_slice %44 {offsets = [0, 0], sizes = [8, 128], strides = [1, 1]} : vector<8x512xf32> to vector<8x128xf32>
    %46 = arith.negf %45 : vector<8x128xf32>
    %47 = math.exp %46 : vector<8x128xf32>
    %cst_24 = arith.constant 1.000000e+00 : f32
    %48 = vector.broadcast %cst_24 : f32 to vector<8x128xf32>
    %49 = arith.addf %48, %47 : vector<8x128xf32>
    %50 = arith.divf %48, %49 : vector<8x128xf32>
    %51 = vector.extract_strided_slice %44 {offsets = [0, 128], sizes = [8, 128], strides = [1, 1]} : vector<8x512xf32> to vector<8x128xf32>
    %52 = arith.negf %51 : vector<8x128xf32>
    %53 = math.exp %52 : vector<8x128xf32>
    %cst_25 = arith.constant 1.000000e+00 : f32
    %54 = vector.broadcast %cst_25 : f32 to vector<8x128xf32>
    %55 = arith.addf %54, %53 : vector<8x128xf32>
    %56 = arith.divf %54, %55 : vector<8x128xf32>
    %57 = vector.extract_strided_slice %44 {offsets = [0, 256], sizes = [8, 128], strides = [1, 1]} : vector<8x512xf32> to vector<8x128xf32>
    %58 = math.tanh %57 : vector<8x128xf32>
    %59 = vector.extract_strided_slice %44 {offsets = [0, 384], sizes = [8, 128], strides = [1, 1]} : vector<8x512xf32> to vector<8x128xf32>
    %60 = arith.negf %59 : vector<8x128xf32>
    %61 = math.exp %60 : vector<8x128xf32>
    %cst_26 = arith.constant 1.000000e+00 : f32
    %62 = vector.broadcast %cst_26 : f32 to vector<8x128xf32>
    %63 = arith.addf %62, %61 : vector<8x128xf32>
    %64 = arith.divf %62, %63 : vector<8x128xf32>
    %65 = arith.mulf %56, %38 : vector<8x128xf32>
    %66 = arith.mulf %50, %58 : vector<8x128xf32>
    %67 = arith.addf %65, %66 : vector<8x128xf32>
    %68 = math.tanh %67 : vector<8x128xf32>
    %69 = arith.mulf %64, %68 : vector<8x128xf32>
    %c8_27 = arith.constant 8 : index
    %c0_28 = arith.constant 0 : index
    %70 = vector.load %arg7[%c8_27, %c0_28] : memref<160x128xf32, #tpu.memory_space<vmem>>, vector<8x128xf32>
    tpu.vector_store %arg7[%c8_27, %c0_28], %69 {strides = array<i32>} : memref<160x128xf32, #tpu.memory_space<vmem>>, vector<8x128xf32>,
    %c16 = arith.constant 16 : index
    %c0_29 = arith.constant 0 : index
    %71 = vector.load %arg10[%c16, %c0_29] : memref<160x512xf32, #tpu.memory_space<vmem>>, vector<8x512xf32>
    %cst_30 = arith.constant dense<0.000000e+00> : vector<8x512xf32>
    %72 = tpu.matmul %69, %10, %cst_30 {dimension_numbers = #tpu.dot_dimension_numbers<[1], [0], [0], [1], [0, 0, 1, 1], [], []>} : vector<8x128xf32>, vector<128x512xf32>, vector<8x512xf32> -> vector<8x512xf32>
    %73 = arith.addf %71, %72 : vector<8x512xf32>
    %74 = vector.extract_strided_slice %73 {offsets = [0, 0], sizes = [8, 128], strides = [1, 1]} : vector<8x512xf32> to vector<8x128xf32>
    %75 = arith.negf %74 : vector<8x128xf32>
    %76 = math.exp %75 : vector<8x128xf32>
    %cst_31 = arith.constant 1.000000e+00 : f32
    %77 = vector.broadcast %cst_31 : f32 to vector<8x128xf32>
    %78 = arith.addf %77, %76 : vector<8x128xf32>
    %79 = arith.divf %77, %78 : vector<8x128xf32>
    %80 = vector.extract_strided_slice %73 {offsets = [0, 128], sizes = [8, 128], strides = [1, 1]} : vector<8x512xf32> to vector<8x128xf32>
    %81 = arith.negf %80 : vector<8x128xf32>
    %82 = math.exp %81 : vector<8x128xf32>
    %cst_32 = arith.constant 1.000000e+00 : f32
    %83 = vector.broadcast %cst_32 : f32 to vector<8x128xf32>
    %84 = arith.addf %83, %82 : vector<8x128xf32>
    %85 = arith.divf %83, %84 : vector<8x128xf32>
    %86 = vector.extract_strided_slice %73 {offsets = [0, 256], sizes = [8, 128], strides = [1, 1]} : vector<8x512xf32> to vector<8x128xf32>
    %87 = math.tanh %86 : vector<8x128xf32>
    %88 = vector.extract_strided_slice %73 {offsets = [0, 384], sizes = [8, 128], strides = [1, 1]} : vector<8x512xf32> to vector<8x128xf32>
    %89 = arith.negf %88 : vector<8x128xf32>
    %90 = math.exp %89 : vector<8x128xf32>
    %cst_33 = arith.constant 1.000000e+00 : f32
    %91 = vector.broadcast %cst_33 : f32 to vector<8x128xf32>
    %92 = arith.addf %91, %90 : vector<8x128xf32>
    %93 = arith.divf %91, %92 : vector<8x128xf32>
    %94 = arith.mulf %85, %67 : vector<8x128xf32>
    %95 = arith.mulf %79, %87 : vector<8x128xf32>
    %96 = arith.addf %94, %95 : vector<8x128xf32>
    %97 = math.tanh %96 : vector<8x128xf32>
    %98 = arith.mulf %93, %97 : vector<8x128xf32>
    %c16_34 = arith.constant 16 : index
    %c0_35 = arith.constant 0 : index
    %99 = vector.load %arg7[%c16_34, %c0_35] : memref<160x128xf32, #tpu.memory_space<vmem>>, vector<8x128xf32>
    tpu.vector_store %arg7[%c16_34, %c0_35], %98 {strides = array<i32>} : memref<160x128xf32, #tpu.memory_space<vmem>>, vector<8x128xf32>,
    %c24 = arith.constant 24 : index
    %c0_36 = arith.constant 0 : index
    %100 = vector.load %arg10[%c24, %c0_36] : memref<160x512xf32, #tpu.memory_space<vmem>>, vector<8x512xf32>
    %cst_37 = arith.constant dense<0.000000e+00> : vector<8x512xf32>
    %101 = tpu.matmul %98, %10, %cst_37 {dimension_numbers = #tpu.dot_dimension_numbers<[1], [0], [0], [1], [0, 0, 1, 1], [], []>} : vector<8x128xf32>, vector<128x512xf32>, vector<8x512xf32> -> vector<8x512xf32>
    %102 = arith.addf %100, %101 : vector<8x512xf32>
    %103 = vector.extract_strided_slice %102 {offsets = [0, 0], sizes = [8, 128], strides = [1, 1]} : vector<8x512xf32> to vector<8x128xf32>
    %104 = arith.negf %103 : vector<8x128xf32>
    %105 = math.exp %104 : vector<8x128xf32>
    %cst_38 = arith.constant 1.000000e+00 : f32
    %106 = vector.broadcast %cst_38 : f32 to vector<8x128xf32>
    %107 = arith.addf %106, %105 : vector<8x128xf32>
    %108 = arith.divf %106, %107 : vector<8x128xf32>
    %109 = vector.extract_strided_slice %102 {offsets = [0, 128], sizes = [8, 128], strides = [1, 1]} : vector<8x512xf32> to vector<8x128xf32>
    %110 = arith.negf %109 : vector<8x128xf32>
    %111 = math.exp %110 : vector<8x128xf32>
    %cst_39 = arith.constant 1.000000e+00 : f32
    %112 = vector.broadcast %cst_39 : f32 to vector<8x128xf32>
    %113 = arith.addf %112, %111 : vector<8x128xf32>
    %114 = arith.divf %112, %113 : vector<8x128xf32>
    %115 = vector.extract_strided_slice %102 {offsets = [0, 256], sizes = [8, 128], strides = [1, 1]} : vector<8x512xf32> to vector<8x128xf32>
    %116 = math.tanh %115 : vector<8x128xf32>
    %117 = vector.extract_strided_slice %102 {offsets = [0, 384], sizes = [8, 128], strides = [1, 1]} : vector<8x512xf32> to vector<8x128xf32>
    %118 = arith.negf %117 : vector<8x128xf32>
    %119 = math.exp %118 : vector<8x128xf32>
    %cst_40 = arith.constant 1.000000e+00 : f32
    %120 = vector.broadcast %cst_40 : f32 to vector<8x128xf32>
    %121 = arith.addf %120, %119 : vector<8x128xf32>
    %122 = arith.divf %120, %121 : vector<8x128xf32>
    %123 = arith.mulf %114, %96 : vector<8x128xf32>
    %124 = arith.mulf %108, %116 : vector<8x128xf32>
    %125 = arith.addf %123, %124 : vector<8x128xf32>
    %126 = math.tanh %125 : vector<8x128xf32>
    %127 = arith.mulf %122, %126 : vector<8x128xf32>
    %c24_41 = arith.constant 24 : index
    %c0_42 = arith.constant 0 : index
    %128 = vector.load %arg7[%c24_41, %c0_42] : memref<160x128xf32, #tpu.memory_space<vmem>>, vector<8x128xf32>
    tpu.vector_store %arg7[%c24_41, %c0_42], %127 {strides = array<i32>} : memref<160x128xf32, #tpu.memory_space<vmem>>, vector<8x128xf32>,
    %c32 = arith.constant 32 : index
    %c0_43 = arith.constant 0 : index
    %129 = vector.load %arg10[%c32, %c0_43] : memref<160x512xf32, #tpu.memory_space<vmem>>, vector<8x512xf32>
    %cst_44 = arith.constant dense<0.000000e+00> : vector<8x512xf32>
    %130 = tpu.matmul %127, %10, %cst_44 {dimension_numbers = #tpu.dot_dimension_numbers<[1], [0], [0], [1], [0, 0, 1, 1], [], []>} : vector<8x128xf32>, vector<128x512xf32>, vector<8x512xf32> -> vector<8x512xf32>
    %131 = arith.addf %129, %130 : vector<8x512xf32>
    %132 = vector.extract_strided_slice %131 {offsets = [0, 0], sizes = [8, 128], strides = [1, 1]} : vector<8x512xf32> to vector<8x128xf32>
    %133 = arith.negf %132 : vector<8x128xf32>
    %134 = math.exp %133 : vector<8x128xf32>
    %cst_45 = arith.constant 1.000000e+00 : f32
    %135 = vector.broadcast %cst_45 : f32 to vector<8x128xf32>
    %136 = arith.addf %135, %134 : vector<8x128xf32>
    %137 = arith.divf %135, %136 : vector<8x128xf32>
    %138 = vector.extract_strided_slice %131 {offsets = [0, 128], sizes = [8, 128], strides = [1, 1]} : vector<8x512xf32> to vector<8x128xf32>
    %139 = arith.negf %138 : vector<8x128xf32>
    %140 = math.exp %139 : vector<8x128xf32>
    %cst_46 = arith.constant 1.000000e+00 : f32
    %141 = vector.broadcast %cst_46 : f32 to vector<8x128xf32>
    %142 = arith.addf %141, %140 : vector<8x128xf32>
    %143 = arith.divf %141, %142 : vector<8x128xf32>
    %144 = vector.extract_strided_slice %131 {offsets = [0, 256], sizes = [8, 128], strides = [1, 1]} : vector<8x512xf32> to vector<8x128xf32>
    %145 = math.tanh %144 : vector<8x128xf32>
    %146 = vector.extract_strided_slice %131 {offsets = [0, 384], sizes = [8, 128], strides = [1, 1]} : vector<8x512xf32> to vector<8x128xf32>
    %147 = arith.negf %146 : vector<8x128xf32>
    %148 = math.exp %147 : vector<8x128xf32>
    %cst_47 = arith.constant 1.000000e+00 : f32
    %149 = vector.broadcast %cst_47 : f32 to vector<8x128xf32>
    %150 = arith.addf %149, %148 : vector<8x128xf32>
    %151 = arith.divf %149, %150 : vector<8x128xf32>
    %152 = arith.mulf %143, %125 : vector<8x128xf32>
    %153 = arith.mulf %137, %145 : vector<8x128xf32>
    %154 = arith.addf %152, %153 : vector<8x128xf32>
    %155 = math.tanh %154 : vector<8x128xf32>
    %156 = arith.mulf %151, %155 : vector<8x128xf32>
    %c32_48 = arith.constant 32 : index
    %c0_49 = arith.constant 0 : index
    %157 = vector.load %arg7[%c32_48, %c0_49] : memref<160x128xf32, #tpu.memory_space<vmem>>, vector<8x128xf32>
    tpu.vector_store %arg7[%c32_48, %c0_49], %156 {strides = array<i32>} : memref<160x128xf32, #tpu.memory_space<vmem>>, vector<8x128xf32>,
    %c40 = arith.constant 40 : index
    %c0_50 = arith.constant 0 : index
    %158 = vector.load %arg10[%c40, %c0_50] : memref<160x512xf32, #tpu.memory_space<vmem>>, vector<8x512xf32>
    %cst_51 = arith.constant dense<0.000000e+00> : vector<8x512xf32>
    %159 = tpu.matmul %156, %10, %cst_51 {dimension_numbers = #tpu.dot_dimension_numbers<[1], [0], [0], [1], [0, 0, 1, 1], [], []>} : vector<8x128xf32>, vector<128x512xf32>, vector<8x512xf32> -> vector<8x512xf32>
    %160 = arith.addf %158, %159 : vector<8x512xf32>
    %161 = vector.extract_strided_slice %160 {offsets = [0, 0], sizes = [8, 128], strides = [1, 1]} : vector<8x512xf32> to vector<8x128xf32>
    %162 = arith.negf %161 : vector<8x128xf32>
    %163 = math.exp %162 : vector<8x128xf32>
    %cst_52 = arith.constant 1.000000e+00 : f32
    %164 = vector.broadcast %cst_52 : f32 to vector<8x128xf32>
    %165 = arith.addf %164, %163 : vector<8x128xf32>
    %166 = arith.divf %164, %165 : vector<8x128xf32>
    %167 = vector.extract_strided_slice %160 {offsets = [0, 128], sizes = [8, 128], strides = [1, 1]} : vector<8x512xf32> to vector<8x128xf32>
    %168 = arith.negf %167 : vector<8x128xf32>
    %169 = math.exp %168 : vector<8x128xf32>
    %cst_53 = arith.constant 1.000000e+00 : f32
    %170 = vector.broadcast %cst_53 : f32 to vector<8x128xf32>
    %171 = arith.addf %170, %169 : vector<8x128xf32>
    %172 = arith.divf %170, %171 : vector<8x128xf32>
    %173 = vector.extract_strided_slice %160 {offsets = [0, 256], sizes = [8, 128], strides = [1, 1]} : vector<8x512xf32> to vector<8x128xf32>
    %174 = math.tanh %173 : vector<8x128xf32>
    %175 = vector.extract_strided_slice %160 {offsets = [0, 384], sizes = [8, 128], strides = [1, 1]} : vector<8x512xf32> to vector<8x128xf32>
    %176 = arith.negf %175 : vector<8x128xf32>
    %177 = math.exp %176 : vector<8x128xf32>
    %cst_54 = arith.constant 1.000000e+00 : f32
    %178 = vector.broadcast %cst_54 : f32 to vector<8x128xf32>
    %179 = arith.addf %178, %177 : vector<8x128xf32>
    %180 = arith.divf %178, %179 : vector<8x128xf32>
    %181 = arith.mulf %172, %154 : vector<8x128xf32>
    %182 = arith.mulf %166, %174 : vector<8x128xf32>
    %183 = arith.addf %181, %182 : vector<8x128xf32>
    %184 = math.tanh %183 : vector<8x128xf32>
    %185 = arith.mulf %180, %184 : vector<8x128xf32>
    %c40_55 = arith.constant 40 : index
    %c0_56 = arith.constant 0 : index
    %186 = vector.load %arg7[%c40_55, %c0_56] : memref<160x128xf32, #tpu.memory_space<vmem>>, vector<8x128xf32>
    tpu.vector_store %arg7[%c40_55, %c0_56], %185 {strides = array<i32>} : memref<160x128xf32, #tpu.memory_space<vmem>>, vector<8x128xf32>,
    %c48 = arith.constant 48 : index
    %c0_57 = arith.constant 0 : index
    %187 = vector.load %arg10[%c48, %c0_57] : memref<160x512xf32, #tpu.memory_space<vmem>>, vector<8x512xf32>
    %cst_58 = arith.constant dense<0.000000e+00> : vector<8x512xf32>
    %188 = tpu.matmul %185, %10, %cst_58 {dimension_numbers = #tpu.dot_dimension_numbers<[1], [0], [0], [1], [0, 0, 1, 1], [], []>} : vector<8x128xf32>, vector<128x512xf32>, vector<8x512xf32> -> vector<8x512xf32>
    %189 = arith.addf %187, %188 : vector<8x512xf32>
    %190 = vector.extract_strided_slice %189 {offsets = [0, 0], sizes = [8, 128], strides = [1, 1]} : vector<8x512xf32> to vector<8x128xf32>
    %191 = arith.negf %190 : vector<8x128xf32>
    %192 = math.exp %191 : vector<8x128xf32>
    %cst_59 = arith.constant 1.000000e+00 : f32
    %193 = vector.broadcast %cst_59 : f32 to vector<8x128xf32>
    %194 = arith.addf %193, %192 : vector<8x128xf32>
    %195 = arith.divf %193, %194 : vector<8x128xf32>
    %196 = vector.extract_strided_slice %189 {offsets = [0, 128], sizes = [8, 128], strides = [1, 1]} : vector<8x512xf32> to vector<8x128xf32>
    %197 = arith.negf %196 : vector<8x128xf32>
    %198 = math.exp %197 : vector<8x128xf32>
    %cst_60 = arith.constant 1.000000e+00 : f32
    %199 = vector.broadcast %cst_60 : f32 to vector<8x128xf32>
    %200 = arith.addf %199, %198 : vector<8x128xf32>
    %201 = arith.divf %199, %200 : vector<8x128xf32>
    %202 = vector.extract_strided_slice %189 {offsets = [0, 256], sizes = [8, 128], strides = [1, 1]} : vector<8x512xf32> to vector<8x128xf32>
    %203 = math.tanh %202 : vector<8x128xf32>
    %204 = vector.extract_strided_slice %189 {offsets = [0, 384], sizes = [8, 128], strides = [1, 1]} : vector<8x512xf32> to vector<8x128xf32>
    %205 = arith.negf %204 : vector<8x128xf32>
    %206 = math.exp %205 : vector<8x128xf32>
    %cst_61 = arith.constant 1.000000e+00 : f32
    %207 = vector.broadcast %cst_61 : f32 to vector<8x128xf32>
    %208 = arith.addf %207, %206 : vector<8x128xf32>
    %209 = arith.divf %207, %208 : vector<8x128xf32>
    %210 = arith.mulf %201, %183 : vector<8x128xf32>
    %211 = arith.mulf %195, %203 : vector<8x128xf32>
    %212 = arith.addf %210, %211 : vector<8x128xf32>
    %213 = math.tanh %212 : vector<8x128xf32>
    %214 = arith.mulf %209, %213 : vector<8x128xf32>
    %c48_62 = arith.constant 48 : index
    %c0_63 = arith.constant 0 : index
    %215 = vector.load %arg7[%c48_62, %c0_63] : memref<160x128xf32, #tpu.memory_space<vmem>>, vector<8x128xf32>
    tpu.vector_store %arg7[%c48_62, %c0_63], %214 {strides = array<i32>} : memref<160x128xf32, #tpu.memory_space<vmem>>, vector<8x128xf32>,
    %c56 = arith.constant 56 : index
    %c0_64 = arith.constant 0 : index
    %216 = vector.load %arg10[%c56, %c0_64] : memref<160x512xf32, #tpu.memory_space<vmem>>, vector<8x512xf32>
    %cst_65 = arith.constant dense<0.000000e+00> : vector<8x512xf32>
    %217 = tpu.matmul %214, %10, %cst_65 {dimension_numbers = #tpu.dot_dimension_numbers<[1], [0], [0], [1], [0, 0, 1, 1], [], []>} : vector<8x128xf32>, vector<128x512xf32>, vector<8x512xf32> -> vector<8x512xf32>
    %218 = arith.addf %216, %217 : vector<8x512xf32>
    %219 = vector.extract_strided_slice %218 {offsets = [0, 0], sizes = [8, 128], strides = [1, 1]} : vector<8x512xf32> to vector<8x128xf32>
    %220 = arith.negf %219 : vector<8x128xf32>
    %221 = math.exp %220 : vector<8x128xf32>
    %cst_66 = arith.constant 1.000000e+00 : f32
    %222 = vector.broadcast %cst_66 : f32 to vector<8x128xf32>
    %223 = arith.addf %222, %221 : vector<8x128xf32>
    %224 = arith.divf %222, %223 : vector<8x128xf32>
    %225 = vector.extract_strided_slice %218 {offsets = [0, 128], sizes = [8, 128], strides = [1, 1]} : vector<8x512xf32> to vector<8x128xf32>
    %226 = arith.negf %225 : vector<8x128xf32>
    %227 = math.exp %226 : vector<8x128xf32>
    %cst_67 = arith.constant 1.000000e+00 : f32
    %228 = vector.broadcast %cst_67 : f32 to vector<8x128xf32>
    %229 = arith.addf %228, %227 : vector<8x128xf32>
    %230 = arith.divf %228, %229 : vector<8x128xf32>
    %231 = vector.extract_strided_slice %218 {offsets = [0, 256], sizes = [8, 128], strides = [1, 1]} : vector<8x512xf32> to vector<8x128xf32>
    %232 = math.tanh %231 : vector<8x128xf32>
    %233 = vector.extract_strided_slice %218 {offsets = [0, 384], sizes = [8, 128], strides = [1, 1]} : vector<8x512xf32> to vector<8x128xf32>
    %234 = arith.negf %233 : vector<8x128xf32>
    %235 = math.exp %234 : vector<8x128xf32>
    %cst_68 = arith.constant 1.000000e+00 : f32
    %236 = vector.broadcast %cst_68 : f32 to vector<8x128xf32>
    %237 = arith.addf %236, %235 : vector<8x128xf32>
    %238 = arith.divf %236, %237 : vector<8x128xf32>
    %239 = arith.mulf %230, %212 : vector<8x128xf32>
    %240 = arith.mulf %224, %232 : vector<8x128xf32>
    %241 = arith.addf %239, %240 : vector<8x128xf32>
    %242 = math.tanh %241 : vector<8x128xf32>
    %243 = arith.mulf %238, %242 : vector<8x128xf32>
    %c56_69 = arith.constant 56 : index
    %c0_70 = arith.constant 0 : index
    %244 = vector.load %arg7[%c56_69, %c0_70] : memref<160x128xf32, #tpu.memory_space<vmem>>, vector<8x128xf32>
    tpu.vector_store %arg7[%c56_69, %c0_70], %243 {strides = array<i32>} : memref<160x128xf32, #tpu.memory_space<vmem>>, vector<8x128xf32>,
    %c64 = arith.constant 64 : index
    %c0_71 = arith.constant 0 : index
    %245 = vector.load %arg10[%c64, %c0_71] : memref<160x512xf32, #tpu.memory_space<vmem>>, vector<8x512xf32>
    %cst_72 = arith.constant dense<0.000000e+00> : vector<8x512xf32>
    %246 = tpu.matmul %243, %10, %cst_72 {dimension_numbers = #tpu.dot_dimension_numbers<[1], [0], [0], [1], [0, 0, 1, 1], [], []>} : vector<8x128xf32>, vector<128x512xf32>, vector<8x512xf32> -> vector<8x512xf32>
    %247 = arith.addf %245, %246 : vector<8x512xf32>
    %248 = vector.extract_strided_slice %247 {offsets = [0, 0], sizes = [8, 128], strides = [1, 1]} : vector<8x512xf32> to vector<8x128xf32>
    %249 = arith.negf %248 : vector<8x128xf32>
    %250 = math.exp %249 : vector<8x128xf32>
    %cst_73 = arith.constant 1.000000e+00 : f32
    %251 = vector.broadcast %cst_73 : f32 to vector<8x128xf32>
    %252 = arith.addf %251, %250 : vector<8x128xf32>
    %253 = arith.divf %251, %252 : vector<8x128xf32>
    %254 = vector.extract_strided_slice %247 {offsets = [0, 128], sizes = [8, 128], strides = [1, 1]} : vector<8x512xf32> to vector<8x128xf32>
    %255 = arith.negf %254 : vector<8x128xf32>
    %256 = math.exp %255 : vector<8x128xf32>
    %cst_74 = arith.constant 1.000000e+00 : f32
    %257 = vector.broadcast %cst_74 : f32 to vector<8x128xf32>
    %258 = arith.addf %257, %256 : vector<8x128xf32>
    %259 = arith.divf %257, %258 : vector<8x128xf32>
    %260 = vector.extract_strided_slice %247 {offsets = [0, 256], sizes = [8, 128], strides = [1, 1]} : vector<8x512xf32> to vector<8x128xf32>
    %261 = math.tanh %260 : vector<8x128xf32>
    %262 = vector.extract_strided_slice %247 {offsets = [0, 384], sizes = [8, 128], strides = [1, 1]} : vector<8x512xf32> to vector<8x128xf32>
    %263 = arith.negf %262 : vector<8x128xf32>
    %264 = math.exp %263 : vector<8x128xf32>
    %cst_75 = arith.constant 1.000000e+00 : f32
    %265 = vector.broadcast %cst_75 : f32 to vector<8x128xf32>
    %266 = arith.addf %265, %264 : vector<8x128xf32>
    %267 = arith.divf %265, %266 : vector<8x128xf32>
    %268 = arith.mulf %259, %241 : vector<8x128xf32>
    %269 = arith.mulf %253, %261 : vector<8x128xf32>
    %270 = arith.addf %268, %269 : vector<8x128xf32>
    %271 = math.tanh %270 : vector<8x128xf32>
    %272 = arith.mulf %267, %271 : vector<8x128xf32>
    %c64_76 = arith.constant 64 : index
    %c0_77 = arith.constant 0 : index
    %273 = vector.load %arg7[%c64_76, %c0_77] : memref<160x128xf32, #tpu.memory_space<vmem>>, vector<8x128xf32>
    tpu.vector_store %arg7[%c64_76, %c0_77], %272 {strides = array<i32>} : memref<160x128xf32, #tpu.memory_space<vmem>>, vector<8x128xf32>,
    %c72 = arith.constant 72 : index
    %c0_78 = arith.constant 0 : index
    %274 = vector.load %arg10[%c72, %c0_78] : memref<160x512xf32, #tpu.memory_space<vmem>>, vector<8x512xf32>
    %cst_79 = arith.constant dense<0.000000e+00> : vector<8x512xf32>
    %275 = tpu.matmul %272, %10, %cst_79 {dimension_numbers = #tpu.dot_dimension_numbers<[1], [0], [0], [1], [0, 0, 1, 1], [], []>} : vector<8x128xf32>, vector<128x512xf32>, vector<8x512xf32> -> vector<8x512xf32>
    %276 = arith.addf %274, %275 : vector<8x512xf32>
    %277 = vector.extract_strided_slice %276 {offsets = [0, 0], sizes = [8, 128], strides = [1, 1]} : vector<8x512xf32> to vector<8x128xf32>
    %278 = arith.negf %277 : vector<8x128xf32>
    %279 = math.exp %278 : vector<8x128xf32>
    %cst_80 = arith.constant 1.000000e+00 : f32
    %280 = vector.broadcast %cst_80 : f32 to vector<8x128xf32>
    %281 = arith.addf %280, %279 : vector<8x128xf32>
    %282 = arith.divf %280, %281 : vector<8x128xf32>
    %283 = vector.extract_strided_slice %276 {offsets = [0, 128], sizes = [8, 128], strides = [1, 1]} : vector<8x512xf32> to vector<8x128xf32>
    %284 = arith.negf %283 : vector<8x128xf32>
    %285 = math.exp %284 : vector<8x128xf32>
    %cst_81 = arith.constant 1.000000e+00 : f32
    %286 = vector.broadcast %cst_81 : f32 to vector<8x128xf32>
    %287 = arith.addf %286, %285 : vector<8x128xf32>
    %288 = arith.divf %286, %287 : vector<8x128xf32>
    %289 = vector.extract_strided_slice %276 {offsets = [0, 256], sizes = [8, 128], strides = [1, 1]} : vector<8x512xf32> to vector<8x128xf32>
    %290 = math.tanh %289 : vector<8x128xf32>
    %291 = vector.extract_strided_slice %276 {offsets = [0, 384], sizes = [8, 128], strides = [1, 1]} : vector<8x512xf32> to vector<8x128xf32>
    %292 = arith.negf %291 : vector<8x128xf32>
    %293 = math.exp %292 : vector<8x128xf32>
    %cst_82 = arith.constant 1.000000e+00 : f32
    %294 = vector.broadcast %cst_82 : f32 to vector<8x128xf32>
    %295 = arith.addf %294, %293 : vector<8x128xf32>
    %296 = arith.divf %294, %295 : vector<8x128xf32>
    %297 = arith.mulf %288, %270 : vector<8x128xf32>
    %298 = arith.mulf %282, %290 : vector<8x128xf32>
    %299 = arith.addf %297, %298 : vector<8x128xf32>
    %300 = math.tanh %299 : vector<8x128xf32>
    %301 = arith.mulf %296, %300 : vector<8x128xf32>
    %c72_83 = arith.constant 72 : index
    %c0_84 = arith.constant 0 : index
    %302 = vector.load %arg7[%c72_83, %c0_84] : memref<160x128xf32, #tpu.memory_space<vmem>>, vector<8x128xf32>
    tpu.vector_store %arg7[%c72_83, %c0_84], %301 {strides = array<i32>} : memref<160x128xf32, #tpu.memory_space<vmem>>, vector<8x128xf32>,
    %c80 = arith.constant 80 : index
    %c0_85 = arith.constant 0 : index
    %303 = vector.load %arg10[%c80, %c0_85] : memref<160x512xf32, #tpu.memory_space<vmem>>, vector<8x512xf32>
    %cst_86 = arith.constant dense<0.000000e+00> : vector<8x512xf32>
    %304 = tpu.matmul %301, %10, %cst_86 {dimension_numbers = #tpu.dot_dimension_numbers<[1], [0], [0], [1], [0, 0, 1, 1], [], []>} : vector<8x128xf32>, vector<128x512xf32>, vector<8x512xf32> -> vector<8x512xf32>
    %305 = arith.addf %303, %304 : vector<8x512xf32>
    %306 = vector.extract_strided_slice %305 {offsets = [0, 0], sizes = [8, 128], strides = [1, 1]} : vector<8x512xf32> to vector<8x128xf32>
    %307 = arith.negf %306 : vector<8x128xf32>
    %308 = math.exp %307 : vector<8x128xf32>
    %cst_87 = arith.constant 1.000000e+00 : f32
    %309 = vector.broadcast %cst_87 : f32 to vector<8x128xf32>
    %310 = arith.addf %309, %308 : vector<8x128xf32>
    %311 = arith.divf %309, %310 : vector<8x128xf32>
    %312 = vector.extract_strided_slice %305 {offsets = [0, 128], sizes = [8, 128], strides = [1, 1]} : vector<8x512xf32> to vector<8x128xf32>
    %313 = arith.negf %312 : vector<8x128xf32>
    %314 = math.exp %313 : vector<8x128xf32>
    %cst_88 = arith.constant 1.000000e+00 : f32
    %315 = vector.broadcast %cst_88 : f32 to vector<8x128xf32>
    %316 = arith.addf %315, %314 : vector<8x128xf32>
    %317 = arith.divf %315, %316 : vector<8x128xf32>
    %318 = vector.extract_strided_slice %305 {offsets = [0, 256], sizes = [8, 128], strides = [1, 1]} : vector<8x512xf32> to vector<8x128xf32>
    %319 = math.tanh %318 : vector<8x128xf32>
    %320 = vector.extract_strided_slice %305 {offsets = [0, 384], sizes = [8, 128], strides = [1, 1]} : vector<8x512xf32> to vector<8x128xf32>
    %321 = arith.negf %320 : vector<8x128xf32>
    %322 = math.exp %321 : vector<8x128xf32>
    %cst_89 = arith.constant 1.000000e+00 : f32
    %323 = vector.broadcast %cst_89 : f32 to vector<8x128xf32>
    %324 = arith.addf %323, %322 : vector<8x128xf32>
    %325 = arith.divf %323, %324 : vector<8x128xf32>
    %326 = arith.mulf %317, %299 : vector<8x128xf32>
    %327 = arith.mulf %311, %319 : vector<8x128xf32>
    %328 = arith.addf %326, %327 : vector<8x128xf32>
    %329 = math.tanh %328 : vector<8x128xf32>
    %330 = arith.mulf %325, %329 : vector<8x128xf32>
    %c80_90 = arith.constant 80 : index
    %c0_91 = arith.constant 0 : index
    %331 = vector.load %arg7[%c80_90, %c0_91] : memref<160x128xf32, #tpu.memory_space<vmem>>, vector<8x128xf32>
    tpu.vector_store %arg7[%c80_90, %c0_91], %330 {strides = array<i32>} : memref<160x128xf32, #tpu.memory_space<vmem>>, vector<8x128xf32>,
    %c88 = arith.constant 88 : index
    %c0_92 = arith.constant 0 : index
    %332 = vector.load %arg10[%c88, %c0_92] : memref<160x512xf32, #tpu.memory_space<vmem>>, vector<8x512xf32>
    %cst_93 = arith.constant dense<0.000000e+00> : vector<8x512xf32>
    %333 = tpu.matmul %330, %10, %cst_93 {dimension_numbers = #tpu.dot_dimension_numbers<[1], [0], [0], [1], [0, 0, 1, 1], [], []>} : vector<8x128xf32>, vector<128x512xf32>, vector<8x512xf32> -> vector<8x512xf32>
    %334 = arith.addf %332, %333 : vector<8x512xf32>
    %335 = vector.extract_strided_slice %334 {offsets = [0, 0], sizes = [8, 128], strides = [1, 1]} : vector<8x512xf32> to vector<8x128xf32>
    %336 = arith.negf %335 : vector<8x128xf32>
    %337 = math.exp %336 : vector<8x128xf32>
    %cst_94 = arith.constant 1.000000e+00 : f32
    %338 = vector.broadcast %cst_94 : f32 to vector<8x128xf32>
    %339 = arith.addf %338, %337 : vector<8x128xf32>
    %340 = arith.divf %338, %339 : vector<8x128xf32>
    %341 = vector.extract_strided_slice %334 {offsets = [0, 128], sizes = [8, 128], strides = [1, 1]} : vector<8x512xf32> to vector<8x128xf32>
    %342 = arith.negf %341 : vector<8x128xf32>
    %343 = math.exp %342 : vector<8x128xf32>
    %cst_95 = arith.constant 1.000000e+00 : f32
    %344 = vector.broadcast %cst_95 : f32 to vector<8x128xf32>
    %345 = arith.addf %344, %343 : vector<8x128xf32>
    %346 = arith.divf %344, %345 : vector<8x128xf32>
    %347 = vector.extract_strided_slice %334 {offsets = [0, 256], sizes = [8, 128], strides = [1, 1]} : vector<8x512xf32> to vector<8x128xf32>
    %348 = math.tanh %347 : vector<8x128xf32>
    %349 = vector.extract_strided_slice %334 {offsets = [0, 384], sizes = [8, 128], strides = [1, 1]} : vector<8x512xf32> to vector<8x128xf32>
    %350 = arith.negf %349 : vector<8x128xf32>
    %351 = math.exp %350 : vector<8x128xf32>
    %cst_96 = arith.constant 1.000000e+00 : f32
    %352 = vector.broadcast %cst_96 : f32 to vector<8x128xf32>
    %353 = arith.addf %352, %351 : vector<8x128xf32>
    %354 = arith.divf %352, %353 : vector<8x128xf32>
    %355 = arith.mulf %346, %328 : vector<8x128xf32>
    %356 = arith.mulf %340, %348 : vector<8x128xf32>
    %357 = arith.addf %355, %356 : vector<8x128xf32>
    %358 = math.tanh %357 : vector<8x128xf32>
    %359 = arith.mulf %354, %358 : vector<8x128xf32>
    %c88_97 = arith.constant 88 : index
    %c0_98 = arith.constant 0 : index
    %360 = vector.load %arg7[%c88_97, %c0_98] : memref<160x128xf32, #tpu.memory_space<vmem>>, vector<8x128xf32>
    tpu.vector_store %arg7[%c88_97, %c0_98], %359 {strides = array<i32>} : memref<160x128xf32, #tpu.memory_space<vmem>>, vector<8x128xf32>,
    %c96 = arith.constant 96 : index
    %c0_99 = arith.constant 0 : index
    %361 = vector.load %arg10[%c96, %c0_99] : memref<160x512xf32, #tpu.memory_space<vmem>>, vector<8x512xf32>
    %cst_100 = arith.constant dense<0.000000e+00> : vector<8x512xf32>
    %362 = tpu.matmul %359, %10, %cst_100 {dimension_numbers = #tpu.dot_dimension_numbers<[1], [0], [0], [1], [0, 0, 1, 1], [], []>} : vector<8x128xf32>, vector<128x512xf32>, vector<8x512xf32> -> vector<8x512xf32>
    %363 = arith.addf %361, %362 : vector<8x512xf32>
    %364 = vector.extract_strided_slice %363 {offsets = [0, 0], sizes = [8, 128], strides = [1, 1]} : vector<8x512xf32> to vector<8x128xf32>
    %365 = arith.negf %364 : vector<8x128xf32>
    %366 = math.exp %365 : vector<8x128xf32>
    %cst_101 = arith.constant 1.000000e+00 : f32
    %367 = vector.broadcast %cst_101 : f32 to vector<8x128xf32>
    %368 = arith.addf %367, %366 : vector<8x128xf32>
    %369 = arith.divf %367, %368 : vector<8x128xf32>
    %370 = vector.extract_strided_slice %363 {offsets = [0, 128], sizes = [8, 128], strides = [1, 1]} : vector<8x512xf32> to vector<8x128xf32>
    %371 = arith.negf %370 : vector<8x128xf32>
    %372 = math.exp %371 : vector<8x128xf32>
    %cst_102 = arith.constant 1.000000e+00 : f32
    %373 = vector.broadcast %cst_102 : f32 to vector<8x128xf32>
    %374 = arith.addf %373, %372 : vector<8x128xf32>
    %375 = arith.divf %373, %374 : vector<8x128xf32>
    %376 = vector.extract_strided_slice %363 {offsets = [0, 256], sizes = [8, 128], strides = [1, 1]} : vector<8x512xf32> to vector<8x128xf32>
    %377 = math.tanh %376 : vector<8x128xf32>
    %378 = vector.extract_strided_slice %363 {offsets = [0, 384], sizes = [8, 128], strides = [1, 1]} : vector<8x512xf32> to vector<8x128xf32>
    %379 = arith.negf %378 : vector<8x128xf32>
    %380 = math.exp %379 : vector<8x128xf32>
    %cst_103 = arith.constant 1.000000e+00 : f32
    %381 = vector.broadcast %cst_103 : f32 to vector<8x128xf32>
    %382 = arith.addf %381, %380 : vector<8x128xf32>
    %383 = arith.divf %381, %382 : vector<8x128xf32>
    %384 = arith.mulf %375, %357 : vector<8x128xf32>
    %385 = arith.mulf %369, %377 : vector<8x128xf32>
    %386 = arith.addf %384, %385 : vector<8x128xf32>
    %387 = math.tanh %386 : vector<8x128xf32>
    %388 = arith.mulf %383, %387 : vector<8x128xf32>
    %c96_104 = arith.constant 96 : index
    %c0_105 = arith.constant 0 : index
    %389 = vector.load %arg7[%c96_104, %c0_105] : memref<160x128xf32, #tpu.memory_space<vmem>>, vector<8x128xf32>
    tpu.vector_store %arg7[%c96_104, %c0_105], %388 {strides = array<i32>} : memref<160x128xf32, #tpu.memory_space<vmem>>, vector<8x128xf32>,
    %c104 = arith.constant 104 : index
    %c0_106 = arith.constant 0 : index
    %390 = vector.load %arg10[%c104, %c0_106] : memref<160x512xf32, #tpu.memory_space<vmem>>, vector<8x512xf32>
    %cst_107 = arith.constant dense<0.000000e+00> : vector<8x512xf32>
    %391 = tpu.matmul %388, %10, %cst_107 {dimension_numbers = #tpu.dot_dimension_numbers<[1], [0], [0], [1], [0, 0, 1, 1], [], []>} : vector<8x128xf32>, vector<128x512xf32>, vector<8x512xf32> -> vector<8x512xf32>
    %392 = arith.addf %390, %391 : vector<8x512xf32>
    %393 = vector.extract_strided_slice %392 {offsets = [0, 0], sizes = [8, 128], strides = [1, 1]} : vector<8x512xf32> to vector<8x128xf32>
    %394 = arith.negf %393 : vector<8x128xf32>
    %395 = math.exp %394 : vector<8x128xf32>
    %cst_108 = arith.constant 1.000000e+00 : f32
    %396 = vector.broadcast %cst_108 : f32 to vector<8x128xf32>
    %397 = arith.addf %396, %395 : vector<8x128xf32>
    %398 = arith.divf %396, %397 : vector<8x128xf32>
    %399 = vector.extract_strided_slice %392 {offsets = [0, 128], sizes = [8, 128], strides = [1, 1]} : vector<8x512xf32> to vector<8x128xf32>
    %400 = arith.negf %399 : vector<8x128xf32>
    %401 = math.exp %400 : vector<8x128xf32>
    %cst_109 = arith.constant 1.000000e+00 : f32
    %402 = vector.broadcast %cst_109 : f32 to vector<8x128xf32>
    %403 = arith.addf %402, %401 : vector<8x128xf32>
    %404 = arith.divf %402, %403 : vector<8x128xf32>
    %405 = vector.extract_strided_slice %392 {offsets = [0, 256], sizes = [8, 128], strides = [1, 1]} : vector<8x512xf32> to vector<8x128xf32>
    %406 = math.tanh %405 : vector<8x128xf32>
    %407 = vector.extract_strided_slice %392 {offsets = [0, 384], sizes = [8, 128], strides = [1, 1]} : vector<8x512xf32> to vector<8x128xf32>
    %408 = arith.negf %407 : vector<8x128xf32>
    %409 = math.exp %408 : vector<8x128xf32>
    %cst_110 = arith.constant 1.000000e+00 : f32
    %410 = vector.broadcast %cst_110 : f32 to vector<8x128xf32>
    %411 = arith.addf %410, %409 : vector<8x128xf32>
    %412 = arith.divf %410, %411 : vector<8x128xf32>
    %413 = arith.mulf %404, %386 : vector<8x128xf32>
    %414 = arith.mulf %398, %406 : vector<8x128xf32>
    %415 = arith.addf %413, %414 : vector<8x128xf32>
    %416 = math.tanh %415 : vector<8x128xf32>
    %417 = arith.mulf %412, %416 : vector<8x128xf32>
    %c104_111 = arith.constant 104 : index
    %c0_112 = arith.constant 0 : index
    %418 = vector.load %arg7[%c104_111, %c0_112] : memref<160x128xf32, #tpu.memory_space<vmem>>, vector<8x128xf32>
    tpu.vector_store %arg7[%c104_111, %c0_112], %417 {strides = array<i32>} : memref<160x128xf32, #tpu.memory_space<vmem>>, vector<8x128xf32>,
    %c112 = arith.constant 112 : index
    %c0_113 = arith.constant 0 : index
    %419 = vector.load %arg10[%c112, %c0_113] : memref<160x512xf32, #tpu.memory_space<vmem>>, vector<8x512xf32>
    %cst_114 = arith.constant dense<0.000000e+00> : vector<8x512xf32>
    %420 = tpu.matmul %417, %10, %cst_114 {dimension_numbers = #tpu.dot_dimension_numbers<[1], [0], [0], [1], [0, 0, 1, 1], [], []>} : vector<8x128xf32>, vector<128x512xf32>, vector<8x512xf32> -> vector<8x512xf32>
    %421 = arith.addf %419, %420 : vector<8x512xf32>
    %422 = vector.extract_strided_slice %421 {offsets = [0, 0], sizes = [8, 128], strides = [1, 1]} : vector<8x512xf32> to vector<8x128xf32>
    %423 = arith.negf %422 : vector<8x128xf32>
    %424 = math.exp %423 : vector<8x128xf32>
    %cst_115 = arith.constant 1.000000e+00 : f32
    %425 = vector.broadcast %cst_115 : f32 to vector<8x128xf32>
    %426 = arith.addf %425, %424 : vector<8x128xf32>
    %427 = arith.divf %425, %426 : vector<8x128xf32>
    %428 = vector.extract_strided_slice %421 {offsets = [0, 128], sizes = [8, 128], strides = [1, 1]} : vector<8x512xf32> to vector<8x128xf32>
    %429 = arith.negf %428 : vector<8x128xf32>
    %430 = math.exp %429 : vector<8x128xf32>
    %cst_116 = arith.constant 1.000000e+00 : f32
    %431 = vector.broadcast %cst_116 : f32 to vector<8x128xf32>
    %432 = arith.addf %431, %430 : vector<8x128xf32>
    %433 = arith.divf %431, %432 : vector<8x128xf32>
    %434 = vector.extract_strided_slice %421 {offsets = [0, 256], sizes = [8, 128], strides = [1, 1]} : vector<8x512xf32> to vector<8x128xf32>
    %435 = math.tanh %434 : vector<8x128xf32>
    %436 = vector.extract_strided_slice %421 {offsets = [0, 384], sizes = [8, 128], strides = [1, 1]} : vector<8x512xf32> to vector<8x128xf32>
    %437 = arith.negf %436 : vector<8x128xf32>
    %438 = math.exp %437 : vector<8x128xf32>
    %cst_117 = arith.constant 1.000000e+00 : f32
    %439 = vector.broadcast %cst_117 : f32 to vector<8x128xf32>
    %440 = arith.addf %439, %438 : vector<8x128xf32>
    %441 = arith.divf %439, %440 : vector<8x128xf32>
    %442 = arith.mulf %433, %415 : vector<8x128xf32>
    %443 = arith.mulf %427, %435 : vector<8x128xf32>
    %444 = arith.addf %442, %443 : vector<8x128xf32>
    %445 = math.tanh %444 : vector<8x128xf32>
    %446 = arith.mulf %441, %445 : vector<8x128xf32>
    %c112_118 = arith.constant 112 : index
    %c0_119 = arith.constant 0 : index
    %447 = vector.load %arg7[%c112_118, %c0_119] : memref<160x128xf32, #tpu.memory_space<vmem>>, vector<8x128xf32>
    tpu.vector_store %arg7[%c112_118, %c0_119], %446 {strides = array<i32>} : memref<160x128xf32, #tpu.memory_space<vmem>>, vector<8x128xf32>,
    %c120 = arith.constant 120 : index
    %c0_120 = arith.constant 0 : index
    %448 = vector.load %arg10[%c120, %c0_120] : memref<160x512xf32, #tpu.memory_space<vmem>>, vector<8x512xf32>
    %cst_121 = arith.constant dense<0.000000e+00> : vector<8x512xf32>
    %449 = tpu.matmul %446, %10, %cst_121 {dimension_numbers = #tpu.dot_dimension_numbers<[1], [0], [0], [1], [0, 0, 1, 1], [], []>} : vector<8x128xf32>, vector<128x512xf32>, vector<8x512xf32> -> vector<8x512xf32>
    %450 = arith.addf %448, %449 : vector<8x512xf32>
    %451 = vector.extract_strided_slice %450 {offsets = [0, 0], sizes = [8, 128], strides = [1, 1]} : vector<8x512xf32> to vector<8x128xf32>
    %452 = arith.negf %451 : vector<8x128xf32>
    %453 = math.exp %452 : vector<8x128xf32>
    %cst_122 = arith.constant 1.000000e+00 : f32
    %454 = vector.broadcast %cst_122 : f32 to vector<8x128xf32>
    %455 = arith.addf %454, %453 : vector<8x128xf32>
    %456 = arith.divf %454, %455 : vector<8x128xf32>
    %457 = vector.extract_strided_slice %450 {offsets = [0, 128], sizes = [8, 128], strides = [1, 1]} : vector<8x512xf32> to vector<8x128xf32>
    %458 = arith.negf %457 : vector<8x128xf32>
    %459 = math.exp %458 : vector<8x128xf32>
    %cst_123 = arith.constant 1.000000e+00 : f32
    %460 = vector.broadcast %cst_123 : f32 to vector<8x128xf32>
    %461 = arith.addf %460, %459 : vector<8x128xf32>
    %462 = arith.divf %460, %461 : vector<8x128xf32>
    %463 = vector.extract_strided_slice %450 {offsets = [0, 256], sizes = [8, 128], strides = [1, 1]} : vector<8x512xf32> to vector<8x128xf32>
    %464 = math.tanh %463 : vector<8x128xf32>
    %465 = vector.extract_strided_slice %450 {offsets = [0, 384], sizes = [8, 128], strides = [1, 1]} : vector<8x512xf32> to vector<8x128xf32>
    %466 = arith.negf %465 : vector<8x128xf32>
    %467 = math.exp %466 : vector<8x128xf32>
    %cst_124 = arith.constant 1.000000e+00 : f32
    %468 = vector.broadcast %cst_124 : f32 to vector<8x128xf32>
    %469 = arith.addf %468, %467 : vector<8x128xf32>
    %470 = arith.divf %468, %469 : vector<8x128xf32>
    %471 = arith.mulf %462, %444 : vector<8x128xf32>
    %472 = arith.mulf %456, %464 : vector<8x128xf32>
    %473 = arith.addf %471, %472 : vector<8x128xf32>
    %474 = math.tanh %473 : vector<8x128xf32>
    %475 = arith.mulf %470, %474 : vector<8x128xf32>
    %c120_125 = arith.constant 120 : index
    %c0_126 = arith.constant 0 : index
    %476 = vector.load %arg7[%c120_125, %c0_126] : memref<160x128xf32, #tpu.memory_space<vmem>>, vector<8x128xf32>
    tpu.vector_store %arg7[%c120_125, %c0_126], %475 {strides = array<i32>} : memref<160x128xf32, #tpu.memory_space<vmem>>, vector<8x128xf32>,
    %c128 = arith.constant 128 : index
    %c0_127 = arith.constant 0 : index
    %477 = vector.load %arg10[%c128, %c0_127] : memref<160x512xf32, #tpu.memory_space<vmem>>, vector<8x512xf32>
    %cst_128 = arith.constant dense<0.000000e+00> : vector<8x512xf32>
    %478 = tpu.matmul %475, %10, %cst_128 {dimension_numbers = #tpu.dot_dimension_numbers<[1], [0], [0], [1], [0, 0, 1, 1], [], []>} : vector<8x128xf32>, vector<128x512xf32>, vector<8x512xf32> -> vector<8x512xf32>
    %479 = arith.addf %477, %478 : vector<8x512xf32>
    %480 = vector.extract_strided_slice %479 {offsets = [0, 0], sizes = [8, 128], strides = [1, 1]} : vector<8x512xf32> to vector<8x128xf32>
    %481 = arith.negf %480 : vector<8x128xf32>
    %482 = math.exp %481 : vector<8x128xf32>
    %cst_129 = arith.constant 1.000000e+00 : f32
    %483 = vector.broadcast %cst_129 : f32 to vector<8x128xf32>
    %484 = arith.addf %483, %482 : vector<8x128xf32>
    %485 = arith.divf %483, %484 : vector<8x128xf32>
    %486 = vector.extract_strided_slice %479 {offsets = [0, 128], sizes = [8, 128], strides = [1, 1]} : vector<8x512xf32> to vector<8x128xf32>
    %487 = arith.negf %486 : vector<8x128xf32>
    %488 = math.exp %487 : vector<8x128xf32>
    %cst_130 = arith.constant 1.000000e+00 : f32
    %489 = vector.broadcast %cst_130 : f32 to vector<8x128xf32>
    %490 = arith.addf %489, %488 : vector<8x128xf32>
    %491 = arith.divf %489, %490 : vector<8x128xf32>
    %492 = vector.extract_strided_slice %479 {offsets = [0, 256], sizes = [8, 128], strides = [1, 1]} : vector<8x512xf32> to vector<8x128xf32>
    %493 = math.tanh %492 : vector<8x128xf32>
    %494 = vector.extract_strided_slice %479 {offsets = [0, 384], sizes = [8, 128], strides = [1, 1]} : vector<8x512xf32> to vector<8x128xf32>
    %495 = arith.negf %494 : vector<8x128xf32>
    %496 = math.exp %495 : vector<8x128xf32>
    %cst_131 = arith.constant 1.000000e+00 : f32
    %497 = vector.broadcast %cst_131 : f32 to vector<8x128xf32>
    %498 = arith.addf %497, %496 : vector<8x128xf32>
    %499 = arith.divf %497, %498 : vector<8x128xf32>
    %500 = arith.mulf %491, %473 : vector<8x128xf32>
    %501 = arith.mulf %485, %493 : vector<8x128xf32>
    %502 = arith.addf %500, %501 : vector<8x128xf32>
    %503 = math.tanh %502 : vector<8x128xf32>
    %504 = arith.mulf %499, %503 : vector<8x128xf32>
    %c128_132 = arith.constant 128 : index
    %c0_133 = arith.constant 0 : index
    %505 = vector.load %arg7[%c128_132, %c0_133] : memref<160x128xf32, #tpu.memory_space<vmem>>, vector<8x128xf32>
    tpu.vector_store %arg7[%c128_132, %c0_133], %504 {strides = array<i32>} : memref<160x128xf32, #tpu.memory_space<vmem>>, vector<8x128xf32>,
    %c136 = arith.constant 136 : index
    %c0_134 = arith.constant 0 : index
    %506 = vector.load %arg10[%c136, %c0_134] : memref<160x512xf32, #tpu.memory_space<vmem>>, vector<8x512xf32>
    %cst_135 = arith.constant dense<0.000000e+00> : vector<8x512xf32>
    %507 = tpu.matmul %504, %10, %cst_135 {dimension_numbers = #tpu.dot_dimension_numbers<[1], [0], [0], [1], [0, 0, 1, 1], [], []>} : vector<8x128xf32>, vector<128x512xf32>, vector<8x512xf32> -> vector<8x512xf32>
    %508 = arith.addf %506, %507 : vector<8x512xf32>
    %509 = vector.extract_strided_slice %508 {offsets = [0, 0], sizes = [8, 128], strides = [1, 1]} : vector<8x512xf32> to vector<8x128xf32>
    %510 = arith.negf %509 : vector<8x128xf32>
    %511 = math.exp %510 : vector<8x128xf32>
    %cst_136 = arith.constant 1.000000e+00 : f32
    %512 = vector.broadcast %cst_136 : f32 to vector<8x128xf32>
    %513 = arith.addf %512, %511 : vector<8x128xf32>
    %514 = arith.divf %512, %513 : vector<8x128xf32>
    %515 = vector.extract_strided_slice %508 {offsets = [0, 128], sizes = [8, 128], strides = [1, 1]} : vector<8x512xf32> to vector<8x128xf32>
    %516 = arith.negf %515 : vector<8x128xf32>
    %517 = math.exp %516 : vector<8x128xf32>
    %cst_137 = arith.constant 1.000000e+00 : f32
    %518 = vector.broadcast %cst_137 : f32 to vector<8x128xf32>
    %519 = arith.addf %518, %517 : vector<8x128xf32>
    %520 = arith.divf %518, %519 : vector<8x128xf32>
    %521 = vector.extract_strided_slice %508 {offsets = [0, 256], sizes = [8, 128], strides = [1, 1]} : vector<8x512xf32> to vector<8x128xf32>
    %522 = math.tanh %521 : vector<8x128xf32>
    %523 = vector.extract_strided_slice %508 {offsets = [0, 384], sizes = [8, 128], strides = [1, 1]} : vector<8x512xf32> to vector<8x128xf32>
    %524 = arith.negf %523 : vector<8x128xf32>
    %525 = math.exp %524 : vector<8x128xf32>
    %cst_138 = arith.constant 1.000000e+00 : f32
    %526 = vector.broadcast %cst_138 : f32 to vector<8x128xf32>
    %527 = arith.addf %526, %525 : vector<8x128xf32>
    %528 = arith.divf %526, %527 : vector<8x128xf32>
    %529 = arith.mulf %520, %502 : vector<8x128xf32>
    %530 = arith.mulf %514, %522 : vector<8x128xf32>
    %531 = arith.addf %529, %530 : vector<8x128xf32>
    %532 = math.tanh %531 : vector<8x128xf32>
    %533 = arith.mulf %528, %532 : vector<8x128xf32>
    %c136_139 = arith.constant 136 : index
    %c0_140 = arith.constant 0 : index
    %534 = vector.load %arg7[%c136_139, %c0_140] : memref<160x128xf32, #tpu.memory_space<vmem>>, vector<8x128xf32>
    tpu.vector_store %arg7[%c136_139, %c0_140], %533 {strides = array<i32>} : memref<160x128xf32, #tpu.memory_space<vmem>>, vector<8x128xf32>,
    %c144 = arith.constant 144 : index
    %c0_141 = arith.constant 0 : index
    %535 = vector.load %arg10[%c144, %c0_141] : memref<160x512xf32, #tpu.memory_space<vmem>>, vector<8x512xf32>
    %cst_142 = arith.constant dense<0.000000e+00> : vector<8x512xf32>
    %536 = tpu.matmul %533, %10, %cst_142 {dimension_numbers = #tpu.dot_dimension_numbers<[1], [0], [0], [1], [0, 0, 1, 1], [], []>} : vector<8x128xf32>, vector<128x512xf32>, vector<8x512xf32> -> vector<8x512xf32>
    %537 = arith.addf %535, %536 : vector<8x512xf32>
    %538 = vector.extract_strided_slice %537 {offsets = [0, 0], sizes = [8, 128], strides = [1, 1]} : vector<8x512xf32> to vector<8x128xf32>
    %539 = arith.negf %538 : vector<8x128xf32>
    %540 = math.exp %539 : vector<8x128xf32>
    %cst_143 = arith.constant 1.000000e+00 : f32
    %541 = vector.broadcast %cst_143 : f32 to vector<8x128xf32>
    %542 = arith.addf %541, %540 : vector<8x128xf32>
    %543 = arith.divf %541, %542 : vector<8x128xf32>
    %544 = vector.extract_strided_slice %537 {offsets = [0, 128], sizes = [8, 128], strides = [1, 1]} : vector<8x512xf32> to vector<8x128xf32>
    %545 = arith.negf %544 : vector<8x128xf32>
    %546 = math.exp %545 : vector<8x128xf32>
    %cst_144 = arith.constant 1.000000e+00 : f32
    %547 = vector.broadcast %cst_144 : f32 to vector<8x128xf32>
    %548 = arith.addf %547, %546 : vector<8x128xf32>
    %549 = arith.divf %547, %548 : vector<8x128xf32>
    %550 = vector.extract_strided_slice %537 {offsets = [0, 256], sizes = [8, 128], strides = [1, 1]} : vector<8x512xf32> to vector<8x128xf32>
    %551 = math.tanh %550 : vector<8x128xf32>
    %552 = vector.extract_strided_slice %537 {offsets = [0, 384], sizes = [8, 128], strides = [1, 1]} : vector<8x512xf32> to vector<8x128xf32>
    %553 = arith.negf %552 : vector<8x128xf32>
    %554 = math.exp %553 : vector<8x128xf32>
    %cst_145 = arith.constant 1.000000e+00 : f32
    %555 = vector.broadcast %cst_145 : f32 to vector<8x128xf32>
    %556 = arith.addf %555, %554 : vector<8x128xf32>
    %557 = arith.divf %555, %556 : vector<8x128xf32>
    %558 = arith.mulf %549, %531 : vector<8x128xf32>
    %559 = arith.mulf %543, %551 : vector<8x128xf32>
    %560 = arith.addf %558, %559 : vector<8x128xf32>
    %561 = math.tanh %560 : vector<8x128xf32>
    %562 = arith.mulf %557, %561 : vector<8x128xf32>
    %c144_146 = arith.constant 144 : index
    %c0_147 = arith.constant 0 : index
    %563 = vector.load %arg7[%c144_146, %c0_147] : memref<160x128xf32, #tpu.memory_space<vmem>>, vector<8x128xf32>
    tpu.vector_store %arg7[%c144_146, %c0_147], %562 {strides = array<i32>} : memref<160x128xf32, #tpu.memory_space<vmem>>, vector<8x128xf32>,
    %c152 = arith.constant 152 : index
    %c0_148 = arith.constant 0 : index
    %564 = vector.load %arg10[%c152, %c0_148] : memref<160x512xf32, #tpu.memory_space<vmem>>, vector<8x512xf32>
    %cst_149 = arith.constant dense<0.000000e+00> : vector<8x512xf32>
    %565 = tpu.matmul %562, %10, %cst_149 {dimension_numbers = #tpu.dot_dimension_numbers<[1], [0], [0], [1], [0, 0, 1, 1], [], []>} : vector<8x128xf32>, vector<128x512xf32>, vector<8x512xf32> -> vector<8x512xf32>
    %566 = arith.addf %564, %565 : vector<8x512xf32>
    %567 = vector.extract_strided_slice %566 {offsets = [0, 0], sizes = [8, 128], strides = [1, 1]} : vector<8x512xf32> to vector<8x128xf32>
    %568 = arith.negf %567 : vector<8x128xf32>
    %569 = math.exp %568 : vector<8x128xf32>
    %cst_150 = arith.constant 1.000000e+00 : f32
    %570 = vector.broadcast %cst_150 : f32 to vector<8x128xf32>
    %571 = arith.addf %570, %569 : vector<8x128xf32>
    %572 = arith.divf %570, %571 : vector<8x128xf32>
    %573 = vector.extract_strided_slice %566 {offsets = [0, 128], sizes = [8, 128], strides = [1, 1]} : vector<8x512xf32> to vector<8x128xf32>
    %574 = arith.negf %573 : vector<8x128xf32>
    %575 = math.exp %574 : vector<8x128xf32>
    %cst_151 = arith.constant 1.000000e+00 : f32
    %576 = vector.broadcast %cst_151 : f32 to vector<8x128xf32>
    %577 = arith.addf %576, %575 : vector<8x128xf32>
    %578 = arith.divf %576, %577 : vector<8x128xf32>
    %579 = vector.extract_strided_slice %566 {offsets = [0, 256], sizes = [8, 128], strides = [1, 1]} : vector<8x512xf32> to vector<8x128xf32>
    %580 = math.tanh %579 : vector<8x128xf32>
    %581 = vector.extract_strided_slice %566 {offsets = [0, 384], sizes = [8, 128], strides = [1, 1]} : vector<8x512xf32> to vector<8x128xf32>
    %582 = arith.negf %581 : vector<8x128xf32>
    %583 = math.exp %582 : vector<8x128xf32>
    %cst_152 = arith.constant 1.000000e+00 : f32
    %584 = vector.broadcast %cst_152 : f32 to vector<8x128xf32>
    %585 = arith.addf %584, %583 : vector<8x128xf32>
    %586 = arith.divf %584, %585 : vector<8x128xf32>
    %587 = arith.mulf %578, %560 : vector<8x128xf32>
    %588 = arith.mulf %572, %580 : vector<8x128xf32>
    %589 = arith.addf %587, %588 : vector<8x128xf32>
    %590 = math.tanh %589 : vector<8x128xf32>
    %591 = arith.mulf %586, %590 : vector<8x128xf32>
    %c152_153 = arith.constant 152 : index
    %c0_154 = arith.constant 0 : index
    %592 = vector.load %arg7[%c152_153, %c0_154] : memref<160x128xf32, #tpu.memory_space<vmem>>, vector<8x128xf32>
    tpu.vector_store %arg7[%c152_153, %c0_154], %591 {strides = array<i32>} : memref<160x128xf32, #tpu.memory_space<vmem>>, vector<8x128xf32>,
    %c0_155 = arith.constant 0 : index
    %c0_156 = arith.constant 0 : index
    %593 = vector.load %arg11[%c0_155, %c0_156] : memref<8x128xf32, #tpu.memory_space<vmem>>, vector<8x128xf32>
    tpu.vector_store %arg11[%c0_155, %c0_156], %591 {strides = array<i32>} : memref<8x128xf32, #tpu.memory_space<vmem>>, vector<8x128xf32>,
    %c0_157 = arith.constant 0 : index
    %c0_158 = arith.constant 0 : index
    %594 = vector.load %arg12[%c0_157, %c0_158] : memref<8x128xf32, #tpu.memory_space<vmem>>, vector<8x128xf32>
    tpu.vector_store %arg12[%c0_157, %c0_158], %589 {strides = array<i32>} : memref<8x128xf32, #tpu.memory_space<vmem>>, vector<8x128xf32>,
    %c0_i32_159 = arith.constant 0 : i32
    %595 = arith.cmpi eq, %arg0, %c0_i32_159 : i32
    %596 = arith.extui %595 : i1 to i32
    %c0_i32_160 = arith.constant 0 : i32
    %597 = arith.cmpi ne, %596, %c0_i32_160 : i32
    scf.if %597 {
      %c0_161 = arith.constant 0 : index
      %c0_162 = arith.constant 0 : index
      %598 = vector.load %arg11[%c0_161, %c0_162] : memref<8x128xf32, #tpu.memory_space<vmem>>, vector<8x128xf32>
      %c0_163 = arith.constant 0 : index
      %c0_164 = arith.constant 0 : index
      %599 = vector.load %arg8[%c0_163, %c0_164] : memref<8x128xf32, #tpu.memory_space<vmem>>, vector<8x128xf32>
      tpu.vector_store %arg8[%c0_163, %c0_164], %598 {strides = array<i32>} : memref<8x128xf32, #tpu.memory_space<vmem>>, vector<8x128xf32>,
      %c0_165 = arith.constant 0 : index
      %c0_166 = arith.constant 0 : index
      %600 = vector.load %arg12[%c0_165, %c0_166] : memref<8x128xf32, #tpu.memory_space<vmem>>, vector<8x128xf32>
      %c0_167 = arith.constant 0 : index
      %c0_168 = arith.constant 0 : index
      %601 = vector.load %arg9[%c0_167, %c0_168] : memref<8x128xf32, #tpu.memory_space<vmem>>, vector<8x128xf32>
      tpu.vector_store %arg9[%c0_167, %c0_168], %600 {strides = array<i32>} : memref<8x128xf32, #tpu.memory_space<vmem>>, vector<8x128xf32>,
    } else {
    }
    return
  }
  func.func @transform_0(%arg0: i32) -> (i32, i32) {
    %c0_i32 = arith.constant 0 : i32
    %c0_i32_0 = arith.constant 0 : i32
    return %arg0, %c0_i32 : i32, i32
  }
  func.func @transform_1(%arg0: i32) -> (i32, i32) {
    %c0_i32 = arith.constant 0 : i32
    %c0_i32_0 = arith.constant 0 : i32
    %c0_i32_1 = arith.constant 0 : i32
    return %c0_i32, %c0_i32_0 : i32, i32
  }
  func.func @transform_2(%arg0: i32) -> (i32, i32) {
    %c0_i32 = arith.constant 0 : i32
    %c0_i32_0 = arith.constant 0 : i32
    %c0_i32_1 = arith.constant 0 : i32
    return %c0_i32, %c0_i32_0 : i32, i32
  }
  func.func @transform_3(%arg0: i32) -> (i32, i32) {
    %c0_i32 = arith.constant 0 : i32
    %c0_i32_0 = arith.constant 0 : i32
    %c0_i32_1 = arith.constant 0 : i32
    return %c0_i32, %c0_i32_0 : i32, i32
  }
  func.func @transform_4(%arg0: i32) -> (i32, i32) {
    %c0_i32 = arith.constant 0 : i32
    %c0_i32_0 = arith.constant 0 : i32
    %c0_i32_1 = arith.constant 0 : i32
    return %c0_i32, %c0_i32_0 : i32, i32
  }
  func.func @transform_5(%arg0: i32) -> (i32, i32) {
    %c0_i32 = arith.constant 0 : i32
    %c0_i32_0 = arith.constant 0 : i32
    %c0_i32_1 = arith.constant 0 : i32
    return %c0_i32, %c0_i32_0 : i32, i32
  }
  func.func @transform_6(%arg0: i32) -> (i32, i32) {
    %c0_i32 = arith.constant 0 : i32
    %c0_i32_0 = arith.constant 0 : i32
    return %arg0, %c0_i32 : i32, i32
  }
  func.func @transform_7(%arg0: i32) -> (i32, i32) {
    %c0_i32 = arith.constant 0 : i32
    %c0_i32_0 = arith.constant 0 : i32
    %c0_i32_1 = arith.constant 0 : i32
    return %c0_i32, %c0_i32_0 : i32, i32
  }
  func.func @transform_8(%arg0: i32) -> (i32, i32) {
    %c0_i32 = arith.constant 0 : i32
    %c0_i32_0 = arith.constant 0 : i32
    %c0_i32_1 = arith.constant 0 : i32
    return %c0_i32, %c0_i32_0 : i32, i32
  }
}

</mosaic_0001>

<bundles_post_ra>
// kernel: qlstm_forward.1
= control target key start
LH: loop header
LB: loop body
LE: loop exit
PB: predicated region body
PF: predicated region fallthrough
CT: control target
= control target key end

     0   :  { %v6051_v3 = vmov 0.0   ;;  %vm84_vm0 = vcmask 130048   ;;  %s7432_s1 = inlined_call_operand.vmem [shape: f32[16,512], index: 1, kind: input, shape index: {}]   ;;  %s7433_s2 = inlined_call_operand.vmem [shape: f32[128,512], index: 2, kind: input, shape index: {}]   ;;  %s7434_s0 = inlined_call_operand.vmem [shape: f32[160,16], index: 0, kind: input, shape index: {}]   ;;  %s7435_s4 = inlined_call_operand.vmem [shape: f32[8,128], index: 4, kind: input, shape index: {}, may-alias: {4,5}]   ;;  %s7436_s3 = inlined_call_operand.vmem [shape: f32[1,512], index: 3, kind: input, shape index: {}]   ;;  %s7437_s5 = inlined_call_operand.vmem [shape: f32[8,128], index: 5, kind: input, shape index: {}, may-alias: {4,5}]   ;;  %s7438_s6 = inlined_call_operand.vmem [shape: f32[160,128], index: 6, kind: output, shape index: {0}]   ;;  %s7439_s8 = inlined_call_operand.vmem [shape: f32[8,128], index: 8, kind: output, shape index: {2}]   ;;  %s7440_s7 = inlined_call_operand.vmem [shape: f32[8,128], index: 7, kind: output, shape index: {1}]  }
   0x1   :  { %v55_v0 = vld [vmem:[%s7432_s1 + $0x8] sm:$0xff]  ;;  %v57_v2 = vld [vmem:[%s7432_s1 + $0x18] sm:$0xff]  ;;  %209 = vmatprep.mubr.f32.mxu0 %v6051_v3  ;;  %394 = vmatprep.mubr.f32.mxu1 %v6051_v3  ;;  %v54_v6 = vld [vmem:[%s7432_s1] sm:$0xff] }
   0x2   :  { %v59_v1 = vld [vmem:[%s7432_s1 + $0x28] sm:$0xff]  ;;  %v61_v5 = vld [vmem:[%s7432_s1 + $0x38] sm:$0xff]  ;;  %v58_v7 = vld [vmem:[%s7432_s1 + $0x20] sm:$0xff] }
   0x3   :  { %v4282_v4 = vpack.c.bf16 %v59_v1, %v55_v0  ;;  %v4286_v8 = vpack.c.bf16 %v61_v5, %v57_v2  ;;  %v4284_v9 = vpack.c.bf16 %v58_v7, %v54_v6  ;;  %v56_v10 = vld [vmem:[%s7432_s1 + $0x10] sm:$0xff]  ;;  %v596_v13 = vld [vmem:[%s7433_s2 + $0x8] sm:$0xff]  ;;  %v595_v15 = vld [vmem:[%s7433_s2] sm:$0xff] }
   0x4   :  { %v60_v11 = vld [vmem:[%s7432_s1 + $0x30] sm:$0xff]  ;;  %v600_v14 = vld [vmem:[%s7433_s2 + $0x28] sm:$0xff]  ;;  %v34_v16 = vld [vmem:[%s7434_s0] sm:$0xff] }
   0x5   :  { %4283 = vmatprep.subr.bf16.mxu0 %v4282_v4  ;;  %v4288_v12 = vpack.c.bf16 %v60_v11, %v56_v10  ;;  %4287 = vmatprep.subr.bf16.mxu1 %v4286_v8  ;;  %v6135_v17 = vpack.c.bf16 %v600_v14, %v596_v13  ;;  %v599_v18 = vld [vmem:[%s7433_s2 + $0x20] sm:$0xff]  ;;  %v604_v20 = vld [vmem:[%s7433_s2 + $0x48] sm:$0xff]  ;;  %v598_v25 = vld [vmem:[%s7433_s2 + $0x18] sm:$0xff] }
   0x6   :  { %4285 = vmatpush1.bf16.msra.mxu0 %v4284_v9  ;;  %v6140_v19 = vpack.c.bf16 %v599_v18, %v595_v15  ;;  %v608_v21 = vld [vmem:[%s7433_s2 + $0x68] sm:$0xff]  ;;  %v603_v23 = vld [vmem:[%s7433_s2 + $0x40] sm:$0xff]  ;;  %v602_v26 = vld [vmem:[%s7433_s2 + $0x38] sm:$0xff] }
   0x7   :  { %4289 = vmatpush1.bf16.msra.mxu1 %v4288_v12  ;;  %4291 = vmatprep.subr.bf16.mxu0 %v6135_v17  ;;  %v6149_v22 = vpack.c.bf16 %v608_v21, %v604_v20  ;;  %v607_v24 = vld [vmem:[%s7433_s2 + $0x60] sm:$0xff]  ;;  %v597_v27 = vld [vmem:[%s7433_s2 + $0x10] sm:$0xff]  ;;  %v35_v28 = vld [vmem:[%s7434_s0 + $0x8] sm:$0xff]  ;;  %v6172_v29 = vpack.c.bf16 %v602_v26, %v598_v25 }
   0x8   :  { %v601_v30 = vld [vmem:[%s7433_s2 + $0x30] sm:$0xff]  ;;  %v612_v31 = vld [vmem:[%s7433_s2 + $0x88] sm:$0xff]  ;;  %v6182_v32 = vpack.c.bf16 %v607_v24, %v603_v23  ;;  %v611_v35 = vld [vmem:[%s7433_s2 + $0x80] sm:$0xff] }
   0x9   :  { %4182 = vmatmul.mubr.msk.f32.vlgmr.msra.gmra.mrb[0].mxu0 %vm84_vm0, %v34_v16  ;;  %v6184_v33 = vpack.c.bf16 %v601_v30, %v597_v27  ;;  %v616_v34 = vld [vmem:[%s7433_s2 + $0xa8] sm:$0xff]  ;;  %4323 = vmatprep.subr.bf16.mxu1 %v6172_v29  ;;  %v615_v37 = vld [vmem:[%s7433_s2 + $0xa0] sm:$0xff]  ;;  %v606_v38 = vld [vmem:[%s7433_s2 + $0x58] sm:$0xff] }
   0xa   :  { %4202 = vmatmul.mubr.msk.f32.vlgmr.msra.gmra.mrb[0].mxu1 %vm84_vm0, %v34_v16  ;;  %4293 = vmatpush1.bf16.msra.mxu0 %v6140_v19  ;;  %v6194_v36 = vpack.c.bf16 %v616_v34, %v612_v31  ;;  %v610_v39 = vld [vmem:[%s7433_s2 + $0x78] sm:$0xff]  ;;  %v605_v41 = vld [vmem:[%s7433_s2 + $0x50] sm:$0xff]  ;;  %v620_v45 = vld [vmem:[%s7433_s2 + $0xc8] sm:$0xff]  ;;  %v6230_v47 = vpack.c.bf16 %v615_v37, %v611_v35 }
   0xb   :  { %215 = vmatprep.mubr.f32.mxu0 %v6051_v3  ;;  %400 = vmatprep.mubr.f32.mxu1 %v6051_v3  ;;  %v6207_v40 = vpack.c.bf16 %v610_v39, %v606_v38  ;;  %v609_v42 = vld [vmem:[%s7433_s2 + $0x70] sm:$0xff]  ;;  %v624_v46 = vld [vmem:[%s7433_s2 + $0xe8] sm:$0xff]  ;;  %v619_v48 = vld [vmem:[%s7433_s2 + $0xc0] sm:$0xff] }
   0xc   :  { %4295 = vmatprep.subr.bf16.mxu0 %v6149_v22  ;;  %4325 = vmatpush1.bf16.msra.mxu1 %v6184_v33  ;;  %v36_v43 = vld [vmem:[%s7434_s0 + $0x10] sm:$0xff]  ;;  %v6220_v44 = vpack.c.bf16 %v609_v42, %v605_v41  ;;  %v614_v49 = vld [vmem:[%s7433_s2 + $0x98] sm:$0xff]  ;;  %v6240_v50 = vpack.c.bf16 %v624_v46, %v620_v45  ;;  %v623_v51 = vld [vmem:[%s7433_s2 + $0xe0] sm:$0xff] }
   0xd   :  { %4183 = vmatmul.mubr.msk.f32.gmra.mrb[2].mxu0 %vm84_vm0, %v35_v28  ;;  %4327 = vmatprep.subr.bf16.mxu1 %v6207_v40  ;;  %v618_v52 = vld [vmem:[%s7433_s2 + $0xb8] sm:$0xff]  ;;  %v613_v53 = vld [vmem:[%s7433_s2 + $0x90] sm:$0xff]  ;;  %v628_v56 = vld [vmem:[%s7433_s2 + $0x108] sm:$0xff]  ;;  %v6273_v60 = vpack.c.bf16 %v623_v51, %v619_v48 }
   0xe   :  { %4203 = vmatmul.mubr.msk.f32.gmra.mrb[2].mxu1 %vm84_vm0, %v35_v28  ;;  %221 = vmatprep.mubr.f32.mxu0 %v6051_v3  ;;  %v6253_v54 = vpack.c.bf16 %v618_v52, %v614_v49  ;;  %v617_v55 = vld [vmem:[%s7433_s2 + $0xb0] sm:$0xff]  ;;  %v37_v57 = vld [vmem:[%s7434_s0 + $0x18] sm:$0xff]  ;;  %v632_v59 = vld [vmem:[%s7433_s2 + $0x128] sm:$0xff] }
   0xf   :  { %406 = vmatprep.mubr.f32.mxu1 %v6051_v3  ;;  %4297 = vmatpush1.bf16.msra.mxu0 %v6182_v32  ;;  %v6266_v58 = vpack.c.bf16 %v617_v55, %v613_v53  ;;  %v627_v61 = vld [vmem:[%s7433_s2 + $0x100] sm:$0xff]  ;;  %v622_v62 = vld [vmem:[%s7433_s2 + $0xd8] sm:$0xff]  ;;  %v6286_v0 = vpack.c.bf16 %v632_v59, %v628_v56  ;;  %v621_v4 = vld [vmem:[%s7433_s2 + $0xd0] sm:$0xff] }
  0x10   :  { %4299 = vmatprep.subr.bf16.mxu0 %v6194_v36  ;;  %4329 = vmatpush1.bf16.msra.mxu1 %v6220_v44  ;;  %v626_v63 = vld [vmem:[%s7433_s2 + $0xf8] sm:$0xff]  ;;  %v631_v1 = vld [vmem:[%s7433_s2 + $0x120] sm:$0xff]  ;;  %v625_v5 = vld [vmem:[%s7433_s2 + $0xf0] sm:$0xff] }
  0x11   :  { %4184 = vmatmul.mubr.msk.f32.gmra.mrb[4].mxu0 %vm84_vm0, %v36_v43  ;;  %4331 = vmatprep.subr.bf16.mxu1 %v6253_v54  ;;  %v6291_v2 = vpack.c.bf16 %v626_v63, %v622_v62  ;;  %v6301_v6 = vpack.c.bf16 %v625_v5, %v621_v4  ;;  %v636_v7 = vld [vmem:[%s7433_s2 + $0x148] sm:$0xff]  ;;  %v38_v9 = vld [vmem:[%s7434_s0 + $0x20] sm:$0xff]  ;;  %v630_v10 = vld [vmem:[%s7433_s2 + $0x118] sm:$0xff]  ;;  %v6319_v11 = vpack.c.bf16 %v631_v1, %v627_v61 }
  0x12   :  { %4204 = vmatmul.mubr.msk.f32.gmra.mrb[4].mxu1 %vm84_vm0, %v36_v43  ;;  %227 = vmatprep.mubr.f32.mxu0 %v6051_v3  ;;  %v640_v8 = vld [vmem:[%s7433_s2 + $0x168] sm:$0xff]  ;;  %v634_v12 = vld [vmem:[%s7433_s2 + $0x138] sm:$0xff]  ;;  %v629_v13 = vld [vmem:[%s7433_s2 + $0x110] sm:$0xff] }
  0x13   :  { %412 = vmatprep.mubr.f32.mxu1 %v6051_v3  ;;  %4301 = vmatpush1.bf16.msra.mxu0 %v6230_v47  ;;  %v6329_v14 = vpack.c.bf16 %v640_v8, %v636_v7  ;;  %v635_v15 = vld [vmem:[%s7433_s2 + $0x140] sm:$0xff]  ;;  %v6337_v18 = vpack.c.bf16 %v634_v12, %v630_v10  ;;  %v633_v20 = vld [vmem:[%s7433_s2 + $0x130] sm:$0xff]  ;;  %v644_v23 = vld [vmem:[%s7433_s2 + $0x188] sm:$0xff] }
  0x14   :  { %4303 = vmatprep.subr.bf16.mxu0 %v6240_v50  ;;  %4333 = vmatpush1.bf16.msra.mxu1 %v6266_v58  ;;  %v639_v16 = vld [vmem:[%s7433_s2 + $0x160] sm:$0xff]  ;;  %v6344_v21 = vpack.c.bf16 %v633_v20, %v629_v13  ;;  %v648_v24 = vld [vmem:[%s7433_s2 + $0x1a8] sm:$0xff]  ;;  %v638_v26 = vld [vmem:[%s7433_s2 + $0x158] sm:$0xff] }
  0x15   :  { %4185 = vmatmul.mubr.msk.f32.gmra.mrb[6].mxu0 %vm84_vm0, %v37_v57  ;;  %4335 = vmatprep.subr.bf16.mxu1 %v6291_v2  ;;  %v39_v25 = vld [vmem:[%s7434_s0 + $0x28] sm:$0xff]  ;;  %v642_v27 = vld [vmem:[%s7433_s2 + $0x178] sm:$0xff]  ;;  %v6365_v28 = vpack.c.bf16 %v639_v16, %v635_v15  ;;  %v637_v30 = vld [vmem:[%s7433_s2 + $0x150] sm:$0xff]  ;;  %v6378_v35 = vpack.c.bf16 %v648_v24, %v644_v23 }
  0x16   :  { %4205 = vmatmul.mubr.msk.f32.gmra.mrb[6].mxu1 %vm84_vm0, %v37_v57  ;;  %233 = vmatprep.mubr.f32.mxu0 %v6051_v3  ;;  %v641_v31 = vld [vmem:[%s7433_s2 + $0x170] sm:$0xff]  ;;  %v643_v37 = vld [vmem:[%s7433_s2 + $0x180] sm:$0xff]  ;;  %v6386_v39 = vpack.c.bf16 %v642_v27, %v638_v26  ;;  %v652_v42 = vld [vmem:[%s7433_s2 + $0x1c8] sm:$0xff] }
  0x17   :  { %418 = vmatprep.mubr.f32.mxu1 %v6051_v3  ;;  %4305 = vmatpush1.bf16.msra.mxu0 %v6273_v60  ;;  %v40_v34 = vld [vmem:[%s7434_s0 + $0x30] sm:$0xff]  ;;  %v647_v38 = vld [vmem:[%s7433_s2 + $0x1a0] sm:$0xff]  ;;  %v6390_v41 = vpack.c.bf16 %v641_v31, %v637_v30  ;;  %v656_v43 = vld [vmem:[%s7433_s2 + $0x1e8] sm:$0xff]  ;;  %v64_v30 = vlaneseq }
  0x18   :  { %4307 = vmatprep.subr.bf16.mxu0 %v6286_v0  ;;  %4337 = vmatpush1.bf16.msra.mxu1 %v6301_v6  ;;  %v646_v45 = vld [vmem:[%s7433_s2 + $0x198] sm:$0xff]  ;;  %v645_v48 = vld [vmem:[%s7433_s2 + $0x190] sm:$0xff]  ;;  %v6414_v51 = vpack.c.bf16 %v647_v38, %v643_v37  ;;  %v6418_v52 = vpack.c.bf16 %v656_v43, %v652_v42  ;;  %v651_v53 = vld [vmem:[%s7433_s2 + $0x1c0] sm:$0xff] }
  0x19   :  { %4186 = vmatmul.mubr.msk.f32.gmra.mrb[8].mxu0 %vm84_vm0, %v38_v9  ;;  %4339 = vmatprep.subr.bf16.mxu1 %v6337_v18  ;;  %v650_v46 = vld [vmem:[%s7433_s2 + $0x1b8] sm:$0xff]  ;;  %v649_v49 = vld [vmem:[%s7433_s2 + $0x1b0] sm:$0xff]  ;;  %v655_v55 = vld [vmem:[%s7433_s2 + $0x1e0] sm:$0xff]  ;;  %v65_v31 = vshrl.u32 %v64_v30, 7 }
  0x1a   :  { %4206 = vmatmul.mubr.msk.f32.gmra.mrb[8].mxu1 %vm84_vm0, %v38_v9  ;;  %239 = vmatprep.mubr.f32.mxu0 %v6051_v3  ;;  %v6426_v56 = vpack.c.bf16 %v650_v46, %v646_v45  ;;  %v6430_v57 = vpack.c.bf16 %v649_v49, %v645_v48  ;;  %v654_v59 = vld [vmem:[%s7433_s2 + $0x1d8] sm:$0xff]  ;;  %v653_v63 = vld [vmem:[%s7433_s2 + $0x1d0] sm:$0xff]  ;;  %v6451_v4 = vpack.c.bf16 %v655_v55, %v651_v53  ;;  %v42_v8 = vld [vmem:[%s7434_s0 + $0x40] sm:$0xff] }
  0x1b   :  { %424 = vmatprep.mubr.f32.mxu1 %v6051_v3  ;;  %4309 = vmatpush1.bf16.msra.mxu0 %v6319_v11  ;;  %v658_v61 = vld [vmem:[%s7433_s2 + $0x1f8] sm:$0xff]  ;;  %v657_v1 = vld [vmem:[%s7433_s2 + $0x1f0] sm:$0xff]  ;;  %v43_v9 = vld [vmem:[%s7434_s0 + $0x48] sm:$0xff]  ;;  %v70_v38 = vsub.s32 1, %v65_v31  ;;  %v78_v46 = vsub.s32 3, %v65_v31 }
  0x1c   :  { %4311 = vmatprep.subr.bf16.mxu0 %v6329_v14  ;;  %4341 = vmatpush1.bf16.msra.mxu1 %v6344_v21  ;;  %v41_v62 = vld [vmem:[%s7434_s0 + $0x38] sm:$0xff]  ;;  %v6455_v5 = vpack.c.bf16 %v658_v61, %v654_v59  ;;  %v6459_v7 = vpack.c.bf16 %v657_v1, %v653_v63  ;;  %v44_v10 = vld [vmem:[%s7434_s0 + $0x50] sm:$0xff]  ;;  %v46_v13 = vld [vmem:[%s7434_s0 + $0x60] sm:$0xff]  ;;  %v74_v1 = vsub.s32 2, %v65_v31 }
  0x1d   :  { %4187 = vmatmul.mubr.msk.f32.gmra.mrb[10].mxu0 %vm84_vm0, %v39_v25  ;;  %4343 = vmatprep.subr.bf16.mxu1 %v6386_v39  ;;  %v45_v12 = vld [vmem:[%s7434_s0 + $0x58] sm:$0xff]  ;;  %v47_v15 = vld [vmem:[%s7434_s0 + $0x68] sm:$0xff]  ;;  %v48_v16 = vld [vmem:[%s7434_s0 + $0x70] sm:$0xff] }
  0x1e   :  { %4207 = vmatmul.mubr.msk.f32.gmra.mrb[10].mxu1 %vm84_vm0, %v39_v25  ;;  %245 = vmatprep.mubr.f32.mxu0 %v6051_v3  ;;  %v49_v20 = vld [vmem:[%s7434_s0 + $0x78] sm:$0xff]  ;;  %v50_v23 = vld [vmem:[%s7434_s0 + $0x80] sm:$0xff]  ;;  %v51_v24 = vld [vmem:[%s7434_s0 + $0x88] sm:$0xff] }
  0x1f   :  { %430 = vmatprep.mubr.f32.mxu1 %v6051_v3  ;;  %4313 = vmatpush1.bf16.msra.mxu0 %v6365_v28  ;;  %v52_v25 = vld [vmem:[%s7434_s0 + $0x90] sm:$0xff]  ;;  %v53_v26 = vld [vmem:[%s7434_s0 + $0x98] sm:$0xff]  ;;  %v30_v27 = vld [vmem:[%s7435_s4] sm:$0xff] }
  0x20   :  { %4315 = vmatprep.subr.bf16.mxu0 %v6378_v35  ;;  %4345 = vmatpush1.bf16.msra.mxu1 %v6390_v41  ;;  %v62_v37 = vld [vmem:[%s7436_s3] sm:$0xf] }
  0x21   :  { %4188 = vmatmul.mubr.msk.f32.gmra.mrb[12].mxu0 %vm84_vm0, %v40_v34  ;;  %4347 = vmatprep.subr.bf16.mxu1 %v6426_v56  ;;  %v6595_v43 = vrot.slane %v62_v37, %v70_v38  ;;  %v6599_v63 = vrot.slane %v62_v37, %v78_v46 }
  0x22   :  { %4208 = vmatmul.mubr.msk.f32.gmra.mrb[12].mxu1 %vm84_vm0, %v40_v34  ;;  %251 = vmatprep.mubr.f32.mxu0 %v6051_v3  ;;  %v66_v34 = vsub.s32 0, %v65_v31 }
  0x23   :  { %436 = vmatprep.mubr.f32.mxu1 %v6051_v3  ;;  %4317 = vmatpush1.bf16.msra.mxu0 %v6414_v51 }
  0x24   :  { %4319 = vmatprep.subr.bf16.mxu0 %v6418_v52  ;;  %4349 = vmatpush1.bf16.msra.mxu1 %v6430_v57  ;;  %v6593_v42 = vrot.slane %v62_v37, %v66_v34 }
  0x25   :  { %4189 = vmatmul.mubr.msk.f32.gmra.mrb[14].mxu0 %vm84_vm0, %v41_v62  ;;  %4351 = vmatprep.subr.bf16.mxu1 %v6455_v5 }
  0x26   :  { %4209 = vmatmul.mubr.msk.f32.gmra.mrb[14].mxu1 %vm84_vm0, %v41_v62  ;;  %257 = vmatprep.mubr.f32.mxu0 %v6051_v3 }
  0x27   :  { %442 = vmatprep.mubr.f32.mxu1 %v6051_v3  ;;  %4321 = vmatpush1.bf16.msra.mxu0 %v6451_v4 }
  0x28   :  { %4355 = vmatprep.subr.bf16.mxu0 %v6135_v17  ;;  %4353 = vmatpush1.bf16.msra.mxu1 %v6459_v7 }
  0x29   :  { %4190 = vmatmul.mubr.msk.f32.gmra.mrb[16].mxu0 %vm84_vm0, %v42_v8  ;;  %4387 = vmatprep.subr.bf16.mxu1 %v6172_v29 }
  0x2a   :  { %4210 = vmatmul.mubr.msk.f32.gmra.mrb[16].mxu1 %vm84_vm0, %v42_v8  ;;  %263 = vmatprep.mubr.f32.mxu0 %v6051_v3 }
  0x2b   :  { %448 = vmatprep.mubr.f32.mxu1 %v6051_v3 }
  0x2d   :  { %4191 = vmatmul.mubr.msk.f32.gmra.mrb[18].mxu0 %vm84_vm0, %v43_v9 }
  0x2e   :  { %4211 = vmatmul.mubr.msk.f32.gmra.mrb[18].mxu1 %vm84_vm0, %v43_v9  ;;  %269 = vmatprep.mubr.f32.mxu0 %v6051_v3  ;;  %v6602_v9 = vrot.slane %v62_v37, %v74_v1 }
  0x2f   :  { %454 = vmatprep.mubr.f32.mxu1 %v6051_v3 }
  0x31   :  { %4192 = vmatmul.mubr.msk.f32.gmra.mrb[20].mxu0 %vm84_vm0, %v44_v10 }
  0x32   :  { %4212 = vmatmul.mubr.msk.f32.gmra.mrb[20].mxu1 %vm84_vm0, %v44_v10  ;;  %275 = vmatprep.mubr.f32.mxu0 %v6051_v3 }
  0x33   :  { %460 = vmatprep.mubr.f32.mxu1 %v6051_v3 }
  0x35   :  { %4193 = vmatmul.mubr.msk.f32.gmra.mrb[22].mxu0 %vm84_vm0, %v45_v12 }
  0x36   :  { %4213 = vmatmul.mubr.msk.f32.gmra.mrb[22].mxu1 %vm84_vm0, %v45_v12  ;;  %281 = vmatprep.mubr.f32.mxu0 %v6051_v3 }
  0x37   :  { %466 = vmatprep.mubr.f32.mxu1 %v6051_v3 }
  0x39   :  { %4194 = vmatmul.mubr.msk.f32.gmra.mrb[24].mxu0 %vm84_vm0, %v46_v13 }
  0x3a   :  { %4214 = vmatmul.mubr.msk.f32.gmra.mrb[24].mxu1 %vm84_vm0, %v46_v13  ;;  %287 = vmatprep.mubr.f32.mxu0 %v6051_v3 }
  0x3b   :  { %472 = vmatprep.mubr.f32.mxu1 %v6051_v3 }
  0x3d   :  { %4195 = vmatmul.mubr.msk.f32.gmra.mrb[26].mxu0 %vm84_vm0, %v47_v15 }
  0x3e   :  { %4215 = vmatmul.mubr.msk.f32.gmra.mrb[26].mxu1 %vm84_vm0, %v47_v15  ;;  %293 = vmatprep.mubr.f32.mxu0 %v6051_v3 }
  0x3f   :  { %478 = vmatprep.mubr.f32.mxu1 %v6051_v3 }
  0x41   :  { %4196 = vmatmul.mubr.msk.f32.gmra.mrb[28].mxu0 %vm84_vm0, %v48_v16 }
  0x42   :  { %4216 = vmatmul.mubr.msk.f32.gmra.mrb[28].mxu1 %vm84_vm0, %v48_v16  ;;  %299 = vmatprep.mubr.f32.mxu0 %v6051_v3 }
  0x43   :  { %484 = vmatprep.mubr.f32.mxu1 %v6051_v3 }
  0x45   :  { %4197 = vmatmul.mubr.msk.f32.gmra.mrb[30].mxu0 %vm84_vm0, %v49_v20 }
  0x46   :  { %4217 = vmatmul.mubr.msk.f32.gmra.mrb[30].mxu1 %vm84_vm0, %v49_v20  ;;  %305 = vmatprep.mubr.f32.mxu0 %v6051_v3 }
  0x47   :  { %490 = vmatprep.mubr.f32.mxu1 %v6051_v3 }
  0x49   :  { %4198 = vmatmul.mubr.msk.f32.gmra.mrb[32].mxu0 %vm84_vm0, %v50_v23 }
  0x4a   :  { %4218 = vmatmul.mubr.msk.f32.gmra.mrb[32].mxu1 %vm84_vm0, %v50_v23  ;;  %311 = vmatprep.mubr.f32.mxu0 %v6051_v3 }
  0x4b   :  { %496 = vmatprep.mubr.f32.mxu1 %v6051_v3 }
  0x4d   :  { %4199 = vmatmul.mubr.msk.f32.gmra.mrb[34].mxu0 %vm84_vm0, %v51_v24 }
  0x4e   :  { %4219 = vmatmul.mubr.msk.f32.gmra.mrb[34].mxu1 %vm84_vm0, %v51_v24  ;;  %317 = vmatprep.mubr.f32.mxu0 %v6051_v3 }
  0x4f   :  { %502 = vmatprep.mubr.f32.mxu1 %v6051_v3 }
  0x51   :  { %4200 = vmatmul.mubr.msk.f32.gmra.mrb[36].mxu0 %vm84_vm0, %v52_v25 }
  0x52   :  { %4220 = vmatmul.mubr.msk.f32.gmra.mrb[36].mxu1 %vm84_vm0, %v52_v25  ;;  %323 = vmatprep.mubr.f32.mxu0 %v6051_v3  ;;  %v32_v25 = vld [vmem:[%s7437_s5] sm:$0xff] }
  0x53   :  { %508 = vmatprep.mubr.f32.mxu1 %v6051_v3 }
  0x55   :  { %4201 = vmatmul.mubr.msk.f32.gmra.mrb[38].mxu0 %vm84_vm0, %v53_v26 }
  0x56   :  { %4221 = vmatmul.mubr.msk.f32.gmra.mrb[38].mxu1 %vm84_vm0, %v53_v26  ;;  %729 = vmatprep.mubr.f32.mxu0 %v6051_v3 }
  0x57   :  { %800 = vmatprep.mubr.f32.mxu1 %v6051_v3 }
  0x59   :  { %730 = vmatmul.mubr.f32.vlgmr.msra.gmra.mrb[0].mxu0 %v30_v27 }
  0x5a   :  { %801 = vmatmul.mubr.f32.vlgmr.msra.gmra.mrb[0].mxu1 %v30_v27  ;;  %4357 = vmatpush1.bf16.msra.mxu0 %v6140_v19 }
  0x5b   :  { %4389 = vmatpush1.bf16.msra.mxu1 %v6184_v33  ;;  %4359 = vmatprep.subr.bf16.mxu0 %v6149_v22 }
  0x5c   :  { %4391 = vmatprep.subr.bf16.mxu1 %v6207_v40  ;;  %904 = vmatprep.mubr.f32.mxu0 %v6051_v3 }
  0x5d   :  { %975 = vmatprep.mubr.f32.mxu1 %v6051_v3 }
  0x5e   :  { %4361 = vmatpush1.bf16.msra.mxu0 %v6182_v32 }
  0x5f   :  { %4393 = vmatpush1.bf16.msra.mxu1 %v6220_v44  ;;  %4363 = vmatprep.subr.bf16.mxu0 %v6194_v36 }
  0x60   :  { %4395 = vmatprep.subr.bf16.mxu1 %v6253_v54 }
  0x62   :  { %4365 = vmatpush1.bf16.msra.mxu0 %v6230_v47 }
  0x63   :  { %4397 = vmatpush1.bf16.msra.mxu1 %v6266_v58  ;;  %4367 = vmatprep.subr.bf16.mxu0 %v6240_v50 }
  0x64   :  { %4399 = vmatprep.subr.bf16.mxu1 %v6291_v2 }
  0x66   :  { %4369 = vmatpush1.bf16.msra.mxu0 %v6273_v60 }
  0x67   :  { %4401 = vmatpush1.bf16.msra.mxu1 %v6301_v6  ;;  %4371 = vmatprep.subr.bf16.mxu0 %v6286_v0 }
  0x68   :  { %4403 = vmatprep.subr.bf16.mxu1 %v6337_v18 }
  0x6a   :  { %4373 = vmatpush1.bf16.msra.mxu0 %v6319_v11 }
  0x6b   :  { %4405 = vmatpush1.bf16.msra.mxu1 %v6344_v21  ;;  %4375 = vmatprep.subr.bf16.mxu0 %v6329_v14 }
  0x6c   :  { %4407 = vmatprep.subr.bf16.mxu1 %v6386_v39 }
  0x6e   :  { %4377 = vmatpush1.bf16.msra.mxu0 %v6365_v28 }
  0x6f   :  { %4409 = vmatpush1.bf16.msra.mxu1 %v6390_v41  ;;  %4379 = vmatprep.subr.bf16.mxu0 %v6378_v35 }
  0x70   :  { %4411 = vmatprep.subr.bf16.mxu1 %v6426_v56 }
  0x72   :  { %4381 = vmatpush1.bf16.msra.mxu0 %v6414_v51 }
  0x73   :  { %4413 = vmatpush1.bf16.msra.mxu1 %v6430_v57  ;;  %4383 = vmatprep.subr.bf16.mxu0 %v6418_v52 }
  0x74   :  { %4415 = vmatprep.subr.bf16.mxu1 %v6455_v5 }
  0x76   :  { %4385 = vmatpush1.bf16.msra.mxu0 %v6451_v4 }
  0x77   :  { %4417 = vmatpush1.bf16.msra.mxu1 %v6459_v7  ;;  %4419 = vmatprep.subr.bf16.mxu0 %v6135_v17 }
  0x78   :  { %4451 = vmatprep.subr.bf16.mxu1 %v6172_v29 }
 0x12c   :  { %v731_v45 = vpop.f32.mrb[0].mxu0 }
 0x12d   :  { %v5570_v48 = vadd.f32 %v731_v45, %v6593_v42  ;;  %v802_v49 = vpop.f32.mrb[0].mxu1  ;;  %v733_v53 = vpop.f32.mrb[1].mxu0 }
 0x12e   :  { %v5571_v55 = vadd.f32 %v733_v53, %v6595_v43  ;;  %v804_v59 = vpop.f32.mrb[1].mxu1  ;;  %v5610_v12 = vadd.f32 %v802_v49, %v6602_v9 }
 0x12f   :  { %v4222_v61 = vmul.f32 -1.442695, %v5570_v48  ;;  %v5611_v8 = vadd.f32 %v804_v59, %v6599_v63 }
 0x130   :  { %v4223_v62 = vmul.f32 -1.442695, %v5571_v55 }
 0x131   :  { %5731 = vpow2.f32 %v4222_v61  ;;  %v4224_v10 = vmul.f32 -1.442695, %v5611_v8 }
 0x132   :  { %5733 = vpow2.f32 %v4223_v62 }
 0x133   :  { %5735 = vpow2.f32 %v4224_v10 }
 0x134   :  { %5737 = vtanh.f32 %v5610_v12 }
 0x13b   :  { %v5732_v13 = vpop.eup %5731 }
 0x13c   :  { %v5734_v15 = vpop.eup %5733  ;;  %v814_v16 = vadd.f32 1.0, %v5732_v13 }
 0x13d   :  { %v820_v20 = vadd.f32 1.0, %v5734_v15  ;;  %v5736_v23 = vpop.eup %5735 }
 0x13e   :  { %5739 = vrcp.f32 %v814_v16  ;;  %v5738_v24 = vpop.eup %5737  ;;  %v827_v31 = vadd.f32 1.0, %v5736_v23 }
 0x13f   :  { %5741 = vrcp.f32 %v820_v20 }
 0x140   :  { %5743 = vrcp.f32 %v827_v31 }
 0x148   :  { %v5740_v26 = vpop.eup %5739 }
 0x149   :  { %v5742_v27 = vpop.eup %5741  ;;  %v831_v30 = vmul.f32 %v5740_v26, %v5738_v24 }
 0x14a   :  { %v830_v34 = vmul.f32 %v5742_v27, %v32_v25  ;;  %v5744_v38 = vpop.eup %5743 }
 0x14c   :  { %v6608_v37 = vadd.f32 %v831_v30, %v830_v34 }
 0x14e   :  { %5745 = vtanh.f32 %v6608_v37 }
 0x158   :  { %v5746_v45 = vpop.eup %5745 }
 0x159   :  { %v834_v46 = vmul.f32 %v5746_v45, %v5744_v38 }
 0x15b   :  { %835 = vst [vmem:[%s7438_s6] sm:$0xff] %v834_v46  ;;  %905 = vmatmul.mubr.f32.vlgmr.msra.gmra.mrb[2].mxu0 %v834_v46  ;;  %976 = vmatmul.mubr.f32.vlgmr.msra.gmra.mrb[2].mxu1 %v834_v46 }
 0x15c   :  { %4421 = vmatpush1.bf16.msra.mxu0 %v6140_v19  ;;  %4453 = vmatpush1.bf16.msra.mxu1 %v6184_v33 }
 0x15d   :  { %4423 = vmatprep.subr.bf16.mxu0 %v6149_v22  ;;  %4455 = vmatprep.subr.bf16.mxu1 %v6207_v40 }
 0x15e   :  { %1079 = vmatprep.mubr.f32.mxu0 %v6051_v3  ;;  %1150 = vmatprep.mubr.f32.mxu1 %v6051_v3 }
 0x160   :  { %4425 = vmatpush1.bf16.msra.mxu0 %v6182_v32  ;;  %4457 = vmatpush1.bf16.msra.mxu1 %v6220_v44 }
 0x161   :  { %4427 = vmatprep.subr.bf16.mxu0 %v6194_v36  ;;  %4459 = vmatprep.subr.bf16.mxu1 %v6253_v54 }
 0x164   :  { %4429 = vmatpush1.bf16.msra.mxu0 %v6230_v47  ;;  %4461 = vmatpush1.bf16.msra.mxu1 %v6266_v58 }
 0x165   :  { %4431 = vmatprep.subr.bf16.mxu0 %v6240_v50  ;;  %4463 = vmatprep.subr.bf16.mxu1 %v6291_v2 }
 0x168   :  { %4433 = vmatpush1.bf16.msra.mxu0 %v6273_v60  ;;  %4465 = vmatpush1.bf16.msra.mxu1 %v6301_v6 }
 0x169   :  { %4435 = vmatprep.subr.bf16.mxu0 %v6286_v0  ;;  %4467 = vmatprep.subr.bf16.mxu1 %v6337_v18 }
 0x16c   :  { %4437 = vmatpush1.bf16.msra.mxu0 %v6319_v11  ;;  %4469 = vmatpush1.bf16.msra.mxu1 %v6344_v21 }
 0x16d   :  { %4439 = vmatprep.subr.bf16.mxu0 %v6329_v14  ;;  %4471 = vmatprep.subr.bf16.mxu1 %v6386_v39 }
 0x170   :  { %4441 = vmatpush1.bf16.msra.mxu0 %v6365_v28  ;;  %4473 = vmatpush1.bf16.msra.mxu1 %v6390_v41 }
 0x171   :  { %4443 = vmatprep.subr.bf16.mxu0 %v6378_v35  ;;  %4475 = vmatprep.subr.bf16.mxu1 %v6426_v56 }
 0x174   :  { %4445 = vmatpush1.bf16.msra.mxu0 %v6414_v51  ;;  %4477 = vmatpush1.bf16.msra.mxu1 %v6430_v57 }
 0x175   :  { %4447 = vmatprep.subr.bf16.mxu0 %v6418_v52  ;;  %4479 = vmatprep.subr.bf16.mxu1 %v6455_v5 }
 0x178   :  { %4449 = vmatpush1.bf16.msra.mxu0 %v6451_v4  ;;  %4481 = vmatpush1.bf16.msra.mxu1 %v6459_v7 }
 0x179   :  { %4483 = vmatprep.subr.bf16.mxu0 %v6135_v17  ;;  %4515 = vmatprep.subr.bf16.mxu1 %v6172_v29 }
 0x22e   :  { %v906_v48 = vpop.f32.mrb[2].mxu0  ;;  %v977_v49 = vpop.f32.mrb[2].mxu1 }
 0x22f   :  { %v5572_v53 = vadd.f32 %v906_v48, %v6593_v42  ;;  %v908_v55 = vpop.f32.mrb[3].mxu0  ;;  %v979_v59 = vpop.f32.mrb[3].mxu1  ;;  %v5612_v12 = vadd.f32 %v977_v49, %v6602_v9 }
 0x230   :  { %v5573_v61 = vadd.f32 %v908_v55, %v6595_v43  ;;  %v5613_v8 = vadd.f32 %v979_v59, %v6599_v63 }
 0x231   :  { %v4225_v62 = vmul.f32 -1.442695, %v5572_v53 }
 0x232   :  { %v4226_v1 = vmul.f32 -1.442695, %v5573_v61  ;;  %v4227_v10 = vmul.f32 -1.442695, %v5613_v8 }
 0x233   :  { %5747 = vpow2.f32 %v4225_v62 }
 0x234   :  { %5749 = vpow2.f32 %v4226_v1 }
 0x235   :  { %5751 = vpow2.f32 %v4227_v10 }
 0x236   :  { %5753 = vtanh.f32 %v5612_v12 }
 0x23d   :  { %v5748_v13 = vpop.eup %5747 }
 0x23e   :  { %v5750_v15 = vpop.eup %5749  ;;  %v989_v16 = vadd.f32 1.0, %v5748_v13 }
 0x23f   :  { %v995_v20 = vadd.f32 1.0, %v5750_v15  ;;  %v5752_v23 = vpop.eup %5751 }
 0x240   :  { %5755 = vrcp.f32 %v989_v16  ;;  %v5754_v24 = vpop.eup %5753  ;;  %v1002_v30 = vadd.f32 1.0, %v5752_v23 }
 0x241   :  { %5757 = vrcp.f32 %v995_v20 }
 0x242   :  { %5759 = vrcp.f32 %v1002_v30 }
 0x24a   :  { %v5756_v25 = vpop.eup %5755 }
 0x24b   :  { %v5758_v26 = vpop.eup %5757  ;;  %v1006_v27 = vmul.f32 %v5756_v25, %v5754_v24 }
 0x24c   :  { %v1005_v31 = vmul.f32 %v5758_v26, %v6608_v37  ;;  %v5760_v38 = vpop.eup %5759 }
 0x24e   :  { %v6653_v34 = vadd.f32 %v1006_v27, %v1005_v31 }
 0x250   :  { %5761 = vtanh.f32 %v6653_v34 }
 0x25a   :  { %v5762_v45 = vpop.eup %5761 }
 0x25b   :  { %v1009_v46 = vmul.f32 %v5762_v45, %v5760_v38 }
 0x25d   :  { %1010 = vst [vmem:[%s7438_s6 + $0x8] sm:$0xff] %v1009_v46  ;;  %1080 = vmatmul.mubr.f32.vlgmr.msra.gmra.mrb[4].mxu0 %v1009_v46  ;;  %1151 = vmatmul.mubr.f32.vlgmr.msra.gmra.mrb[4].mxu1 %v1009_v46 }
 0x25e   :  { %4485 = vmatpush1.bf16.msra.mxu0 %v6140_v19  ;;  %4517 = vmatpush1.bf16.msra.mxu1 %v6184_v33 }
 0x25f   :  { %4487 = vmatprep.subr.bf16.mxu0 %v6149_v22  ;;  %4519 = vmatprep.subr.bf16.mxu1 %v6207_v40 }
 0x260   :  { %1254 = vmatprep.mubr.f32.mxu0 %v6051_v3  ;;  %1325 = vmatprep.mubr.f32.mxu1 %v6051_v3 }
 0x262   :  { %4489 = vmatpush1.bf16.msra.mxu0 %v6182_v32  ;;  %4521 = vmatpush1.bf16.msra.mxu1 %v6220_v44 }
 0x263   :  { %4491 = vmatprep.subr.bf16.mxu0 %v6194_v36  ;;  %4523 = vmatprep.subr.bf16.mxu1 %v6253_v54 }
 0x266   :  { %4493 = vmatpush1.bf16.msra.mxu0 %v6230_v47  ;;  %4525 = vmatpush1.bf16.msra.mxu1 %v6266_v58 }
 0x267   :  { %4495 = vmatprep.subr.bf16.mxu0 %v6240_v50  ;;  %4527 = vmatprep.subr.bf16.mxu1 %v6291_v2 }
 0x26a   :  { %4497 = vmatpush1.bf16.msra.mxu0 %v6273_v60  ;;  %4529 = vmatpush1.bf16.msra.mxu1 %v6301_v6 }
 0x26b   :  { %4499 = vmatprep.subr.bf16.mxu0 %v6286_v0  ;;  %4531 = vmatprep.subr.bf16.mxu1 %v6337_v18 }
 0x26e   :  { %4501 = vmatpush1.bf16.msra.mxu0 %v6319_v11  ;;  %4533 = vmatpush1.bf16.msra.mxu1 %v6344_v21 }
 0x26f   :  { %4503 = vmatprep.subr.bf16.mxu0 %v6329_v14  ;;  %4535 = vmatprep.subr.bf16.mxu1 %v6386_v39 }
 0x272   :  { %4505 = vmatpush1.bf16.msra.mxu0 %v6365_v28  ;;  %4537 = vmatpush1.bf16.msra.mxu1 %v6390_v41 }
 0x273   :  { %4507 = vmatprep.subr.bf16.mxu0 %v6378_v35  ;;  %4539 = vmatprep.subr.bf16.mxu1 %v6426_v56 }
 0x276   :  { %4509 = vmatpush1.bf16.msra.mxu0 %v6414_v51  ;;  %4541 = vmatpush1.bf16.msra.mxu1 %v6430_v57 }
 0x277   :  { %4511 = vmatprep.subr.bf16.mxu0 %v6418_v52  ;;  %4543 = vmatprep.subr.bf16.mxu1 %v6455_v5 }
 0x27a   :  { %4513 = vmatpush1.bf16.msra.mxu0 %v6451_v4  ;;  %4545 = vmatpush1.bf16.msra.mxu1 %v6459_v7 }
 0x27b   :  { %4547 = vmatprep.subr.bf16.mxu0 %v6135_v17  ;;  %4579 = vmatprep.subr.bf16.mxu1 %v6172_v29 }
 0x330   :  { %v1081_v37 = vpop.f32.mrb[4].mxu0  ;;  %v1152_v48 = vpop.f32.mrb[4].mxu1 }
 0x331   :  { %v5574_v49 = vadd.f32 %v1081_v37, %v6593_v42  ;;  %v1083_v53 = vpop.f32.mrb[5].mxu0  ;;  %v1154_v55 = vpop.f32.mrb[5].mxu1  ;;  %v5614_v10 = vadd.f32 %v1152_v48, %v6602_v9 }
 0x332   :  { %v5575_v59 = vadd.f32 %v1083_v53, %v6595_v43  ;;  %v5615_v1 = vadd.f32 %v1154_v55, %v6599_v63 }
 0x333   :  { %v4228_v61 = vmul.f32 -1.442695, %v5574_v49 }
 0x334   :  { %v4229_v62 = vmul.f32 -1.442695, %v5575_v59  ;;  %v4230_v8 = vmul.f32 -1.442695, %v5615_v1 }
 0x335   :  { %5763 = vpow2.f32 %v4228_v61 }
 0x336   :  { %5765 = vpow2.f32 %v4229_v62 }
 0x337   :  { %5767 = vpow2.f32 %v4230_v8 }
 0x338   :  { %5769 = vtanh.f32 %v5614_v10 }
 0x33f   :  { %v5764_v12 = vpop.eup %5763 }
 0x340   :  { %v5766_v13 = vpop.eup %5765  ;;  %v1164_v15 = vadd.f32 1.0, %v5764_v12 }
 0x341   :  { %v1170_v16 = vadd.f32 1.0, %v5766_v13  ;;  %v5768_v20 = vpop.eup %5767 }
 0x342   :  { %5771 = vrcp.f32 %v1164_v15  ;;  %v5770_v23 = vpop.eup %5769  ;;  %v1177_v27 = vadd.f32 1.0, %v5768_v20 }
 0x343   :  { %5773 = vrcp.f32 %v1170_v16 }
 0x344   :  { %5775 = vrcp.f32 %v1177_v27 }
 0x34c   :  { %v5772_v24 = vpop.eup %5771 }
 0x34d   :  { %v5774_v25 = vpop.eup %5773  ;;  %v1181_v26 = vmul.f32 %v5772_v24, %v5770_v23 }
 0x34e   :  { %v1180_v30 = vmul.f32 %v5774_v25, %v6653_v34  ;;  %v5776_v38 = vpop.eup %5775 }
 0x350   :  { %v6698_v31 = vadd.f32 %v1181_v26, %v1180_v30 }
 0x352   :  { %5777 = vtanh.f32 %v6698_v31 }
 0x35c   :  { %v5778_v45 = vpop.eup %5777 }
 0x35d   :  { %v1184_v46 = vmul.f32 %v5778_v45, %v5776_v38 }
 0x35f   :  { %1185 = vst [vmem:[%s7438_s6 + $0x10] sm:$0xff] %v1184_v46  ;;  %1255 = vmatmul.mubr.f32.vlgmr.msra.gmra.mrb[6].mxu0 %v1184_v46  ;;  %1326 = vmatmul.mubr.f32.vlgmr.msra.gmra.mrb[6].mxu1 %v1184_v46 }
 0x360   :  { %4549 = vmatpush1.bf16.msra.mxu0 %v6140_v19  ;;  %4581 = vmatpush1.bf16.msra.mxu1 %v6184_v33 }
 0x361   :  { %4551 = vmatprep.subr.bf16.mxu0 %v6149_v22  ;;  %4583 = vmatprep.subr.bf16.mxu1 %v6207_v40 }
 0x362   :  { %1429 = vmatprep.mubr.f32.mxu0 %v6051_v3  ;;  %1500 = vmatprep.mubr.f32.mxu1 %v6051_v3 }
 0x364   :  { %4553 = vmatpush1.bf16.msra.mxu0 %v6182_v32  ;;  %4585 = vmatpush1.bf16.msra.mxu1 %v6220_v44 }
 0x365   :  { %4555 = vmatprep.subr.bf16.mxu0 %v6194_v36  ;;  %4587 = vmatprep.subr.bf16.mxu1 %v6253_v54 }
 0x368   :  { %4557 = vmatpush1.bf16.msra.mxu0 %v6230_v47  ;;  %4589 = vmatpush1.bf16.msra.mxu1 %v6266_v58 }
 0x369   :  { %4559 = vmatprep.subr.bf16.mxu0 %v6240_v50  ;;  %4591 = vmatprep.subr.bf16.mxu1 %v6291_v2 }
 0x36c   :  { %4561 = vmatpush1.bf16.msra.mxu0 %v6273_v60  ;;  %4593 = vmatpush1.bf16.msra.mxu1 %v6301_v6 }
 0x36d   :  { %4563 = vmatprep.subr.bf16.mxu0 %v6286_v0  ;;  %4595 = vmatprep.subr.bf16.mxu1 %v6337_v18 }
 0x370   :  { %4565 = vmatpush1.bf16.msra.mxu0 %v6319_v11  ;;  %4597 = vmatpush1.bf16.msra.mxu1 %v6344_v21 }
 0x371   :  { %4567 = vmatprep.subr.bf16.mxu0 %v6329_v14  ;;  %4599 = vmatprep.subr.bf16.mxu1 %v6386_v39 }
 0x374   :  { %4569 = vmatpush1.bf16.msra.mxu0 %v6365_v28  ;;  %4601 = vmatpush1.bf16.msra.mxu1 %v6390_v41 }
 0x375   :  { %4571 = vmatprep.subr.bf16.mxu0 %v6378_v35  ;;  %4603 = vmatprep.subr.bf16.mxu1 %v6426_v56 }
 0x378   :  { %4573 = vmatpush1.bf16.msra.mxu0 %v6414_v51  ;;  %4605 = vmatpush1.bf16.msra.mxu1 %v6430_v57 }
 0x379   :  { %4575 = vmatprep.subr.bf16.mxu0 %v6418_v52  ;;  %4607 = vmatprep.subr.bf16.mxu1 %v6455_v5 }
 0x37c   :  { %4577 = vmatpush1.bf16.msra.mxu0 %v6451_v4  ;;  %4609 = vmatpush1.bf16.msra.mxu1 %v6459_v7 }
 0x37d   :  { %4611 = vmatprep.subr.bf16.mxu0 %v6135_v17  ;;  %4643 = vmatprep.subr.bf16.mxu1 %v6172_v29 }
 0x432   :  { %v1256_v34 = vpop.f32.mrb[6].mxu0  ;;  %v1327_v37 = vpop.f32.mrb[6].mxu1 }
 0x433   :  { %v5576_v48 = vadd.f32 %v1256_v34, %v6593_v42  ;;  %v1258_v49 = vpop.f32.mrb[7].mxu0  ;;  %v1329_v53 = vpop.f32.mrb[7].mxu1  ;;  %v5616_v8 = vadd.f32 %v1327_v37, %v6602_v9 }
 0x434   :  { %v5577_v55 = vadd.f32 %v1258_v49, %v6595_v43  ;;  %v5617_v62 = vadd.f32 %v1329_v53, %v6599_v63 }
 0x435   :  { %v4231_v59 = vmul.f32 -1.442695, %v5576_v48 }
 0x436   :  { %v4232_v61 = vmul.f32 -1.442695, %v5577_v55  ;;  %v4233_v1 = vmul.f32 -1.442695, %v5617_v62 }
 0x437   :  { %5779 = vpow2.f32 %v4231_v59 }
 0x438   :  { %5781 = vpow2.f32 %v4232_v61 }
 0x439   :  { %5783 = vpow2.f32 %v4233_v1 }
 0x43a   :  { %5785 = vtanh.f32 %v5616_v8 }
 0x441   :  { %v5780_v10 = vpop.eup %5779 }
 0x442   :  { %v5782_v12 = vpop.eup %5781  ;;  %v1339_v13 = vadd.f32 1.0, %v5780_v10 }
 0x443   :  { %v1345_v15 = vadd.f32 1.0, %v5782_v12  ;;  %v5784_v16 = vpop.eup %5783 }
 0x444   :  { %5787 = vrcp.f32 %v1339_v13  ;;  %v5786_v20 = vpop.eup %5785  ;;  %v1352_v26 = vadd.f32 1.0, %v5784_v16 }
 0x445   :  { %5789 = vrcp.f32 %v1345_v15 }
 0x446   :  { %5791 = vrcp.f32 %v1352_v26 }
 0x44e   :  { %v5788_v23 = vpop.eup %5787 }
 0x44f   :  { %v5790_v24 = vpop.eup %5789  ;;  %v1356_v25 = vmul.f32 %v5788_v23, %v5786_v20 }
 0x450   :  { %v1355_v27 = vmul.f32 %v5790_v24, %v6698_v31  ;;  %v5792_v38 = vpop.eup %5791 }
 0x452   :  { %v6743_v30 = vadd.f32 %v1356_v25, %v1355_v27 }
 0x454   :  { %5793 = vtanh.f32 %v6743_v30 }
 0x45e   :  { %v5794_v45 = vpop.eup %5793 }
 0x45f   :  { %v1359_v46 = vmul.f32 %v5794_v45, %v5792_v38 }
 0x461   :  { %1360 = vst [vmem:[%s7438_s6 + $0x18] sm:$0xff] %v1359_v46  ;;  %1430 = vmatmul.mubr.f32.vlgmr.msra.gmra.mrb[8].mxu0 %v1359_v46  ;;  %1501 = vmatmul.mubr.f32.vlgmr.msra.gmra.mrb[8].mxu1 %v1359_v46 }
 0x462   :  { %4613 = vmatpush1.bf16.msra.mxu0 %v6140_v19  ;;  %4645 = vmatpush1.bf16.msra.mxu1 %v6184_v33 }
 0x463   :  { %4615 = vmatprep.subr.bf16.mxu0 %v6149_v22  ;;  %4647 = vmatprep.subr.bf16.mxu1 %v6207_v40 }
 0x464   :  { %1604 = vmatprep.mubr.f32.mxu0 %v6051_v3  ;;  %1675 = vmatprep.mubr.f32.mxu1 %v6051_v3 }
 0x466   :  { %4617 = vmatpush1.bf16.msra.mxu0 %v6182_v32  ;;  %4649 = vmatpush1.bf16.msra.mxu1 %v6220_v44 }
 0x467   :  { %4619 = vmatprep.subr.bf16.mxu0 %v6194_v36  ;;  %4651 = vmatprep.subr.bf16.mxu1 %v6253_v54 }
 0x46a   :  { %4621 = vmatpush1.bf16.msra.mxu0 %v6230_v47  ;;  %4653 = vmatpush1.bf16.msra.mxu1 %v6266_v58 }
 0x46b   :  { %4623 = vmatprep.subr.bf16.mxu0 %v6240_v50  ;;  %4655 = vmatprep.subr.bf16.mxu1 %v6291_v2 }
 0x46e   :  { %4625 = vmatpush1.bf16.msra.mxu0 %v6273_v60  ;;  %4657 = vmatpush1.bf16.msra.mxu1 %v6301_v6 }
 0x46f   :  { %4627 = vmatprep.subr.bf16.mxu0 %v6286_v0  ;;  %4659 = vmatprep.subr.bf16.mxu1 %v6337_v18 }
 0x472   :  { %4629 = vmatpush1.bf16.msra.mxu0 %v6319_v11  ;;  %4661 = vmatpush1.bf16.msra.mxu1 %v6344_v21 }
 0x473   :  { %4631 = vmatprep.subr.bf16.mxu0 %v6329_v14  ;;  %4663 = vmatprep.subr.bf16.mxu1 %v6386_v39 }
 0x476   :  { %4633 = vmatpush1.bf16.msra.mxu0 %v6365_v28  ;;  %4665 = vmatpush1.bf16.msra.mxu1 %v6390_v41 }
 0x477   :  { %4635 = vmatprep.subr.bf16.mxu0 %v6378_v35  ;;  %4667 = vmatprep.subr.bf16.mxu1 %v6426_v56 }
 0x47a   :  { %4637 = vmatpush1.bf16.msra.mxu0 %v6414_v51  ;;  %4669 = vmatpush1.bf16.msra.mxu1 %v6430_v57 }
 0x47b   :  { %4639 = vmatprep.subr.bf16.mxu0 %v6418_v52  ;;  %4671 = vmatprep.subr.bf16.mxu1 %v6455_v5 }
 0x47e   :  { %4641 = vmatpush1.bf16.msra.mxu0 %v6451_v4  ;;  %4673 = vmatpush1.bf16.msra.mxu1 %v6459_v7 }
 0x47f   :  { %4675 = vmatprep.subr.bf16.mxu0 %v6135_v17  ;;  %4707 = vmatprep.subr.bf16.mxu1 %v6172_v29 }
 0x534   :  { %v1431_v31 = vpop.f32.mrb[8].mxu0  ;;  %v1502_v34 = vpop.f32.mrb[8].mxu1 }
 0x535   :  { %v5578_v37 = vadd.f32 %v1431_v31, %v6593_v42  ;;  %v1433_v48 = vpop.f32.mrb[9].mxu0  ;;  %v1504_v49 = vpop.f32.mrb[9].mxu1  ;;  %v5618_v1 = vadd.f32 %v1502_v34, %v6602_v9 }
 0x536   :  { %v5579_v53 = vadd.f32 %v1433_v48, %v6595_v43  ;;  %v5619_v61 = vadd.f32 %v1504_v49, %v6599_v63 }
 0x537   :  { %v4234_v55 = vmul.f32 -1.442695, %v5578_v37 }
 0x538   :  { %v4235_v59 = vmul.f32 -1.442695, %v5579_v53  ;;  %v4236_v62 = vmul.f32 -1.442695, %v5619_v61 }
 0x539   :  { %5795 = vpow2.f32 %v4234_v55 }
 0x53a   :  { %5797 = vpow2.f32 %v4235_v59 }
 0x53b   :  { %5799 = vpow2.f32 %v4236_v62 }
 0x53c   :  { %5801 = vtanh.f32 %v5618_v1 }
 0x543   :  { %v5796_v8 = vpop.eup %5795 }
 0x544   :  { %v5798_v10 = vpop.eup %5797  ;;  %v1514_v12 = vadd.f32 1.0, %v5796_v8 }
 0x545   :  { %v1520_v13 = vadd.f32 1.0, %v5798_v10  ;;  %v5800_v15 = vpop.eup %5799 }
 0x546   :  { %5803 = vrcp.f32 %v1514_v12  ;;  %v5802_v16 = vpop.eup %5801  ;;  %v1527_v25 = vadd.f32 1.0, %v5800_v15 }
 0x547   :  { %5805 = vrcp.f32 %v1520_v13 }
 0x548   :  { %5807 = vrcp.f32 %v1527_v25 }
 0x550   :  { %v5804_v20 = vpop.eup %5803 }
 0x551   :  { %v5806_v23 = vpop.eup %5805  ;;  %v1531_v24 = vmul.f32 %v5804_v20, %v5802_v16 }
 0x552   :  { %v1530_v26 = vmul.f32 %v5806_v23, %v6743_v30  ;;  %v5808_v38 = vpop.eup %5807 }
 0x554   :  { %v6788_v27 = vadd.f32 %v1531_v24, %v1530_v26 }
 0x556   :  { %5809 = vtanh.f32 %v6788_v27 }
 0x560   :  { %v5810_v45 = vpop.eup %5809 }
 0x561   :  { %v1534_v46 = vmul.f32 %v5810_v45, %v5808_v38 }
 0x563   :  { %1535 = vst [vmem:[%s7438_s6 + $0x20] sm:$0xff] %v1534_v46  ;;  %1605 = vmatmul.mubr.f32.vlgmr.msra.gmra.mrb[10].mxu0 %v1534_v46  ;;  %1676 = vmatmul.mubr.f32.vlgmr.msra.gmra.mrb[10].mxu1 %v1534_v46 }
 0x564   :  { %4677 = vmatpush1.bf16.msra.mxu0 %v6140_v19  ;;  %4709 = vmatpush1.bf16.msra.mxu1 %v6184_v33 }
 0x565   :  { %4679 = vmatprep.subr.bf16.mxu0 %v6149_v22  ;;  %4711 = vmatprep.subr.bf16.mxu1 %v6207_v40 }
 0x566   :  { %1779 = vmatprep.mubr.f32.mxu0 %v6051_v3  ;;  %1850 = vmatprep.mubr.f32.mxu1 %v6051_v3 }
 0x568   :  { %4681 = vmatpush1.bf16.msra.mxu0 %v6182_v32  ;;  %4713 = vmatpush1.bf16.msra.mxu1 %v6220_v44 }
 0x569   :  { %4683 = vmatprep.subr.bf16.mxu0 %v6194_v36  ;;  %4715 = vmatprep.subr.bf16.mxu1 %v6253_v54 }
 0x56c   :  { %4685 = vmatpush1.bf16.msra.mxu0 %v6230_v47  ;;  %4717 = vmatpush1.bf16.msra.mxu1 %v6266_v58 }
 0x56d   :  { %4687 = vmatprep.subr.bf16.mxu0 %v6240_v50  ;;  %4719 = vmatprep.subr.bf16.mxu1 %v6291_v2 }
 0x570   :  { %4689 = vmatpush1.bf16.msra.mxu0 %v6273_v60  ;;  %4721 = vmatpush1.bf16.msra.mxu1 %v6301_v6 }
 0x571   :  { %4691 = vmatprep.subr.bf16.mxu0 %v6286_v0  ;;  %4723 = vmatprep.subr.bf16.mxu1 %v6337_v18 }
 0x574   :  { %4693 = vmatpush1.bf16.msra.mxu0 %v6319_v11  ;;  %4725 = vmatpush1.bf16.msra.mxu1 %v6344_v21 }
 0x575   :  { %4695 = vmatprep.subr.bf16.mxu0 %v6329_v14  ;;  %4727 = vmatprep.subr.bf16.mxu1 %v6386_v39 }
 0x578   :  { %4697 = vmatpush1.bf16.msra.mxu0 %v6365_v28  ;;  %4729 = vmatpush1.bf16.msra.mxu1 %v6390_v41 }
 0x579   :  { %4699 = vmatprep.subr.bf16.mxu0 %v6378_v35  ;;  %4731 = vmatprep.subr.bf16.mxu1 %v6426_v56 }
 0x57c   :  { %4701 = vmatpush1.bf16.msra.mxu0 %v6414_v51  ;;  %4733 = vmatpush1.bf16.msra.mxu1 %v6430_v57 }
 0x57d   :  { %4703 = vmatprep.subr.bf16.mxu0 %v6418_v52  ;;  %4735 = vmatprep.subr.bf16.mxu1 %v6455_v5 }
 0x580   :  { %4705 = vmatpush1.bf16.msra.mxu0 %v6451_v4  ;;  %4737 = vmatpush1.bf16.msra.mxu1 %v6459_v7 }
 0x581   :  { %4739 = vmatprep.subr.bf16.mxu0 %v6135_v17  ;;  %4771 = vmatprep.subr.bf16.mxu1 %v6172_v29 }
 0x636   :  { %v1606_v30 = vpop.f32.mrb[10].mxu0  ;;  %v1677_v31 = vpop.f32.mrb[10].mxu1 }
 0x637   :  { %v5580_v34 = vadd.f32 %v1606_v30, %v6593_v42  ;;  %v1608_v37 = vpop.f32.mrb[11].mxu0  ;;  %v1679_v48 = vpop.f32.mrb[11].mxu1  ;;  %v5620_v62 = vadd.f32 %v1677_v31, %v6602_v9 }
 0x638   :  { %v5581_v49 = vadd.f32 %v1608_v37, %v6595_v43  ;;  %v5621_v59 = vadd.f32 %v1679_v48, %v6599_v63 }
 0x639   :  { %v4237_v53 = vmul.f32 -1.442695, %v5580_v34 }
 0x63a   :  { %v4238_v55 = vmul.f32 -1.442695, %v5581_v49  ;;  %v4239_v61 = vmul.f32 -1.442695, %v5621_v59 }
 0x63b   :  { %5811 = vpow2.f32 %v4237_v53 }
 0x63c   :  { %5813 = vpow2.f32 %v4238_v55 }
 0x63d   :  { %5815 = vpow2.f32 %v4239_v61 }
 0x63e   :  { %5817 = vtanh.f32 %v5620_v62 }
 0x645   :  { %v5812_v1 = vpop.eup %5811 }
 0x646   :  { %v5814_v8 = vpop.eup %5813  ;;  %v1689_v10 = vadd.f32 1.0, %v5812_v1 }
 0x647   :  { %v1695_v12 = vadd.f32 1.0, %v5814_v8  ;;  %v5816_v13 = vpop.eup %5815 }
 0x648   :  { %5819 = vrcp.f32 %v1689_v10  ;;  %v5818_v15 = vpop.eup %5817  ;;  %v1702_v24 = vadd.f32 1.0, %v5816_v13 }
 0x649   :  { %5821 = vrcp.f32 %v1695_v12 }
 0x64a   :  { %5823 = vrcp.f32 %v1702_v24 }
 0x652   :  { %v5820_v16 = vpop.eup %5819 }
 0x653   :  { %v5822_v20 = vpop.eup %5821  ;;  %v1706_v23 = vmul.f32 %v5820_v16, %v5818_v15 }
 0x654   :  { %v1705_v25 = vmul.f32 %v5822_v20, %v6788_v27  ;;  %v5824_v38 = vpop.eup %5823 }
 0x656   :  { %v6833_v26 = vadd.f32 %v1706_v23, %v1705_v25 }
 0x658   :  { %5825 = vtanh.f32 %v6833_v26 }
 0x662   :  { %v5826_v45 = vpop.eup %5825 }
 0x663   :  { %v1709_v46 = vmul.f32 %v5826_v45, %v5824_v38 }
 0x665   :  { %1710 = vst [vmem:[%s7438_s6 + $0x28] sm:$0xff] %v1709_v46  ;;  %1780 = vmatmul.mubr.f32.vlgmr.msra.gmra.mrb[12].mxu0 %v1709_v46  ;;  %1851 = vmatmul.mubr.f32.vlgmr.msra.gmra.mrb[12].mxu1 %v1709_v46 }
 0x666   :  { %4741 = vmatpush1.bf16.msra.mxu0 %v6140_v19  ;;  %4773 = vmatpush1.bf16.msra.mxu1 %v6184_v33 }
 0x667   :  { %4743 = vmatprep.subr.bf16.mxu0 %v6149_v22  ;;  %4775 = vmatprep.subr.bf16.mxu1 %v6207_v40 }
 0x668   :  { %1954 = vmatprep.mubr.f32.mxu0 %v6051_v3  ;;  %2025 = vmatprep.mubr.f32.mxu1 %v6051_v3 }
 0x66a   :  { %4745 = vmatpush1.bf16.msra.mxu0 %v6182_v32  ;;  %4777 = vmatpush1.bf16.msra.mxu1 %v6220_v44 }
 0x66b   :  { %4747 = vmatprep.subr.bf16.mxu0 %v6194_v36  ;;  %4779 = vmatprep.subr.bf16.mxu1 %v6253_v54 }
 0x66e   :  { %4749 = vmatpush1.bf16.msra.mxu0 %v6230_v47  ;;  %4781 = vmatpush1.bf16.msra.mxu1 %v6266_v58 }
 0x66f   :  { %4751 = vmatprep.subr.bf16.mxu0 %v6240_v50  ;;  %4783 = vmatprep.subr.bf16.mxu1 %v6291_v2 }
 0x672   :  { %4753 = vmatpush1.bf16.msra.mxu0 %v6273_v60  ;;  %4785 = vmatpush1.bf16.msra.mxu1 %v6301_v6 }
 0x673   :  { %4755 = vmatprep.subr.bf16.mxu0 %v6286_v0  ;;  %4787 = vmatprep.subr.bf16.mxu1 %v6337_v18 }
 0x676   :  { %4757 = vmatpush1.bf16.msra.mxu0 %v6319_v11  ;;  %4789 = vmatpush1.bf16.msra.mxu1 %v6344_v21 }
 0x677   :  { %4759 = vmatprep.subr.bf16.mxu0 %v6329_v14  ;;  %4791 = vmatprep.subr.bf16.mxu1 %v6386_v39 }
 0x67a   :  { %4761 = vmatpush1.bf16.msra.mxu0 %v6365_v28  ;;  %4793 = vmatpush1.bf16.msra.mxu1 %v6390_v41 }
 0x67b   :  { %4763 = vmatprep.subr.bf16.mxu0 %v6378_v35  ;;  %4795 = vmatprep.subr.bf16.mxu1 %v6426_v56 }
 0x67e   :  { %4765 = vmatpush1.bf16.msra.mxu0 %v6414_v51  ;;  %4797 = vmatpush1.bf16.msra.mxu1 %v6430_v57 }
 0x67f   :  { %4767 = vmatprep.subr.bf16.mxu0 %v6418_v52  ;;  %4799 = vmatprep.subr.bf16.mxu1 %v6455_v5 }
 0x682   :  { %4769 = vmatpush1.bf16.msra.mxu0 %v6451_v4  ;;  %4801 = vmatpush1.bf16.msra.mxu1 %v6459_v7 }
 0x683   :  { %4803 = vmatprep.subr.bf16.mxu0 %v6135_v17  ;;  %4835 = vmatprep.subr.bf16.mxu1 %v6172_v29 }
 0x738   :  { %v1781_v27 = vpop.f32.mrb[12].mxu0  ;;  %v1852_v30 = vpop.f32.mrb[12].mxu1 }
 0x739   :  { %v5582_v31 = vadd.f32 %v1781_v27, %v6593_v42  ;;  %v1783_v34 = vpop.f32.mrb[13].mxu0  ;;  %v1854_v37 = vpop.f32.mrb[13].mxu1  ;;  %v5622_v61 = vadd.f32 %v1852_v30, %v6602_v9 }
 0x73a   :  { %v5583_v48 = vadd.f32 %v1783_v34, %v6595_v43  ;;  %v5623_v55 = vadd.f32 %v1854_v37, %v6599_v63 }
 0x73b   :  { %v4240_v49 = vmul.f32 -1.442695, %v5582_v31 }
 0x73c   :  { %v4241_v53 = vmul.f32 -1.442695, %v5583_v48  ;;  %v4242_v59 = vmul.f32 -1.442695, %v5623_v55 }
 0x73d   :  { %5827 = vpow2.f32 %v4240_v49 }
 0x73e   :  { %5829 = vpow2.f32 %v4241_v53 }
 0x73f   :  { %5831 = vpow2.f32 %v4242_v59 }
 0x740   :  { %5833 = vtanh.f32 %v5622_v61 }
 0x747   :  { %v5828_v62 = vpop.eup %5827 }
 0x748   :  { %v5830_v1 = vpop.eup %5829  ;;  %v1864_v8 = vadd.f32 1.0, %v5828_v62 }
 0x749   :  { %v1870_v10 = vadd.f32 1.0, %v5830_v1  ;;  %v5832_v12 = vpop.eup %5831 }
 0x74a   :  { %5835 = vrcp.f32 %v1864_v8  ;;  %v5834_v13 = vpop.eup %5833  ;;  %v1877_v23 = vadd.f32 1.0, %v5832_v12 }
 0x74b   :  { %5837 = vrcp.f32 %v1870_v10 }
 0x74c   :  { %5839 = vrcp.f32 %v1877_v23 }
 0x754   :  { %v5836_v15 = vpop.eup %5835 }
 0x755   :  { %v5838_v16 = vpop.eup %5837  ;;  %v1881_v20 = vmul.f32 %v5836_v15, %v5834_v13 }
 0x756   :  { %v1880_v24 = vmul.f32 %v5838_v16, %v6833_v26  ;;  %v5840_v38 = vpop.eup %5839 }
 0x758   :  { %v6878_v25 = vadd.f32 %v1881_v20, %v1880_v24 }
 0x75a   :  { %5841 = vtanh.f32 %v6878_v25 }
 0x764   :  { %v5842_v45 = vpop.eup %5841 }
 0x765   :  { %v1884_v46 = vmul.f32 %v5842_v45, %v5840_v38 }
 0x767   :  { %1885 = vst [vmem:[%s7438_s6 + $0x30] sm:$0xff] %v1884_v46  ;;  %1955 = vmatmul.mubr.f32.vlgmr.msra.gmra.mrb[14].mxu0 %v1884_v46  ;;  %2026 = vmatmul.mubr.f32.vlgmr.msra.gmra.mrb[14].mxu1 %v1884_v46 }
 0x768   :  { %4805 = vmatpush1.bf16.msra.mxu0 %v6140_v19  ;;  %4837 = vmatpush1.bf16.msra.mxu1 %v6184_v33 }
 0x769   :  { %4807 = vmatprep.subr.bf16.mxu0 %v6149_v22  ;;  %4839 = vmatprep.subr.bf16.mxu1 %v6207_v40 }
 0x76a   :  { %2129 = vmatprep.mubr.f32.mxu0 %v6051_v3  ;;  %2200 = vmatprep.mubr.f32.mxu1 %v6051_v3 }
 0x76c   :  { %4809 = vmatpush1.bf16.msra.mxu0 %v6182_v32  ;;  %4841 = vmatpush1.bf16.msra.mxu1 %v6220_v44 }
 0x76d   :  { %4811 = vmatprep.subr.bf16.mxu0 %v6194_v36  ;;  %4843 = vmatprep.subr.bf16.mxu1 %v6253_v54 }
 0x770   :  { %4813 = vmatpush1.bf16.msra.mxu0 %v6230_v47  ;;  %4845 = vmatpush1.bf16.msra.mxu1 %v6266_v58 }
 0x771   :  { %4815 = vmatprep.subr.bf16.mxu0 %v6240_v50  ;;  %4847 = vmatprep.subr.bf16.mxu1 %v6291_v2 }
 0x774   :  { %4817 = vmatpush1.bf16.msra.mxu0 %v6273_v60  ;;  %4849 = vmatpush1.bf16.msra.mxu1 %v6301_v6 }
 0x775   :  { %4819 = vmatprep.subr.bf16.mxu0 %v6286_v0  ;;  %4851 = vmatprep.subr.bf16.mxu1 %v6337_v18 }
 0x778   :  { %4821 = vmatpush1.bf16.msra.mxu0 %v6319_v11  ;;  %4853 = vmatpush1.bf16.msra.mxu1 %v6344_v21 }
 0x779   :  { %4823 = vmatprep.subr.bf16.mxu0 %v6329_v14  ;;  %4855 = vmatprep.subr.bf16.mxu1 %v6386_v39 }
 0x77c   :  { %4825 = vmatpush1.bf16.msra.mxu0 %v6365_v28  ;;  %4857 = vmatpush1.bf16.msra.mxu1 %v6390_v41 }
 0x77d   :  { %4827 = vmatprep.subr.bf16.mxu0 %v6378_v35  ;;  %4859 = vmatprep.subr.bf16.mxu1 %v6426_v56 }
 0x780   :  { %4829 = vmatpush1.bf16.msra.mxu0 %v6414_v51  ;;  %4861 = vmatpush1.bf16.msra.mxu1 %v6430_v57 }
 0x781   :  { %4831 = vmatprep.subr.bf16.mxu0 %v6418_v52  ;;  %4863 = vmatprep.subr.bf16.mxu1 %v6455_v5 }
 0x784   :  { %4833 = vmatpush1.bf16.msra.mxu0 %v6451_v4  ;;  %4865 = vmatpush1.bf16.msra.mxu1 %v6459_v7 }
 0x785   :  { %4867 = vmatprep.subr.bf16.mxu0 %v6135_v17  ;;  %4899 = vmatprep.subr.bf16.mxu1 %v6172_v29 }
 0x83a   :  { %v1956_v26 = vpop.f32.mrb[14].mxu0  ;;  %v2027_v27 = vpop.f32.mrb[14].mxu1 }
 0x83b   :  { %v5584_v30 = vadd.f32 %v1956_v26, %v6593_v42  ;;  %v1958_v31 = vpop.f32.mrb[15].mxu0  ;;  %v2029_v34 = vpop.f32.mrb[15].mxu1  ;;  %v5624_v59 = vadd.f32 %v2027_v27, %v6602_v9 }
 0x83c   :  { %v5585_v37 = vadd.f32 %v1958_v31, %v6595_v43  ;;  %v5625_v53 = vadd.f32 %v2029_v34, %v6599_v63 }
 0x83d   :  { %v4243_v48 = vmul.f32 -1.442695, %v5584_v30 }
 0x83e   :  { %v4244_v49 = vmul.f32 -1.442695, %v5585_v37  ;;  %v4245_v55 = vmul.f32 -1.442695, %v5625_v53 }
 0x83f   :  { %5843 = vpow2.f32 %v4243_v48 }
 0x840   :  { %5845 = vpow2.f32 %v4244_v49 }
 0x841   :  { %5847 = vpow2.f32 %v4245_v55 }
 0x842   :  { %5849 = vtanh.f32 %v5624_v59 }
 0x849   :  { %v5844_v61 = vpop.eup %5843 }
 0x84a   :  { %v5846_v62 = vpop.eup %5845  ;;  %v2039_v1 = vadd.f32 1.0, %v5844_v61 }
 0x84b   :  { %v2045_v8 = vadd.f32 1.0, %v5846_v62  ;;  %v5848_v10 = vpop.eup %5847 }
 0x84c   :  { %5851 = vrcp.f32 %v2039_v1  ;;  %v5850_v12 = vpop.eup %5849  ;;  %v2052_v20 = vadd.f32 1.0, %v5848_v10 }
 0x84d   :  { %5853 = vrcp.f32 %v2045_v8 }
 0x84e   :  { %5855 = vrcp.f32 %v2052_v20 }
 0x856   :  { %v5852_v13 = vpop.eup %5851 }
 0x857   :  { %v5854_v15 = vpop.eup %5853  ;;  %v2056_v16 = vmul.f32 %v5852_v13, %v5850_v12 }
 0x858   :  { %v2055_v23 = vmul.f32 %v5854_v15, %v6878_v25  ;;  %v5856_v38 = vpop.eup %5855 }
 0x85a   :  { %v6923_v24 = vadd.f32 %v2056_v16, %v2055_v23 }
 0x85c   :  { %5857 = vtanh.f32 %v6923_v24 }
 0x866   :  { %v5858_v45 = vpop.eup %5857 }
 0x867   :  { %v2059_v46 = vmul.f32 %v5858_v45, %v5856_v38 }
 0x869   :  { %2060 = vst [vmem:[%s7438_s6 + $0x38] sm:$0xff] %v2059_v46  ;;  %2130 = vmatmul.mubr.f32.vlgmr.msra.gmra.mrb[16].mxu0 %v2059_v46  ;;  %2201 = vmatmul.mubr.f32.vlgmr.msra.gmra.mrb[16].mxu1 %v2059_v46 }
 0x86a   :  { %4869 = vmatpush1.bf16.msra.mxu0 %v6140_v19  ;;  %4901 = vmatpush1.bf16.msra.mxu1 %v6184_v33 }
 0x86b   :  { %4871 = vmatprep.subr.bf16.mxu0 %v6149_v22  ;;  %4903 = vmatprep.subr.bf16.mxu1 %v6207_v40 }
 0x86c   :  { %2304 = vmatprep.mubr.f32.mxu0 %v6051_v3  ;;  %2375 = vmatprep.mubr.f32.mxu1 %v6051_v3 }
 0x86e   :  { %4873 = vmatpush1.bf16.msra.mxu0 %v6182_v32  ;;  %4905 = vmatpush1.bf16.msra.mxu1 %v6220_v44 }
 0x86f   :  { %4875 = vmatprep.subr.bf16.mxu0 %v6194_v36  ;;  %4907 = vmatprep.subr.bf16.mxu1 %v6253_v54 }
 0x872   :  { %4877 = vmatpush1.bf16.msra.mxu0 %v6230_v47  ;;  %4909 = vmatpush1.bf16.msra.mxu1 %v6266_v58 }
 0x873   :  { %4879 = vmatprep.subr.bf16.mxu0 %v6240_v50  ;;  %4911 = vmatprep.subr.bf16.mxu1 %v6291_v2 }
 0x876   :  { %4881 = vmatpush1.bf16.msra.mxu0 %v6273_v60  ;;  %4913 = vmatpush1.bf16.msra.mxu1 %v6301_v6 }
 0x877   :  { %4883 = vmatprep.subr.bf16.mxu0 %v6286_v0  ;;  %4915 = vmatprep.subr.bf16.mxu1 %v6337_v18 }
 0x87a   :  { %4885 = vmatpush1.bf16.msra.mxu0 %v6319_v11  ;;  %4917 = vmatpush1.bf16.msra.mxu1 %v6344_v21 }
 0x87b   :  { %4887 = vmatprep.subr.bf16.mxu0 %v6329_v14  ;;  %4919 = vmatprep.subr.bf16.mxu1 %v6386_v39 }
 0x87e   :  { %4889 = vmatpush1.bf16.msra.mxu0 %v6365_v28  ;;  %4921 = vmatpush1.bf16.msra.mxu1 %v6390_v41 }
 0x87f   :  { %4891 = vmatprep.subr.bf16.mxu0 %v6378_v35  ;;  %4923 = vmatprep.subr.bf16.mxu1 %v6426_v56 }
 0x882   :  { %4893 = vmatpush1.bf16.msra.mxu0 %v6414_v51  ;;  %4925 = vmatpush1.bf16.msra.mxu1 %v6430_v57 }
 0x883   :  { %4895 = vmatprep.subr.bf16.mxu0 %v6418_v52  ;;  %4927 = vmatprep.subr.bf16.mxu1 %v6455_v5 }
 0x886   :  { %4897 = vmatpush1.bf16.msra.mxu0 %v6451_v4  ;;  %4929 = vmatpush1.bf16.msra.mxu1 %v6459_v7 }
 0x887   :  { %4931 = vmatprep.subr.bf16.mxu0 %v6135_v17  ;;  %4963 = vmatprep.subr.bf16.mxu1 %v6172_v29 }
 0x93c   :  { %v2131_v25 = vpop.f32.mrb[16].mxu0  ;;  %v2202_v26 = vpop.f32.mrb[16].mxu1 }
 0x93d   :  { %v5586_v27 = vadd.f32 %v2131_v25, %v6593_v42  ;;  %v2133_v30 = vpop.f32.mrb[17].mxu0  ;;  %v2204_v31 = vpop.f32.mrb[17].mxu1  ;;  %v5626_v55 = vadd.f32 %v2202_v26, %v6602_v9 }
 0x93e   :  { %v5587_v34 = vadd.f32 %v2133_v30, %v6595_v43  ;;  %v5627_v49 = vadd.f32 %v2204_v31, %v6599_v63 }
 0x93f   :  { %v4246_v37 = vmul.f32 -1.442695, %v5586_v27 }
 0x940   :  { %v4247_v48 = vmul.f32 -1.442695, %v5587_v34  ;;  %v4248_v53 = vmul.f32 -1.442695, %v5627_v49 }
 0x941   :  { %5859 = vpow2.f32 %v4246_v37 }
 0x942   :  { %5861 = vpow2.f32 %v4247_v48 }
 0x943   :  { %5863 = vpow2.f32 %v4248_v53 }
 0x944   :  { %5865 = vtanh.f32 %v5626_v55 }
 0x94b   :  { %v5860_v59 = vpop.eup %5859 }
 0x94c   :  { %v5862_v61 = vpop.eup %5861  ;;  %v2214_v62 = vadd.f32 1.0, %v5860_v59 }
 0x94d   :  { %v2220_v1 = vadd.f32 1.0, %v5862_v61  ;;  %v5864_v8 = vpop.eup %5863 }
 0x94e   :  { %5867 = vrcp.f32 %v2214_v62  ;;  %v5866_v10 = vpop.eup %5865  ;;  %v2227_v16 = vadd.f32 1.0, %v5864_v8 }
 0x94f   :  { %5869 = vrcp.f32 %v2220_v1 }
 0x950   :  { %5871 = vrcp.f32 %v2227_v16 }
 0x958   :  { %v5868_v12 = vpop.eup %5867 }
 0x959   :  { %v5870_v13 = vpop.eup %5869  ;;  %v2231_v15 = vmul.f32 %v5868_v12, %v5866_v10 }
 0x95a   :  { %v2230_v20 = vmul.f32 %v5870_v13, %v6923_v24  ;;  %v5872_v38 = vpop.eup %5871 }
 0x95c   :  { %v6968_v23 = vadd.f32 %v2231_v15, %v2230_v20 }
 0x95e   :  { %5873 = vtanh.f32 %v6968_v23 }
 0x968   :  { %v5874_v45 = vpop.eup %5873 }
 0x969   :  { %v2234_v46 = vmul.f32 %v5874_v45, %v5872_v38 }
 0x96b   :  { %2235 = vst [vmem:[%s7438_s6 + $0x40] sm:$0xff] %v2234_v46  ;;  %2305 = vmatmul.mubr.f32.vlgmr.msra.gmra.mrb[18].mxu0 %v2234_v46  ;;  %2376 = vmatmul.mubr.f32.vlgmr.msra.gmra.mrb[18].mxu1 %v2234_v46 }
 0x96c   :  { %4933 = vmatpush1.bf16.msra.mxu0 %v6140_v19  ;;  %4965 = vmatpush1.bf16.msra.mxu1 %v6184_v33 }
 0x96d   :  { %4935 = vmatprep.subr.bf16.mxu0 %v6149_v22  ;;  %4967 = vmatprep.subr.bf16.mxu1 %v6207_v40 }
 0x96e   :  { %2479 = vmatprep.mubr.f32.mxu0 %v6051_v3  ;;  %2550 = vmatprep.mubr.f32.mxu1 %v6051_v3 }
 0x970   :  { %4937 = vmatpush1.bf16.msra.mxu0 %v6182_v32  ;;  %4969 = vmatpush1.bf16.msra.mxu1 %v6220_v44 }
 0x971   :  { %4939 = vmatprep.subr.bf16.mxu0 %v6194_v36  ;;  %4971 = vmatprep.subr.bf16.mxu1 %v6253_v54 }
 0x974   :  { %4941 = vmatpush1.bf16.msra.mxu0 %v6230_v47  ;;  %4973 = vmatpush1.bf16.msra.mxu1 %v6266_v58 }
 0x975   :  { %4943 = vmatprep.subr.bf16.mxu0 %v6240_v50  ;;  %4975 = vmatprep.subr.bf16.mxu1 %v6291_v2 }
 0x978   :  { %4945 = vmatpush1.bf16.msra.mxu0 %v6273_v60  ;;  %4977 = vmatpush1.bf16.msra.mxu1 %v6301_v6 }
 0x979   :  { %4947 = vmatprep.subr.bf16.mxu0 %v6286_v0  ;;  %4979 = vmatprep.subr.bf16.mxu1 %v6337_v18 }
 0x97c   :  { %4949 = vmatpush1.bf16.msra.mxu0 %v6319_v11  ;;  %4981 = vmatpush1.bf16.msra.mxu1 %v6344_v21 }
 0x97d   :  { %4951 = vmatprep.subr.bf16.mxu0 %v6329_v14  ;;  %4983 = vmatprep.subr.bf16.mxu1 %v6386_v39 }
 0x980   :  { %4953 = vmatpush1.bf16.msra.mxu0 %v6365_v28  ;;  %4985 = vmatpush1.bf16.msra.mxu1 %v6390_v41 }
 0x981   :  { %4955 = vmatprep.subr.bf16.mxu0 %v6378_v35  ;;  %4987 = vmatprep.subr.bf16.mxu1 %v6426_v56 }
 0x984   :  { %4957 = vmatpush1.bf16.msra.mxu0 %v6414_v51  ;;  %4989 = vmatpush1.bf16.msra.mxu1 %v6430_v57 }
 0x985   :  { %4959 = vmatprep.subr.bf16.mxu0 %v6418_v52  ;;  %4991 = vmatprep.subr.bf16.mxu1 %v6455_v5 }
 0x988   :  { %4961 = vmatpush1.bf16.msra.mxu0 %v6451_v4  ;;  %4993 = vmatpush1.bf16.msra.mxu1 %v6459_v7 }
 0x989   :  { %4995 = vmatprep.subr.bf16.mxu0 %v6135_v17  ;;  %5027 = vmatprep.subr.bf16.mxu1 %v6172_v29 }
 0xa3e   :  { %v2306_v24 = vpop.f32.mrb[18].mxu0  ;;  %v2377_v25 = vpop.f32.mrb[18].mxu1 }
 0xa3f   :  { %v5588_v26 = vadd.f32 %v2306_v24, %v6593_v42  ;;  %v2308_v27 = vpop.f32.mrb[19].mxu0  ;;  %v2379_v30 = vpop.f32.mrb[19].mxu1  ;;  %v5628_v53 = vadd.f32 %v2377_v25, %v6602_v9 }
 0xa40   :  { %v5589_v31 = vadd.f32 %v2308_v27, %v6595_v43  ;;  %v5629_v48 = vadd.f32 %v2379_v30, %v6599_v63 }
 0xa41   :  { %v4249_v34 = vmul.f32 -1.442695, %v5588_v26 }
 0xa42   :  { %v4250_v37 = vmul.f32 -1.442695, %v5589_v31  ;;  %v4251_v49 = vmul.f32 -1.442695, %v5629_v48 }
 0xa43   :  { %5875 = vpow2.f32 %v4249_v34 }
 0xa44   :  { %5877 = vpow2.f32 %v4250_v37 }
 0xa45   :  { %5879 = vpow2.f32 %v4251_v49 }
 0xa46   :  { %5881 = vtanh.f32 %v5628_v53 }
 0xa4d   :  { %v5876_v55 = vpop.eup %5875 }
 0xa4e   :  { %v5878_v59 = vpop.eup %5877  ;;  %v2389_v61 = vadd.f32 1.0, %v5876_v55 }
 0xa4f   :  { %v2395_v62 = vadd.f32 1.0, %v5878_v59  ;;  %v5880_v1 = vpop.eup %5879 }
 0xa50   :  { %5883 = vrcp.f32 %v2389_v61  ;;  %v5882_v8 = vpop.eup %5881  ;;  %v2402_v15 = vadd.f32 1.0, %v5880_v1 }
 0xa51   :  { %5885 = vrcp.f32 %v2395_v62 }
 0xa52   :  { %5887 = vrcp.f32 %v2402_v15 }
 0xa5a   :  { %v5884_v10 = vpop.eup %5883 }
 0xa5b   :  { %v5886_v12 = vpop.eup %5885  ;;  %v2406_v13 = vmul.f32 %v5884_v10, %v5882_v8 }
 0xa5c   :  { %v2405_v16 = vmul.f32 %v5886_v12, %v6968_v23  ;;  %v5888_v38 = vpop.eup %5887 }
 0xa5e   :  { %v7013_v20 = vadd.f32 %v2406_v13, %v2405_v16 }
 0xa60   :  { %5889 = vtanh.f32 %v7013_v20 }
 0xa6a   :  { %v5890_v45 = vpop.eup %5889 }
 0xa6b   :  { %v2409_v46 = vmul.f32 %v5890_v45, %v5888_v38 }
 0xa6d   :  { %2410 = vst [vmem:[%s7438_s6 + $0x48] sm:$0xff] %v2409_v46  ;;  %2480 = vmatmul.mubr.f32.vlgmr.msra.gmra.mrb[20].mxu0 %v2409_v46  ;;  %2551 = vmatmul.mubr.f32.vlgmr.msra.gmra.mrb[20].mxu1 %v2409_v46 }
 0xa6e   :  { %4997 = vmatpush1.bf16.msra.mxu0 %v6140_v19  ;;  %5029 = vmatpush1.bf16.msra.mxu1 %v6184_v33 }
 0xa6f   :  { %4999 = vmatprep.subr.bf16.mxu0 %v6149_v22  ;;  %5031 = vmatprep.subr.bf16.mxu1 %v6207_v40 }
 0xa70   :  { %2654 = vmatprep.mubr.f32.mxu0 %v6051_v3  ;;  %2725 = vmatprep.mubr.f32.mxu1 %v6051_v3 }
 0xa72   :  { %5001 = vmatpush1.bf16.msra.mxu0 %v6182_v32  ;;  %5033 = vmatpush1.bf16.msra.mxu1 %v6220_v44 }
 0xa73   :  { %5003 = vmatprep.subr.bf16.mxu0 %v6194_v36  ;;  %5035 = vmatprep.subr.bf16.mxu1 %v6253_v54 }
 0xa76   :  { %5005 = vmatpush1.bf16.msra.mxu0 %v6230_v47  ;;  %5037 = vmatpush1.bf16.msra.mxu1 %v6266_v58 }
 0xa77   :  { %5007 = vmatprep.subr.bf16.mxu0 %v6240_v50  ;;  %5039 = vmatprep.subr.bf16.mxu1 %v6291_v2 }
 0xa7a   :  { %5009 = vmatpush1.bf16.msra.mxu0 %v6273_v60  ;;  %5041 = vmatpush1.bf16.msra.mxu1 %v6301_v6 }
 0xa7b   :  { %5011 = vmatprep.subr.bf16.mxu0 %v6286_v0  ;;  %5043 = vmatprep.subr.bf16.mxu1 %v6337_v18 }
 0xa7e   :  { %5013 = vmatpush1.bf16.msra.mxu0 %v6319_v11  ;;  %5045 = vmatpush1.bf16.msra.mxu1 %v6344_v21 }
 0xa7f   :  { %5015 = vmatprep.subr.bf16.mxu0 %v6329_v14  ;;  %5047 = vmatprep.subr.bf16.mxu1 %v6386_v39 }
 0xa82   :  { %5017 = vmatpush1.bf16.msra.mxu0 %v6365_v28  ;;  %5049 = vmatpush1.bf16.msra.mxu1 %v6390_v41 }
 0xa83   :  { %5019 = vmatprep.subr.bf16.mxu0 %v6378_v35  ;;  %5051 = vmatprep.subr.bf16.mxu1 %v6426_v56 }
 0xa86   :  { %5021 = vmatpush1.bf16.msra.mxu0 %v6414_v51  ;;  %5053 = vmatpush1.bf16.msra.mxu1 %v6430_v57 }
 0xa87   :  { %5023 = vmatprep.subr.bf16.mxu0 %v6418_v52  ;;  %5055 = vmatprep.subr.bf16.mxu1 %v6455_v5 }
 0xa8a   :  { %5025 = vmatpush1.bf16.msra.mxu0 %v6451_v4  ;;  %5057 = vmatpush1.bf16.msra.mxu1 %v6459_v7 }
 0xa8b   :  { %5059 = vmatprep.subr.bf16.mxu0 %v6135_v17  ;;  %5091 = vmatprep.subr.bf16.mxu1 %v6172_v29 }
 0xb40   :  { %v2481_v23 = vpop.f32.mrb[20].mxu0  ;;  %v2552_v24 = vpop.f32.mrb[20].mxu1 }
 0xb41   :  { %v5590_v25 = vadd.f32 %v2481_v23, %v6593_v42  ;;  %v2483_v26 = vpop.f32.mrb[21].mxu0  ;;  %v2554_v27 = vpop.f32.mrb[21].mxu1  ;;  %v5630_v49 = vadd.f32 %v2552_v24, %v6602_v9 }
 0xb42   :  { %v5591_v30 = vadd.f32 %v2483_v26, %v6595_v43  ;;  %v5631_v37 = vadd.f32 %v2554_v27, %v6599_v63 }
 0xb43   :  { %v4252_v31 = vmul.f32 -1.442695, %v5590_v25 }
 0xb44   :  { %v4253_v34 = vmul.f32 -1.442695, %v5591_v30  ;;  %v4254_v48 = vmul.f32 -1.442695, %v5631_v37 }
 0xb45   :  { %5891 = vpow2.f32 %v4252_v31 }
 0xb46   :  { %5893 = vpow2.f32 %v4253_v34 }
 0xb47   :  { %5895 = vpow2.f32 %v4254_v48 }
 0xb48   :  { %5897 = vtanh.f32 %v5630_v49 }
 0xb4f   :  { %v5892_v53 = vpop.eup %5891 }
 0xb50   :  { %v5894_v55 = vpop.eup %5893  ;;  %v2564_v59 = vadd.f32 1.0, %v5892_v53 }
 0xb51   :  { %v2570_v61 = vadd.f32 1.0, %v5894_v55  ;;  %v5896_v62 = vpop.eup %5895 }
 0xb52   :  { %5899 = vrcp.f32 %v2564_v59  ;;  %v5898_v1 = vpop.eup %5897  ;;  %v2577_v13 = vadd.f32 1.0, %v5896_v62 }
 0xb53   :  { %5901 = vrcp.f32 %v2570_v61 }
 0xb54   :  { %5903 = vrcp.f32 %v2577_v13 }
 0xb5c   :  { %v5900_v8 = vpop.eup %5899 }
 0xb5d   :  { %v5902_v10 = vpop.eup %5901  ;;  %v2581_v12 = vmul.f32 %v5900_v8, %v5898_v1 }
 0xb5e   :  { %v2580_v15 = vmul.f32 %v5902_v10, %v7013_v20  ;;  %v5904_v38 = vpop.eup %5903 }
 0xb60   :  { %v7058_v16 = vadd.f32 %v2581_v12, %v2580_v15 }
 0xb62   :  { %5905 = vtanh.f32 %v7058_v16 }
 0xb6c   :  { %v5906_v45 = vpop.eup %5905 }
 0xb6d   :  { %v2584_v46 = vmul.f32 %v5906_v45, %v5904_v38 }
 0xb6f   :  { %2585 = vst [vmem:[%s7438_s6 + $0x50] sm:$0xff] %v2584_v46  ;;  %2655 = vmatmul.mubr.f32.vlgmr.msra.gmra.mrb[22].mxu0 %v2584_v46  ;;  %2726 = vmatmul.mubr.f32.vlgmr.msra.gmra.mrb[22].mxu1 %v2584_v46 }
 0xb70   :  { %5061 = vmatpush1.bf16.msra.mxu0 %v6140_v19  ;;  %5093 = vmatpush1.bf16.msra.mxu1 %v6184_v33 }
 0xb71   :  { %5063 = vmatprep.subr.bf16.mxu0 %v6149_v22  ;;  %5095 = vmatprep.subr.bf16.mxu1 %v6207_v40 }
 0xb72   :  { %2829 = vmatprep.mubr.f32.mxu0 %v6051_v3  ;;  %2900 = vmatprep.mubr.f32.mxu1 %v6051_v3 }
 0xb74   :  { %5065 = vmatpush1.bf16.msra.mxu0 %v6182_v32  ;;  %5097 = vmatpush1.bf16.msra.mxu1 %v6220_v44 }
 0xb75   :  { %5067 = vmatprep.subr.bf16.mxu0 %v6194_v36  ;;  %5099 = vmatprep.subr.bf16.mxu1 %v6253_v54 }
 0xb78   :  { %5069 = vmatpush1.bf16.msra.mxu0 %v6230_v47  ;;  %5101 = vmatpush1.bf16.msra.mxu1 %v6266_v58 }
 0xb79   :  { %5071 = vmatprep.subr.bf16.mxu0 %v6240_v50  ;;  %5103 = vmatprep.subr.bf16.mxu1 %v6291_v2 }
 0xb7c   :  { %5073 = vmatpush1.bf16.msra.mxu0 %v6273_v60  ;;  %5105 = vmatpush1.bf16.msra.mxu1 %v6301_v6 }
 0xb7d   :  { %5075 = vmatprep.subr.bf16.mxu0 %v6286_v0  ;;  %5107 = vmatprep.subr.bf16.mxu1 %v6337_v18 }
 0xb80   :  { %5077 = vmatpush1.bf16.msra.mxu0 %v6319_v11  ;;  %5109 = vmatpush1.bf16.msra.mxu1 %v6344_v21 }
 0xb81   :  { %5079 = vmatprep.subr.bf16.mxu0 %v6329_v14  ;;  %5111 = vmatprep.subr.bf16.mxu1 %v6386_v39 }
 0xb84   :  { %5081 = vmatpush1.bf16.msra.mxu0 %v6365_v28  ;;  %5113 = vmatpush1.bf16.msra.mxu1 %v6390_v41 }
 0xb85   :  { %5083 = vmatprep.subr.bf16.mxu0 %v6378_v35  ;;  %5115 = vmatprep.subr.bf16.mxu1 %v6426_v56 }
 0xb88   :  { %5085 = vmatpush1.bf16.msra.mxu0 %v6414_v51  ;;  %5117 = vmatpush1.bf16.msra.mxu1 %v6430_v57 }
 0xb89   :  { %5087 = vmatprep.subr.bf16.mxu0 %v6418_v52  ;;  %5119 = vmatprep.subr.bf16.mxu1 %v6455_v5 }
 0xb8c   :  { %5089 = vmatpush1.bf16.msra.mxu0 %v6451_v4  ;;  %5121 = vmatpush1.bf16.msra.mxu1 %v6459_v7 }
 0xb8d   :  { %5123 = vmatprep.subr.bf16.mxu0 %v6135_v17  ;;  %5155 = vmatprep.subr.bf16.mxu1 %v6172_v29 }
 0xc42   :  { %v2656_v20 = vpop.f32.mrb[22].mxu0  ;;  %v2727_v23 = vpop.f32.mrb[22].mxu1 }
 0xc43   :  { %v5592_v24 = vadd.f32 %v2656_v20, %v6593_v42  ;;  %v2658_v25 = vpop.f32.mrb[23].mxu0  ;;  %v2729_v26 = vpop.f32.mrb[23].mxu1  ;;  %v5632_v48 = vadd.f32 %v2727_v23, %v6602_v9 }
 0xc44   :  { %v5593_v27 = vadd.f32 %v2658_v25, %v6595_v43  ;;  %v5633_v34 = vadd.f32 %v2729_v26, %v6599_v63 }
 0xc45   :  { %v4255_v30 = vmul.f32 -1.442695, %v5592_v24 }
 0xc46   :  { %v4256_v31 = vmul.f32 -1.442695, %v5593_v27  ;;  %v4257_v37 = vmul.f32 -1.442695, %v5633_v34 }
 0xc47   :  { %5907 = vpow2.f32 %v4255_v30 }
 0xc48   :  { %5909 = vpow2.f32 %v4256_v31 }
 0xc49   :  { %5911 = vpow2.f32 %v4257_v37 }
 0xc4a   :  { %5913 = vtanh.f32 %v5632_v48 }
 0xc51   :  { %v5908_v49 = vpop.eup %5907 }
 0xc52   :  { %v5910_v53 = vpop.eup %5909  ;;  %v2739_v55 = vadd.f32 1.0, %v5908_v49 }
 0xc53   :  { %v2745_v59 = vadd.f32 1.0, %v5910_v53  ;;  %v5912_v61 = vpop.eup %5911 }
 0xc54   :  { %5915 = vrcp.f32 %v2739_v55  ;;  %v5914_v62 = vpop.eup %5913  ;;  %v2752_v12 = vadd.f32 1.0, %v5912_v61 }
 0xc55   :  { %5917 = vrcp.f32 %v2745_v59 }
 0xc56   :  { %5919 = vrcp.f32 %v2752_v12 }
 0xc5e   :  { %v5916_v1 = vpop.eup %5915 }
 0xc5f   :  { %v5918_v8 = vpop.eup %5917  ;;  %v2756_v10 = vmul.f32 %v5916_v1, %v5914_v62 }
 0xc60   :  { %v2755_v13 = vmul.f32 %v5918_v8, %v7058_v16  ;;  %v5920_v38 = vpop.eup %5919 }
 0xc62   :  { %v7103_v15 = vadd.f32 %v2756_v10, %v2755_v13 }
 0xc64   :  { %5921 = vtanh.f32 %v7103_v15 }
 0xc6e   :  { %v5922_v45 = vpop.eup %5921 }
 0xc6f   :  { %v2759_v46 = vmul.f32 %v5922_v45, %v5920_v38 }
 0xc71   :  { %2760 = vst [vmem:[%s7438_s6 + $0x58] sm:$0xff] %v2759_v46  ;;  %2830 = vmatmul.mubr.f32.vlgmr.msra.gmra.mrb[24].mxu0 %v2759_v46  ;;  %2901 = vmatmul.mubr.f32.vlgmr.msra.gmra.mrb[24].mxu1 %v2759_v46 }
 0xc72   :  { %5125 = vmatpush1.bf16.msra.mxu0 %v6140_v19  ;;  %5157 = vmatpush1.bf16.msra.mxu1 %v6184_v33 }
 0xc73   :  { %5127 = vmatprep.subr.bf16.mxu0 %v6149_v22  ;;  %5159 = vmatprep.subr.bf16.mxu1 %v6207_v40 }
 0xc74   :  { %3004 = vmatprep.mubr.f32.mxu0 %v6051_v3  ;;  %3075 = vmatprep.mubr.f32.mxu1 %v6051_v3 }
 0xc76   :  { %5129 = vmatpush1.bf16.msra.mxu0 %v6182_v32  ;;  %5161 = vmatpush1.bf16.msra.mxu1 %v6220_v44 }
 0xc77   :  { %5131 = vmatprep.subr.bf16.mxu0 %v6194_v36  ;;  %5163 = vmatprep.subr.bf16.mxu1 %v6253_v54 }
 0xc7a   :  { %5133 = vmatpush1.bf16.msra.mxu0 %v6230_v47  ;;  %5165 = vmatpush1.bf16.msra.mxu1 %v6266_v58 }
 0xc7b   :  { %5135 = vmatprep.subr.bf16.mxu0 %v6240_v50  ;;  %5167 = vmatprep.subr.bf16.mxu1 %v6291_v2 }
 0xc7e   :  { %5137 = vmatpush1.bf16.msra.mxu0 %v6273_v60  ;;  %5169 = vmatpush1.bf16.msra.mxu1 %v6301_v6 }
 0xc7f   :  { %5139 = vmatprep.subr.bf16.mxu0 %v6286_v0  ;;  %5171 = vmatprep.subr.bf16.mxu1 %v6337_v18 }
 0xc82   :  { %5141 = vmatpush1.bf16.msra.mxu0 %v6319_v11  ;;  %5173 = vmatpush1.bf16.msra.mxu1 %v6344_v21 }
 0xc83   :  { %5143 = vmatprep.subr.bf16.mxu0 %v6329_v14  ;;  %5175 = vmatprep.subr.bf16.mxu1 %v6386_v39 }
 0xc86   :  { %5145 = vmatpush1.bf16.msra.mxu0 %v6365_v28  ;;  %5177 = vmatpush1.bf16.msra.mxu1 %v6390_v41 }
 0xc87   :  { %5147 = vmatprep.subr.bf16.mxu0 %v6378_v35  ;;  %5179 = vmatprep.subr.bf16.mxu1 %v6426_v56 }
 0xc8a   :  { %5149 = vmatpush1.bf16.msra.mxu0 %v6414_v51  ;;  %5181 = vmatpush1.bf16.msra.mxu1 %v6430_v57 }
 0xc8b   :  { %5151 = vmatprep.subr.bf16.mxu0 %v6418_v52  ;;  %5183 = vmatprep.subr.bf16.mxu1 %v6455_v5 }
 0xc8e   :  { %5153 = vmatpush1.bf16.msra.mxu0 %v6451_v4  ;;  %5185 = vmatpush1.bf16.msra.mxu1 %v6459_v7 }
 0xc8f   :  { %5187 = vmatprep.subr.bf16.mxu0 %v6135_v17  ;;  %5219 = vmatprep.subr.bf16.mxu1 %v6172_v29 }
 0xd44   :  { %v2831_v16 = vpop.f32.mrb[24].mxu0  ;;  %v2902_v20 = vpop.f32.mrb[24].mxu1 }
 0xd45   :  { %v5594_v23 = vadd.f32 %v2831_v16, %v6593_v42  ;;  %v2833_v24 = vpop.f32.mrb[25].mxu0  ;;  %v2904_v25 = vpop.f32.mrb[25].mxu1  ;;  %v5634_v37 = vadd.f32 %v2902_v20, %v6602_v9 }
 0xd46   :  { %v5595_v26 = vadd.f32 %v2833_v24, %v6595_v43  ;;  %v5635_v31 = vadd.f32 %v2904_v25, %v6599_v63 }
 0xd47   :  { %v4258_v27 = vmul.f32 -1.442695, %v5594_v23 }
 0xd48   :  { %v4259_v30 = vmul.f32 -1.442695, %v5595_v26  ;;  %v4260_v34 = vmul.f32 -1.442695, %v5635_v31 }
 0xd49   :  { %5923 = vpow2.f32 %v4258_v27 }
 0xd4a   :  { %5925 = vpow2.f32 %v4259_v30 }
 0xd4b   :  { %5927 = vpow2.f32 %v4260_v34 }
 0xd4c   :  { %5929 = vtanh.f32 %v5634_v37 }
 0xd53   :  { %v5924_v48 = vpop.eup %5923 }
 0xd54   :  { %v5926_v49 = vpop.eup %5925  ;;  %v2914_v53 = vadd.f32 1.0, %v5924_v48 }
 0xd55   :  { %v2920_v55 = vadd.f32 1.0, %v5926_v49  ;;  %v5928_v59 = vpop.eup %5927 }
 0xd56   :  { %5931 = vrcp.f32 %v2914_v53  ;;  %v5930_v61 = vpop.eup %5929  ;;  %v2927_v10 = vadd.f32 1.0, %v5928_v59 }
 0xd57   :  { %5933 = vrcp.f32 %v2920_v55 }
 0xd58   :  { %5935 = vrcp.f32 %v2927_v10 }
 0xd60   :  { %v5932_v62 = vpop.eup %5931 }
 0xd61   :  { %v5934_v1 = vpop.eup %5933  ;;  %v2931_v8 = vmul.f32 %v5932_v62, %v5930_v61 }
 0xd62   :  { %v2930_v12 = vmul.f32 %v5934_v1, %v7103_v15  ;;  %v5936_v38 = vpop.eup %5935 }
 0xd64   :  { %v7148_v13 = vadd.f32 %v2931_v8, %v2930_v12 }
 0xd66   :  { %5937 = vtanh.f32 %v7148_v13 }
 0xd70   :  { %v5938_v45 = vpop.eup %5937 }
 0xd71   :  { %v2934_v46 = vmul.f32 %v5938_v45, %v5936_v38 }
 0xd73   :  { %2935 = vst [vmem:[%s7438_s6 + $0x60] sm:$0xff] %v2934_v46  ;;  %3005 = vmatmul.mubr.f32.vlgmr.msra.gmra.mrb[26].mxu0 %v2934_v46  ;;  %3076 = vmatmul.mubr.f32.vlgmr.msra.gmra.mrb[26].mxu1 %v2934_v46 }
 0xd74   :  { %5189 = vmatpush1.bf16.msra.mxu0 %v6140_v19  ;;  %5221 = vmatpush1.bf16.msra.mxu1 %v6184_v33 }
 0xd75   :  { %5191 = vmatprep.subr.bf16.mxu0 %v6149_v22  ;;  %5223 = vmatprep.subr.bf16.mxu1 %v6207_v40 }
 0xd76   :  { %3179 = vmatprep.mubr.f32.mxu0 %v6051_v3  ;;  %3250 = vmatprep.mubr.f32.mxu1 %v6051_v3 }
 0xd78   :  { %5193 = vmatpush1.bf16.msra.mxu0 %v6182_v32  ;;  %5225 = vmatpush1.bf16.msra.mxu1 %v6220_v44 }
 0xd79   :  { %5195 = vmatprep.subr.bf16.mxu0 %v6194_v36  ;;  %5227 = vmatprep.subr.bf16.mxu1 %v6253_v54 }
 0xd7c   :  { %5197 = vmatpush1.bf16.msra.mxu0 %v6230_v47  ;;  %5229 = vmatpush1.bf16.msra.mxu1 %v6266_v58 }
 0xd7d   :  { %5199 = vmatprep.subr.bf16.mxu0 %v6240_v50  ;;  %5231 = vmatprep.subr.bf16.mxu1 %v6291_v2 }
 0xd80   :  { %5201 = vmatpush1.bf16.msra.mxu0 %v6273_v60  ;;  %5233 = vmatpush1.bf16.msra.mxu1 %v6301_v6 }
 0xd81   :  { %5203 = vmatprep.subr.bf16.mxu0 %v6286_v0  ;;  %5235 = vmatprep.subr.bf16.mxu1 %v6337_v18 }
 0xd84   :  { %5205 = vmatpush1.bf16.msra.mxu0 %v6319_v11  ;;  %5237 = vmatpush1.bf16.msra.mxu1 %v6344_v21 }
 0xd85   :  { %5207 = vmatprep.subr.bf16.mxu0 %v6329_v14  ;;  %5239 = vmatprep.subr.bf16.mxu1 %v6386_v39 }
 0xd88   :  { %5209 = vmatpush1.bf16.msra.mxu0 %v6365_v28  ;;  %5241 = vmatpush1.bf16.msra.mxu1 %v6390_v41 }
 0xd89   :  { %5211 = vmatprep.subr.bf16.mxu0 %v6378_v35  ;;  %5243 = vmatprep.subr.bf16.mxu1 %v6426_v56 }
 0xd8c   :  { %5213 = vmatpush1.bf16.msra.mxu0 %v6414_v51  ;;  %5245 = vmatpush1.bf16.msra.mxu1 %v6430_v57 }
 0xd8d   :  { %5215 = vmatprep.subr.bf16.mxu0 %v6418_v52  ;;  %5247 = vmatprep.subr.bf16.mxu1 %v6455_v5 }
 0xd90   :  { %5217 = vmatpush1.bf16.msra.mxu0 %v6451_v4  ;;  %5249 = vmatpush1.bf16.msra.mxu1 %v6459_v7 }
 0xd91   :  { %5251 = vmatprep.subr.bf16.mxu0 %v6135_v17  ;;  %5283 = vmatprep.subr.bf16.mxu1 %v6172_v29 }
 0xe46   :  { %v3006_v15 = vpop.f32.mrb[26].mxu0  ;;  %v3077_v16 = vpop.f32.mrb[26].mxu1 }
 0xe47   :  { %v5596_v20 = vadd.f32 %v3006_v15, %v6593_v42  ;;  %v3008_v23 = vpop.f32.mrb[27].mxu0  ;;  %v3079_v24 = vpop.f32.mrb[27].mxu1  ;;  %v5636_v34 = vadd.f32 %v3077_v16, %v6602_v9 }
 0xe48   :  { %v5597_v25 = vadd.f32 %v3008_v23, %v6595_v43  ;;  %v5637_v30 = vadd.f32 %v3079_v24, %v6599_v63 }
 0xe49   :  { %v4261_v26 = vmul.f32 -1.442695, %v5596_v20 }
 0xe4a   :  { %v4262_v27 = vmul.f32 -1.442695, %v5597_v25  ;;  %v4263_v31 = vmul.f32 -1.442695, %v5637_v30 }
 0xe4b   :  { %5939 = vpow2.f32 %v4261_v26 }
 0xe4c   :  { %5941 = vpow2.f32 %v4262_v27 }
 0xe4d   :  { %5943 = vpow2.f32 %v4263_v31 }
 0xe4e   :  { %5945 = vtanh.f32 %v5636_v34 }
 0xe55   :  { %v5940_v37 = vpop.eup %5939 }
 0xe56   :  { %v5942_v48 = vpop.eup %5941  ;;  %v3089_v49 = vadd.f32 1.0, %v5940_v37 }
 0xe57   :  { %v3095_v53 = vadd.f32 1.0, %v5942_v48  ;;  %v5944_v55 = vpop.eup %5943 }
 0xe58   :  { %5947 = vrcp.f32 %v3089_v49  ;;  %v5946_v59 = vpop.eup %5945  ;;  %v3102_v8 = vadd.f32 1.0, %v5944_v55 }
 0xe59   :  { %5949 = vrcp.f32 %v3095_v53 }
 0xe5a   :  { %5951 = vrcp.f32 %v3102_v8 }
 0xe62   :  { %v5948_v61 = vpop.eup %5947 }
 0xe63   :  { %v5950_v62 = vpop.eup %5949  ;;  %v3106_v1 = vmul.f32 %v5948_v61, %v5946_v59 }
 0xe64   :  { %v3105_v10 = vmul.f32 %v5950_v62, %v7148_v13  ;;  %v5952_v38 = vpop.eup %5951 }
 0xe66   :  { %v7193_v12 = vadd.f32 %v3106_v1, %v3105_v10 }
 0xe68   :  { %5953 = vtanh.f32 %v7193_v12 }
 0xe72   :  { %v5954_v45 = vpop.eup %5953 }
 0xe73   :  { %v3109_v46 = vmul.f32 %v5954_v45, %v5952_v38 }
 0xe75   :  { %3110 = vst [vmem:[%s7438_s6 + $0x68] sm:$0xff] %v3109_v46  ;;  %3180 = vmatmul.mubr.f32.vlgmr.msra.gmra.mrb[28].mxu0 %v3109_v46  ;;  %3251 = vmatmul.mubr.f32.vlgmr.msra.gmra.mrb[28].mxu1 %v3109_v46 }
 0xe76   :  { %5253 = vmatpush1.bf16.msra.mxu0 %v6140_v19  ;;  %5285 = vmatpush1.bf16.msra.mxu1 %v6184_v33 }
 0xe77   :  { %5255 = vmatprep.subr.bf16.mxu0 %v6149_v22  ;;  %5287 = vmatprep.subr.bf16.mxu1 %v6207_v40 }
 0xe78   :  { %3354 = vmatprep.mubr.f32.mxu0 %v6051_v3  ;;  %3425 = vmatprep.mubr.f32.mxu1 %v6051_v3 }
 0xe7a   :  { %5257 = vmatpush1.bf16.msra.mxu0 %v6182_v32  ;;  %5289 = vmatpush1.bf16.msra.mxu1 %v6220_v44 }
 0xe7b   :  { %5259 = vmatprep.subr.bf16.mxu0 %v6194_v36  ;;  %5291 = vmatprep.subr.bf16.mxu1 %v6253_v54 }
 0xe7e   :  { %5261 = vmatpush1.bf16.msra.mxu0 %v6230_v47  ;;  %5293 = vmatpush1.bf16.msra.mxu1 %v6266_v58 }
 0xe7f   :  { %5263 = vmatprep.subr.bf16.mxu0 %v6240_v50  ;;  %5295 = vmatprep.subr.bf16.mxu1 %v6291_v2 }
 0xe82   :  { %5265 = vmatpush1.bf16.msra.mxu0 %v6273_v60  ;;  %5297 = vmatpush1.bf16.msra.mxu1 %v6301_v6 }
 0xe83   :  { %5267 = vmatprep.subr.bf16.mxu0 %v6286_v0  ;;  %5299 = vmatprep.subr.bf16.mxu1 %v6337_v18 }
 0xe86   :  { %5269 = vmatpush1.bf16.msra.mxu0 %v6319_v11  ;;  %5301 = vmatpush1.bf16.msra.mxu1 %v6344_v21 }
 0xe87   :  { %5271 = vmatprep.subr.bf16.mxu0 %v6329_v14  ;;  %5303 = vmatprep.subr.bf16.mxu1 %v6386_v39 }
 0xe8a   :  { %5273 = vmatpush1.bf16.msra.mxu0 %v6365_v28  ;;  %5305 = vmatpush1.bf16.msra.mxu1 %v6390_v41 }
 0xe8b   :  { %5275 = vmatprep.subr.bf16.mxu0 %v6378_v35  ;;  %5307 = vmatprep.subr.bf16.mxu1 %v6426_v56 }
 0xe8e   :  { %5277 = vmatpush1.bf16.msra.mxu0 %v6414_v51  ;;  %5309 = vmatpush1.bf16.msra.mxu1 %v6430_v57 }
 0xe8f   :  { %5279 = vmatprep.subr.bf16.mxu0 %v6418_v52  ;;  %5311 = vmatprep.subr.bf16.mxu1 %v6455_v5 }
 0xe92   :  { %5281 = vmatpush1.bf16.msra.mxu0 %v6451_v4  ;;  %5313 = vmatpush1.bf16.msra.mxu1 %v6459_v7 }
 0xe93   :  { %5315 = vmatprep.subr.bf16.mxu0 %v6135_v17  ;;  %5347 = vmatprep.subr.bf16.mxu1 %v6172_v29 }
 0xf48   :  { %v3181_v13 = vpop.f32.mrb[28].mxu0  ;;  %v3252_v15 = vpop.f32.mrb[28].mxu1 }
 0xf49   :  { %v5598_v16 = vadd.f32 %v3181_v13, %v6593_v42  ;;  %v3183_v20 = vpop.f32.mrb[29].mxu0  ;;  %v3254_v23 = vpop.f32.mrb[29].mxu1  ;;  %v5638_v31 = vadd.f32 %v3252_v15, %v6602_v9 }
 0xf4a   :  { %v5599_v24 = vadd.f32 %v3183_v20, %v6595_v43  ;;  %v5639_v27 = vadd.f32 %v3254_v23, %v6599_v63 }
 0xf4b   :  { %v4264_v25 = vmul.f32 -1.442695, %v5598_v16 }
 0xf4c   :  { %v4265_v26 = vmul.f32 -1.442695, %v5599_v24  ;;  %v4266_v30 = vmul.f32 -1.442695, %v5639_v27 }
 0xf4d   :  { %5955 = vpow2.f32 %v4264_v25 }
 0xf4e   :  { %5957 = vpow2.f32 %v4265_v26 }
 0xf4f   :  { %5959 = vpow2.f32 %v4266_v30 }
 0xf50   :  { %5961 = vtanh.f32 %v5638_v31 }
 0xf57   :  { %v5956_v34 = vpop.eup %5955 }
 0xf58   :  { %v5958_v37 = vpop.eup %5957  ;;  %v3264_v48 = vadd.f32 1.0, %v5956_v34 }
 0xf59   :  { %v3270_v49 = vadd.f32 1.0, %v5958_v37  ;;  %v5960_v53 = vpop.eup %5959 }
 0xf5a   :  { %5963 = vrcp.f32 %v3264_v48  ;;  %v5962_v55 = vpop.eup %5961  ;;  %v3277_v1 = vadd.f32 1.0, %v5960_v53 }
 0xf5b   :  { %5965 = vrcp.f32 %v3270_v49 }
 0xf5c   :  { %5967 = vrcp.f32 %v3277_v1 }
 0xf64   :  { %v5964_v59 = vpop.eup %5963 }
 0xf65   :  { %v5966_v61 = vpop.eup %5965  ;;  %v3281_v62 = vmul.f32 %v5964_v59, %v5962_v55 }
 0xf66   :  { %v3280_v8 = vmul.f32 %v5966_v61, %v7193_v12  ;;  %v5968_v38 = vpop.eup %5967 }
 0xf68   :  { %v7238_v10 = vadd.f32 %v3281_v62, %v3280_v8 }
 0xf6a   :  { %5969 = vtanh.f32 %v7238_v10 }
 0xf74   :  { %v5970_v45 = vpop.eup %5969 }
 0xf75   :  { %v3284_v46 = vmul.f32 %v5970_v45, %v5968_v38 }
 0xf77   :  { %3285 = vst [vmem:[%s7438_s6 + $0x70] sm:$0xff] %v3284_v46  ;;  %3355 = vmatmul.mubr.f32.vlgmr.msra.gmra.mrb[30].mxu0 %v3284_v46  ;;  %3426 = vmatmul.mubr.f32.vlgmr.msra.gmra.mrb[30].mxu1 %v3284_v46 }
 0xf78   :  { %5317 = vmatpush1.bf16.msra.mxu0 %v6140_v19  ;;  %5349 = vmatpush1.bf16.msra.mxu1 %v6184_v33 }
 0xf79   :  { %5319 = vmatprep.subr.bf16.mxu0 %v6149_v22  ;;  %5351 = vmatprep.subr.bf16.mxu1 %v6207_v40 }
 0xf7a   :  { %3529 = vmatprep.mubr.f32.mxu0 %v6051_v3  ;;  %3600 = vmatprep.mubr.f32.mxu1 %v6051_v3 }
 0xf7c   :  { %5321 = vmatpush1.bf16.msra.mxu0 %v6182_v32  ;;  %5353 = vmatpush1.bf16.msra.mxu1 %v6220_v44 }
 0xf7d   :  { %5323 = vmatprep.subr.bf16.mxu0 %v6194_v36  ;;  %5355 = vmatprep.subr.bf16.mxu1 %v6253_v54 }
 0xf80   :  { %5325 = vmatpush1.bf16.msra.mxu0 %v6230_v47  ;;  %5357 = vmatpush1.bf16.msra.mxu1 %v6266_v58 }
 0xf81   :  { %5327 = vmatprep.subr.bf16.mxu0 %v6240_v50  ;;  %5359 = vmatprep.subr.bf16.mxu1 %v6291_v2 }
 0xf84   :  { %5329 = vmatpush1.bf16.msra.mxu0 %v6273_v60  ;;  %5361 = vmatpush1.bf16.msra.mxu1 %v6301_v6 }
 0xf85   :  { %5331 = vmatprep.subr.bf16.mxu0 %v6286_v0  ;;  %5363 = vmatprep.subr.bf16.mxu1 %v6337_v18 }
 0xf88   :  { %5333 = vmatpush1.bf16.msra.mxu0 %v6319_v11  ;;  %5365 = vmatpush1.bf16.msra.mxu1 %v6344_v21 }
 0xf89   :  { %5335 = vmatprep.subr.bf16.mxu0 %v6329_v14  ;;  %5367 = vmatprep.subr.bf16.mxu1 %v6386_v39 }
 0xf8c   :  { %5337 = vmatpush1.bf16.msra.mxu0 %v6365_v28  ;;  %5369 = vmatpush1.bf16.msra.mxu1 %v6390_v41 }
 0xf8d   :  { %5339 = vmatprep.subr.bf16.mxu0 %v6378_v35  ;;  %5371 = vmatprep.subr.bf16.mxu1 %v6426_v56 }
 0xf90   :  { %5341 = vmatpush1.bf16.msra.mxu0 %v6414_v51  ;;  %5373 = vmatpush1.bf16.msra.mxu1 %v6430_v57 }
 0xf91   :  { %5343 = vmatprep.subr.bf16.mxu0 %v6418_v52  ;;  %5375 = vmatprep.subr.bf16.mxu1 %v6455_v5 }
 0xf94   :  { %5345 = vmatpush1.bf16.msra.mxu0 %v6451_v4  ;;  %5377 = vmatpush1.bf16.msra.mxu1 %v6459_v7 }
 0xf95   :  { %5379 = vmatprep.subr.bf16.mxu0 %v6135_v17  ;;  %5411 = vmatprep.subr.bf16.mxu1 %v6172_v29 }
0x104a   :  { %v3356_v12 = vpop.f32.mrb[30].mxu0  ;;  %v3427_v13 = vpop.f32.mrb[30].mxu1 }
0x104b   :  { %v5600_v15 = vadd.f32 %v3356_v12, %v6593_v42  ;;  %v3358_v16 = vpop.f32.mrb[31].mxu0  ;;  %v3429_v20 = vpop.f32.mrb[31].mxu1  ;;  %v5640_v30 = vadd.f32 %v3427_v13, %v6602_v9 }
0x104c   :  { %v5601_v23 = vadd.f32 %v3358_v16, %v6595_v43  ;;  %v5641_v26 = vadd.f32 %v3429_v20, %v6599_v63 }
0x104d   :  { %v4267_v24 = vmul.f32 -1.442695, %v5600_v15 }
0x104e   :  { %v4268_v25 = vmul.f32 -1.442695, %v5601_v23  ;;  %v4269_v27 = vmul.f32 -1.442695, %v5641_v26 }
0x104f   :  { %5971 = vpow2.f32 %v4267_v24 }
0x1050   :  { %5973 = vpow2.f32 %v4268_v25 }
0x1051   :  { %5975 = vpow2.f32 %v4269_v27 }
0x1052   :  { %5977 = vtanh.f32 %v5640_v30 }
0x1059   :  { %v5972_v31 = vpop.eup %5971 }
0x105a   :  { %v5974_v34 = vpop.eup %5973  ;;  %v3439_v37 = vadd.f32 1.0, %v5972_v31 }
0x105b   :  { %v3445_v48 = vadd.f32 1.0, %v5974_v34  ;;  %v5976_v49 = vpop.eup %5975 }
0x105c   :  { %5979 = vrcp.f32 %v3439_v37  ;;  %v5978_v53 = vpop.eup %5977  ;;  %v3452_v62 = vadd.f32 1.0, %v5976_v49 }
0x105d   :  { %5981 = vrcp.f32 %v3445_v48 }
0x105e   :  { %5983 = vrcp.f32 %v3452_v62 }
0x1066   :  { %v5980_v55 = vpop.eup %5979 }
0x1067   :  { %v5982_v59 = vpop.eup %5981  ;;  %v3456_v61 = vmul.f32 %v5980_v55, %v5978_v53 }
0x1068   :  { %v3455_v1 = vmul.f32 %v5982_v59, %v7238_v10  ;;  %v5984_v38 = vpop.eup %5983 }
0x106a   :  { %v7283_v8 = vadd.f32 %v3456_v61, %v3455_v1 }
0x106c   :  { %5985 = vtanh.f32 %v7283_v8 }
0x1076   :  { %v5986_v45 = vpop.eup %5985 }
0x1077   :  { %v3459_v46 = vmul.f32 %v5986_v45, %v5984_v38 }
0x1079   :  { %3460 = vst [vmem:[%s7438_s6 + $0x78] sm:$0xff] %v3459_v46  ;;  %3530 = vmatmul.mubr.f32.vlgmr.msra.gmra.mrb[32].mxu0 %v3459_v46  ;;  %3601 = vmatmul.mubr.f32.vlgmr.msra.gmra.mrb[32].mxu1 %v3459_v46 }
0x107a   :  { %5381 = vmatpush1.bf16.msra.mxu0 %v6140_v19  ;;  %5413 = vmatpush1.bf16.msra.mxu1 %v6184_v33 }
0x107b   :  { %5383 = vmatprep.subr.bf16.mxu0 %v6149_v22  ;;  %5415 = vmatprep.subr.bf16.mxu1 %v6207_v40 }
0x107c   :  { %3704 = vmatprep.mubr.f32.mxu0 %v6051_v3  ;;  %3775 = vmatprep.mubr.f32.mxu1 %v6051_v3 }
0x107e   :  { %5385 = vmatpush1.bf16.msra.mxu0 %v6182_v32  ;;  %5417 = vmatpush1.bf16.msra.mxu1 %v6220_v44 }
0x107f   :  { %5387 = vmatprep.subr.bf16.mxu0 %v6194_v36  ;;  %5419 = vmatprep.subr.bf16.mxu1 %v6253_v54 }
0x1082   :  { %5389 = vmatpush1.bf16.msra.mxu0 %v6230_v47  ;;  %5421 = vmatpush1.bf16.msra.mxu1 %v6266_v58 }
0x1083   :  { %5391 = vmatprep.subr.bf16.mxu0 %v6240_v50  ;;  %5423 = vmatprep.subr.bf16.mxu1 %v6291_v2 }
0x1086   :  { %5393 = vmatpush1.bf16.msra.mxu0 %v6273_v60  ;;  %5425 = vmatpush1.bf16.msra.mxu1 %v6301_v6 }
0x1087   :  { %5395 = vmatprep.subr.bf16.mxu0 %v6286_v0  ;;  %5427 = vmatprep.subr.bf16.mxu1 %v6337_v18 }
0x108a   :  { %5397 = vmatpush1.bf16.msra.mxu0 %v6319_v11  ;;  %5429 = vmatpush1.bf16.msra.mxu1 %v6344_v21 }
0x108b   :  { %5399 = vmatprep.subr.bf16.mxu0 %v6329_v14  ;;  %5431 = vmatprep.subr.bf16.mxu1 %v6386_v39 }
0x108e   :  { %5401 = vmatpush1.bf16.msra.mxu0 %v6365_v28  ;;  %5433 = vmatpush1.bf16.msra.mxu1 %v6390_v41 }
0x108f   :  { %5403 = vmatprep.subr.bf16.mxu0 %v6378_v35  ;;  %5435 = vmatprep.subr.bf16.mxu1 %v6426_v56 }
0x1092   :  { %5405 = vmatpush1.bf16.msra.mxu0 %v6414_v51  ;;  %5437 = vmatpush1.bf16.msra.mxu1 %v6430_v57 }
0x1093   :  { %5407 = vmatprep.subr.bf16.mxu0 %v6418_v52  ;;  %5439 = vmatprep.subr.bf16.mxu1 %v6455_v5 }
0x1096   :  { %5409 = vmatpush1.bf16.msra.mxu0 %v6451_v4  ;;  %5441 = vmatpush1.bf16.msra.mxu1 %v6459_v7 }
0x1097   :  { %5443 = vmatprep.subr.bf16.mxu0 %v6135_v17  ;;  %5475 = vmatprep.subr.bf16.mxu1 %v6172_v29 }
0x114c   :  { %v3531_v10 = vpop.f32.mrb[32].mxu0  ;;  %v3602_v12 = vpop.f32.mrb[32].mxu1 }
0x114d   :  { %v5602_v13 = vadd.f32 %v3531_v10, %v6593_v42  ;;  %v3533_v15 = vpop.f32.mrb[33].mxu0  ;;  %v3604_v16 = vpop.f32.mrb[33].mxu1  ;;  %v5642_v27 = vadd.f32 %v3602_v12, %v6602_v9 }
0x114e   :  { %v5603_v20 = vadd.f32 %v3533_v15, %v6595_v43  ;;  %v5643_v25 = vadd.f32 %v3604_v16, %v6599_v63 }
0x114f   :  { %v4270_v23 = vmul.f32 -1.442695, %v5602_v13 }
0x1150   :  { %v4271_v24 = vmul.f32 -1.442695, %v5603_v20  ;;  %v4272_v26 = vmul.f32 -1.442695, %v5643_v25 }
0x1151   :  { %5987 = vpow2.f32 %v4270_v23 }
0x1152   :  { %5989 = vpow2.f32 %v4271_v24 }
0x1153   :  { %5991 = vpow2.f32 %v4272_v26 }
0x1154   :  { %5993 = vtanh.f32 %v5642_v27 }
0x115b   :  { %v5988_v30 = vpop.eup %5987 }
0x115c   :  { %v5990_v31 = vpop.eup %5989  ;;  %v3614_v34 = vadd.f32 1.0, %v5988_v30 }
0x115d   :  { %v3620_v37 = vadd.f32 1.0, %v5990_v31  ;;  %v5992_v48 = vpop.eup %5991 }
0x115e   :  { %5995 = vrcp.f32 %v3614_v34  ;;  %v5994_v49 = vpop.eup %5993  ;;  %v3627_v61 = vadd.f32 1.0, %v5992_v48 }
0x115f   :  { %5997 = vrcp.f32 %v3620_v37 }
0x1160   :  { %5999 = vrcp.f32 %v3627_v61 }
0x1168   :  { %v5996_v53 = vpop.eup %5995 }
0x1169   :  { %v5998_v55 = vpop.eup %5997  ;;  %v3631_v59 = vmul.f32 %v5996_v53, %v5994_v49 }
0x116a   :  { %v3630_v62 = vmul.f32 %v5998_v55, %v7283_v8  ;;  %v6000_v38 = vpop.eup %5999 }
0x116c   :  { %v7328_v1 = vadd.f32 %v3631_v59, %v3630_v62 }
0x116e   :  { %6001 = vtanh.f32 %v7328_v1 }
0x1178   :  { %v6002_v45 = vpop.eup %6001 }
0x1179   :  { %v3634_v46 = vmul.f32 %v6002_v45, %v6000_v38 }
0x117b   :  { %3635 = vst [vmem:[%s7438_s6 + $0x80] sm:$0xff] %v3634_v46  ;;  %3705 = vmatmul.mubr.f32.vlgmr.msra.gmra.mrb[34].mxu0 %v3634_v46  ;;  %3776 = vmatmul.mubr.f32.vlgmr.msra.gmra.mrb[34].mxu1 %v3634_v46 }
0x117c   :  { %5445 = vmatpush1.bf16.msra.mxu0 %v6140_v19  ;;  %5477 = vmatpush1.bf16.msra.mxu1 %v6184_v33 }
0x117d   :  { %5447 = vmatprep.subr.bf16.mxu0 %v6149_v22  ;;  %5479 = vmatprep.subr.bf16.mxu1 %v6207_v40 }
0x117e   :  { %3879 = vmatprep.mubr.f32.mxu0 %v6051_v3  ;;  %3950 = vmatprep.mubr.f32.mxu1 %v6051_v3 }
0x1180   :  { %5449 = vmatpush1.bf16.msra.mxu0 %v6182_v32  ;;  %5481 = vmatpush1.bf16.msra.mxu1 %v6220_v44 }
0x1181   :  { %5451 = vmatprep.subr.bf16.mxu0 %v6194_v36  ;;  %5483 = vmatprep.subr.bf16.mxu1 %v6253_v54 }
0x1184   :  { %5453 = vmatpush1.bf16.msra.mxu0 %v6230_v47  ;;  %5485 = vmatpush1.bf16.msra.mxu1 %v6266_v58 }
0x1185   :  { %5455 = vmatprep.subr.bf16.mxu0 %v6240_v50  ;;  %5487 = vmatprep.subr.bf16.mxu1 %v6291_v2 }
0x1188   :  { %5457 = vmatpush1.bf16.msra.mxu0 %v6273_v60  ;;  %5489 = vmatpush1.bf16.msra.mxu1 %v6301_v6 }
0x1189   :  { %5459 = vmatprep.subr.bf16.mxu0 %v6286_v0  ;;  %5491 = vmatprep.subr.bf16.mxu1 %v6337_v18 }
0x118c   :  { %5461 = vmatpush1.bf16.msra.mxu0 %v6319_v11  ;;  %5493 = vmatpush1.bf16.msra.mxu1 %v6344_v21 }
0x118d   :  { %5463 = vmatprep.subr.bf16.mxu0 %v6329_v14  ;;  %5495 = vmatprep.subr.bf16.mxu1 %v6386_v39 }
0x1190   :  { %5465 = vmatpush1.bf16.msra.mxu0 %v6365_v28  ;;  %5497 = vmatpush1.bf16.msra.mxu1 %v6390_v41 }
0x1191   :  { %5467 = vmatprep.subr.bf16.mxu0 %v6378_v35  ;;  %5499 = vmatprep.subr.bf16.mxu1 %v6426_v56 }
0x1194   :  { %5469 = vmatpush1.bf16.msra.mxu0 %v6414_v51  ;;  %5501 = vmatpush1.bf16.msra.mxu1 %v6430_v57 }
0x1195   :  { %5471 = vmatprep.subr.bf16.mxu0 %v6418_v52  ;;  %5503 = vmatprep.subr.bf16.mxu1 %v6455_v5 }
0x1198   :  { %5473 = vmatpush1.bf16.msra.mxu0 %v6451_v4  ;;  %5505 = vmatpush1.bf16.msra.mxu1 %v6459_v7 }
0x1199   :  { %5507 = vmatprep.subr.bf16.mxu0 %v6135_v17  ;;  %5539 = vmatprep.subr.bf16.mxu1 %v6172_v29 }
0x124e   :  { %v3706_v8 = vpop.f32.mrb[34].mxu0  ;;  %v3777_v10 = vpop.f32.mrb[34].mxu1 }
0x124f   :  { %v5604_v12 = vadd.f32 %v3706_v8, %v6593_v42  ;;  %v3708_v13 = vpop.f32.mrb[35].mxu0  ;;  %v3779_v15 = vpop.f32.mrb[35].mxu1  ;;  %v5644_v26 = vadd.f32 %v3777_v10, %v6602_v9 }
0x1250   :  { %v5605_v16 = vadd.f32 %v3708_v13, %v6595_v43  ;;  %v5645_v24 = vadd.f32 %v3779_v15, %v6599_v63 }
0x1251   :  { %v4273_v20 = vmul.f32 -1.442695, %v5604_v12 }
0x1252   :  { %v4274_v23 = vmul.f32 -1.442695, %v5605_v16  ;;  %v4275_v25 = vmul.f32 -1.442695, %v5645_v24 }
0x1253   :  { %6003 = vpow2.f32 %v4273_v20 }
0x1254   :  { %6005 = vpow2.f32 %v4274_v23 }
0x1255   :  { %6007 = vpow2.f32 %v4275_v25 }
0x1256   :  { %6009 = vtanh.f32 %v5644_v26 }
0x125d   :  { %v6004_v17 = vpop.eup %6003 }
0x125e   :  { %v6006_v27 = vpop.eup %6005  ;;  %v3789_v29 = vadd.f32 1.0, %v6004_v17 }
0x125f   :  { %v3795_v30 = vadd.f32 1.0, %v6006_v27  ;;  %v6008_v31 = vpop.eup %6007 }
0x1260   :  { %6011 = vrcp.f32 %v3789_v29  ;;  %v6010_v34 = vpop.eup %6009  ;;  %v3802_v53 = vadd.f32 1.0, %v6008_v31 }
0x1261   :  { %6013 = vrcp.f32 %v3795_v30 }
0x1262   :  { %6015 = vrcp.f32 %v3802_v53 }
0x126a   :  { %v6012_v37 = vpop.eup %6011 }
0x126b   :  { %v6014_v48 = vpop.eup %6013  ;;  %v3806_v49 = vmul.f32 %v6012_v37, %v6010_v34 }
0x126c   :  { %v3805_v55 = vmul.f32 %v6014_v48, %v7328_v1  ;;  %v6016_v61 = vpop.eup %6015 }
0x126e   :  { %v7373_v59 = vadd.f32 %v3806_v49, %v3805_v55 }
0x1270   :  { %6017 = vtanh.f32 %v7373_v59 }
0x127a   :  { %v6018_v62 = vpop.eup %6017 }
0x127b   :  { %v3809_v38 = vmul.f32 %v6018_v62, %v6016_v61 }
0x127d   :  { %3810 = vst [vmem:[%s7438_s6 + $0x88] sm:$0xff] %v3809_v38  ;;  %3880 = vmatmul.mubr.f32.vlgmr.msra.gmra.mrb[36].mxu0 %v3809_v38  ;;  %3951 = vmatmul.mubr.f32.vlgmr.msra.gmra.mrb[36].mxu1 %v3809_v38 }
0x127e   :  { %5509 = vmatpush1.bf16.msra.mxu0 %v6140_v19  ;;  %5541 = vmatpush1.bf16.msra.mxu1 %v6184_v33 }
0x127f   :  { %5511 = vmatprep.subr.bf16.mxu0 %v6149_v22  ;;  %5543 = vmatprep.subr.bf16.mxu1 %v6207_v40 }
0x1280   :  { %4054 = vmatprep.mubr.f32.mxu0 %v6051_v3  ;;  %4125 = vmatprep.mubr.f32.mxu1 %v6051_v3 }
0x1282   :  { %5513 = vmatpush1.bf16.msra.mxu0 %v6182_v32  ;;  %5545 = vmatpush1.bf16.msra.mxu1 %v6220_v44 }
0x1283   :  { %5515 = vmatprep.subr.bf16.mxu0 %v6194_v36  ;;  %5547 = vmatprep.subr.bf16.mxu1 %v6253_v54 }
0x1286   :  { %5517 = vmatpush1.bf16.msra.mxu0 %v6230_v47  ;;  %5549 = vmatpush1.bf16.msra.mxu1 %v6266_v58 }
0x1287   :  { %5519 = vmatprep.subr.bf16.mxu0 %v6240_v50  ;;  %5551 = vmatprep.subr.bf16.mxu1 %v6291_v2 }
0x128a   :  { %5521 = vmatpush1.bf16.msra.mxu0 %v6273_v60  ;;  %5553 = vmatpush1.bf16.msra.mxu1 %v6301_v6 }
0x128b   :  { %5523 = vmatprep.subr.bf16.mxu0 %v6286_v0  ;;  %5555 = vmatprep.subr.bf16.mxu1 %v6337_v18 }
0x128e   :  { %5525 = vmatpush1.bf16.msra.mxu0 %v6319_v11  ;;  %5557 = vmatpush1.bf16.msra.mxu1 %v6344_v21 }
0x128f   :  { %5527 = vmatprep.subr.bf16.mxu0 %v6329_v14  ;;  %5559 = vmatprep.subr.bf16.mxu1 %v6386_v39 }
0x1292   :  { %5529 = vmatpush1.bf16.msra.mxu0 %v6365_v28  ;;  %5561 = vmatpush1.bf16.msra.mxu1 %v6390_v41 }
0x1293   :  { %5531 = vmatprep.subr.bf16.mxu0 %v6378_v35  ;;  %5563 = vmatprep.subr.bf16.mxu1 %v6426_v56 }
0x1296   :  { %5533 = vmatpush1.bf16.msra.mxu0 %v6414_v51  ;;  %5565 = vmatpush1.bf16.msra.mxu1 %v6430_v57 }
0x1297   :  { %5535 = vmatprep.subr.bf16.mxu0 %v6418_v52  ;;  %5567 = vmatprep.subr.bf16.mxu1 %v6455_v5 }
0x129a   :  { %5537 = vmatpush1.bf16.msra.mxu0 %v6451_v4  ;;  %5569 = vmatpush1.bf16.msra.mxu1 %v6459_v7 }
0x1350   :  { %v3881_v3 = vpop.f32.mrb[36].mxu0  ;;  %v3952_v19 = vpop.f32.mrb[36].mxu1 }
0x1351   :  { %v5606_v22 = vadd.f32 %v3881_v3, %v6593_v42  ;;  %v3883_v32 = vpop.f32.mrb[37].mxu0  ;;  %v3954_v33 = vpop.f32.mrb[37].mxu1  ;;  %v5646_v54 = vadd.f32 %v3952_v19, %v6602_v9 }
0x1352   :  { %v5607_v36 = vadd.f32 %v3883_v32, %v6595_v43  ;;  %v5647_v47 = vadd.f32 %v3954_v33, %v6599_v63 }
0x1353   :  { %v4276_v40 = vmul.f32 -1.442695, %v5606_v22 }
0x1354   :  { %v4277_v44 = vmul.f32 -1.442695, %v5607_v36  ;;  %v4278_v50 = vmul.f32 -1.442695, %v5647_v47 }
0x1355   :  { %6019 = vpow2.f32 %v4276_v40 }
0x1356   :  { %6021 = vpow2.f32 %v4277_v44 }
0x1357   :  { %6023 = vpow2.f32 %v4278_v50 }
0x1358   :  { %6025 = vtanh.f32 %v5646_v54 }
0x135f   :  { %v6020_v58 = vpop.eup %6019 }
0x1360   :  { %v6022_v60 = vpop.eup %6021  ;;  %v3964_v0 = vadd.f32 1.0, %v6020_v58 }
0x1361   :  { %v3970_v2 = vadd.f32 1.0, %v6022_v60  ;;  %v6024_v6 = vpop.eup %6023 }
0x1362   :  { %6027 = vrcp.f32 %v3964_v0  ;;  %v6026_v11 = vpop.eup %6025  ;;  %v3977_v28 = vadd.f32 1.0, %v6024_v6 }
0x1363   :  { %6029 = vrcp.f32 %v3970_v2 }
0x1364   :  { %6031 = vrcp.f32 %v3977_v28 }
0x136c   :  { %v6028_v14 = vpop.eup %6027 }
0x136d   :  { %v6030_v18 = vpop.eup %6029  ;;  %v3981_v21 = vmul.f32 %v6028_v14, %v6026_v11 }
0x136e   :  { %v3980_v35 = vmul.f32 %v6030_v18, %v7373_v59  ;;  %v6032_v41 = vpop.eup %6031 }
0x1370   :  { %v3982_v39 = vadd.f32 %v3981_v21, %v3980_v35 }
0x1372   :  { %6033 = vtanh.f32 %v3982_v39 }
0x137c   :  { %v6034_v51 = vpop.eup %6033 }
0x137d   :  { %v3984_v52 = vmul.f32 %v6034_v51, %v6032_v41 }
0x137f   :  { %3985 = vst [vmem:[%s7438_s6 + $0x90] sm:$0xff] %v3984_v52  ;;  %4055 = vmatmul.mubr.f32.vlgmr.msra.gmra.mrb[38].mxu0 %v3984_v52  ;;  %4126 = vmatmul.mubr.f32.vlgmr.msra.gmra.mrb[38].mxu1 %v3984_v52 }
0x1452   :  { %v4056_v56 = vpop.f32.mrb[38].mxu0  ;;  %v4127_v57 = vpop.f32.mrb[38].mxu1 }
0x1453   :  { %v5608_v4 = vadd.f32 %v4056_v56, %v6593_v42  ;;  %v4058_v5 = vpop.f32.mrb[39].mxu0  ;;  %v4129_v7 = vpop.f32.mrb[39].mxu1  ;;  %v5648_v12 = vadd.f32 %v4127_v57, %v6602_v9 }
0x1454   :  { %v5609_v1 = vadd.f32 %v4058_v5, %v6595_v43  ;;  %v5649_v8 = vadd.f32 %v4129_v7, %v6599_v63 }
0x1455   :  { %v4279_v45 = vmul.f32 -1.442695, %v5608_v4 }
0x1456   :  { %v4280_v46 = vmul.f32 -1.442695, %v5609_v1  ;;  %v4281_v10 = vmul.f32 -1.442695, %v5649_v8 }
0x1457   :  { %6035 = vpow2.f32 %v4279_v45 }
0x1458   :  { %6037 = vpow2.f32 %v4280_v46 }
0x1459   :  { %6039 = vpow2.f32 %v4281_v10 }
0x145a   :  { %6041 = vtanh.f32 %v5648_v12 }
0x1461   :  { %v6036_v13 = vpop.eup %6035 }
0x1462   :  { %v6038_v15 = vpop.eup %6037  ;;  %v4139_v16 = vadd.f32 1.0, %v6036_v13 }
0x1463   :  { %v4145_v20 = vadd.f32 1.0, %v6038_v15  ;;  %v6040_v42 = vpop.eup %6039 }
0x1464   :  { %6043 = vrcp.f32 %v4139_v16  ;;  %v6042_v23 = vpop.eup %6041  ;;  %v4152_v26 = vadd.f32 1.0, %v6040_v42 }
0x1465   :  { %6045 = vrcp.f32 %v4145_v20 }
0x1466   :  { %6047 = vrcp.f32 %v4152_v26 }
0x146e   :  { %v6044_v43 = vpop.eup %6043 }
0x146f   :  { %v6046_v24 = vpop.eup %6045  ;;  %v4156_v25 = vmul.f32 %v6044_v43, %v6042_v23 }
0x1470   :  { %v4155_v17 = vmul.f32 %v6046_v24, %v3982_v39  ;;  %v6048_v63 = vpop.eup %6047 }
0x1472   :  { %v4157_v27 = vadd.f32 %v4156_v25, %v4155_v17 }
0x1474   :  { %6049 = vtanh.f32 %v4157_v27  ;;  %4169 = vst [vmem:[%s7439_s8] sm:$0xff] %v4157_v27 }
0x147e   :  { %v6050_v9 = vpop.eup %6049 }
0x147f   :  { %v4159_v29 = vmul.f32 %v6050_v9, %v6048_v63 }
0x1481   :  { %4160 = vst [vmem:[%s7438_s6 + $0x98] sm:$0xff] %v4159_v29  ;;  %4167 = vst [vmem:[%s7440_s7] sm:$0xff] %v4159_v29 }

</bundles_post_ra>
